<compile_context>
chip_gen: v6e
topology: v6e:2x2x1
jax: 0.10.0
libtpu: 0.0.40
codegen_flags: <defaults>
</compile_context>

<pallas_src>
import jax
import jax.numpy as jnp
from jax.experimental import pallas as pl
from jax.experimental.pallas import tpu as pltpu

IN_FEATURES = 256 * 25   # 6400
HIDDEN = 256
OUT = 1
OUT_LANES = 128          # lane-dense output slab width (unmasked vst)
NEG_SLOPE = 0.2


def _leaky_relu(x, slope):
    return jnp.where(x > 0, x, slope * x)


def mlp_kernel(x_ref, w1_ref, b1_ref, w2_ref, b2_ref, w3_ref, b3_ref, o_ref):
    # x:  (tb, 6400) f32 (cast to bf16 in-kernel)   w1: (6400, 256) bf16
    # b1: (1, 256) f32                              w2: (256, 256) bf16
    # b2: (1, 256) f32                              w3: (256, 128) bf16 (col 0 real)
    # b3: (1, 1) f32 in SMEM                        o:  (tb, 128) bf16 (col 0 consumed)

    # In-kernel f32 -> bf16 cast of the x tile (cheap VPU work hidden under the
    # MXU) instead of a separate wrapper cast pass over HBM.
    x = x_ref[...].astype(jnp.bfloat16)

    # Layer 1: bf16 MXU matmul, f32 accumulate; elementwise in f32.
    h = jnp.dot(x, w1_ref[...], preferred_element_type=jnp.float32) + b1_ref[...]
    h = _leaky_relu(h, NEG_SLOPE)

    # Layer 2: cast activation to bf16 for the MXU, accumulate in f32.
    h = jnp.dot(h.astype(jnp.bfloat16), w2_ref[...],
                preferred_element_type=jnp.float32) + b2_ref[...]
    h = _leaky_relu(h, NEG_SLOPE)

    # Layer 3 (256 -> 1) on the MXU against zero-padded (256, 128) w3: column 0
    # holds the real logit, the rest is discarded by the wrapper.  Avoids the
    # XLU cross-lane reduction and the broadcast_to.
    z = jnp.dot(h.astype(jnp.bfloat16), w3_ref[...],
                preferred_element_type=jnp.float32) + b3_ref[0, 0]

    # Lane-dense bf16 write (unmasked vst); wrapper slices column 0.
    o_ref[...] = jax.nn.sigmoid(z).astype(o_ref.dtype)


def discriminator1_forward(img, params, *, batch_tile=None):
    """img: (B, 256, 5, 5) float32 (NCHW). Returns (B, 1) validity scores."""
    B = img.shape[0]
    x = img.reshape(B, -1).astype(jnp.float32)  # same as torch .view(B, -1)
    assert x.shape[1] == IN_FEATURES

    w1, b1, w2, b2, w3, b3 = params

    # Tile selection:
    #   * B <= 256: single full-dim block (block rows == array rows satisfies
    #     the (8,128) rule) -> no padded rows are DMA'd or matmul'd.
    #   * 256 < B < 1024: tb=256 -> >=2 grid steps (keeps both v7x TCs busy).
    #   * B >= 1024: tb=512 (fits v7x's 64 MiB VMEM with f32 x tiles).
    #   On v5e/v6e (128 MiB VMEM) batch_tile=1024 can be passed explicitly;
    #   the VMEM limit below scales with it.
    if batch_tile is None:
        if B <= 256:
            tb = B
        elif B < 1024:
            tb = 256
        else:
            tb = 512
    else:
        tb = batch_tile

    grid = (pl.cdiv(B, tb),)  # ragged last block handled by Pallas (no jnp.pad)

    # Weights: bf16 for the MXU, biases in f32.  w3 (256,1) is zero-padded to
    # (256,128) so layer 3 is a tiny MXU matmul that emits the output slab.
    w1_bf16 = w1.astype(jnp.bfloat16)
    w2_bf16 = w2.astype(jnp.bfloat16)
    w3_pad = (jnp.zeros((HIDDEN, OUT_LANES), jnp.float32)
              .at[:, :OUT].set(w3.reshape(HIDDEN, OUT))
              .astype(jnp.bfloat16))
    b1_row = b1.reshape(1, HIDDEN).astype(jnp.float32)
    b2_row = b2.reshape(1, HIDDEN).astype(jnp.float32)
    b3_s = b3.reshape(1, 1).astype(jnp.float32)

    # VMEM budget: double-buffered f32 x tiles + in-kernel bf16 temp + weights
    # (double-buffered by default; still fits comfortably) + out slab + slack.
    weight_bytes = (IN_FEATURES * HIDDEN + HIDDEN * HIDDEN
                    + HIDDEN * OUT_LANES) * 2
    vmem_bytes = (2 * tb * IN_FEATURES * 4        # x tiles (f32, double-buffered)
                  + tb * IN_FEATURES * 2          # in-kernel bf16 cast temp
                  + 2 * tb * OUT_LANES * 2        # out tiles (bf16)
                  + 2 * weight_bytes              # resident weights
                  + (6 << 20))                    # slack / internal scratch
    vmem_limit = int(max(32 << 20, vmem_bytes))

    cost = pl.CostEstimate(
        flops=2 * B * (IN_FEATURES * HIDDEN + HIDDEN * HIDDEN + HIDDEN * OUT_LANES),
        transcendentals=B * OUT_LANES,
        bytes_accessed=(B * IN_FEATURES * 4        # x read (f32, single pass)
                        + B * OUT_LANES * 2        # bf16 slab writeback
                        + weight_bytes + 2 * HIDDEN * 4 + 4),
    )

    out = pl.pallas_call(
        mlp_kernel,
        out_shape=jax.ShapeDtypeStruct((B, OUT_LANES), jnp.bfloat16),
        grid=grid,
        in_specs=[
            pl.BlockSpec((tb, IN_FEATURES), lambda i: (i, 0)),            # x tile (f32)
            pl.BlockSpec((IN_FEATURES, HIDDEN), lambda i: (0, 0)),        # w1 resident
            pl.BlockSpec((1, HIDDEN), lambda i: (0, 0)),                  # b1 resident
            pl.BlockSpec((HIDDEN, HIDDEN), lambda i: (0, 0)),             # w2 resident
            pl.BlockSpec((1, HIDDEN), lambda i: (0, 0)),                  # b2 resident
            pl.BlockSpec((HIDDEN, OUT_LANES), lambda i: (0, 0)),          # w3 padded, resident
            pl.BlockSpec((1, 1), lambda i: (0, 0),
                         memory_space=pltpu.MemorySpace.SMEM),            # b3 scalar
        ],
        out_specs=pl.BlockSpec((tb, OUT_LANES), lambda i: (i, 0)),
        compiler_params=pltpu.CompilerParams(
            dimension_semantics=("parallel",),   # shard batch tiles across TCs (v7x)
            vmem_limit_bytes=vmem_limit,
        ),
        cost_estimate=cost,
    )(x, w1_bf16, b1_row, w2_bf16, b2_row, w3_pad, b3_s)

    # Only column 0 of the lane-dense slab is the real score; everything else
    # (including any ragged-block rows) is discarded here.
    return out[:, :OUT].astype(jnp.float32)


def init_params(key):
    """Deterministic init mimicking PyTorch nn.Linear defaults:
       U(-1/sqrt(fan_in), 1/sqrt(fan_in)) for weight and bias.
       Weights are stored transposed (in, out) so the kernel does x @ W."""
    ks = jax.random.split(key, 6)

    def linear(kw, kb, fan_in, fan_out):
        bound = 1.0 / jnp.sqrt(jnp.float32(fan_in))
        w = jax.random.uniform(kw, (fan_in, fan_out), jnp.float32, -bound, bound)
        b = jax.random.uniform(kb, (1, fan_out), jnp.float32, -bound, bound)
        return w, b

    w1, b1 = linear(ks[0], ks[1], IN_FEATURES, HIDDEN)
    w2, b2 = linear(ks[2], ks[3], HIDDEN, HIDDEN)
    w3, b3 = linear(ks[4], ks[5], HIDDEN, OUT)
    return (w1, b1, w2, b2, w3, b3)


def reference_forward(img, params):
    """Pure-JAX f32 reference of the same forward pass for a correctness check."""
    w1, b1, w2, b2, w3, b3 = params
    x = img.reshape(img.shape[0], -1).astype(jnp.float32)
    h = _leaky_relu(x @ w1 + b1, NEG_SLOPE)
    h = _leaky_relu(h @ w2 + b2, NEG_SLOPE)
    return jax.nn.sigmoid(h @ w3 + b3)


if __name__ == "__main__":
    key = jax.random.PRNGKey(0)
    k_img, k_params = jax.random.split(key)

    # Input consistent with Linear(256*25, ...): (B, 256, 5, 5) in NCHW.
    B = 2
    img = jax.random.normal(k_img, (B, 256, 5, 5), dtype=jnp.float32)

    params = init_params(k_params)

    out = discriminator1_forward(img, params)
    out = jax.block_until_ready(out)

    ref = reference_forward(img, params)
    assert out.shape == (B, 1)
    # bf16 matmul inputs + bf16 output slab loosen the tolerance vs. the f32
    # reference (fine for a GAN discriminator score in (0, 1)).
    assert jnp.allclose(out, ref, atol=2e-2, rtol=2e-2), (out, ref)

    print("KERNEL_OK")
</pallas_src>

<mosaic_0001>
module attributes {stable_mosaic.version = 11 : i64} {
  func.func @mlp_kernel(%arg0: i32, %arg1: memref<2x6400xf32, #tpu.memory_space<vmem>>, %arg2: memref<6400x256xbf16, #tpu.memory_space<vmem>>, %arg3: memref<1x256xf32, #tpu.memory_space<vmem>>, %arg4: memref<256x256xbf16, #tpu.memory_space<vmem>>, %arg5: memref<1x256xf32, #tpu.memory_space<vmem>>, %arg6: memref<256x128xbf16, #tpu.memory_space<vmem>>, %arg7: memref<1x1xf32, #tpu.memory_space<smem>>, %arg8: memref<2x128xbf16, #tpu.memory_space<vmem>>) attributes {dimension_semantics = [#tpu.dimension_semantics<parallel>], iteration_bounds = array<i64: 1>, scalar_prefetch = 0 : i64, scratch_operands = 0 : i64, tpu.core_type = #tpu.core_type<tc>, window_params = [{transform_indices = @transform_0, window_bounds = array<i64: 2, 6400>}, {pipeline_mode = #tpu.pipeline_mode<synchronous>, transform_indices = @transform_1, window_bounds = array<i64: 6400, 256>}, {pipeline_mode = #tpu.pipeline_mode<synchronous>, transform_indices = @transform_2, window_bounds = array<i64: 1, 256>}, {pipeline_mode = #tpu.pipeline_mode<synchronous>, transform_indices = @transform_3, window_bounds = array<i64: 256, 256>}, {pipeline_mode = #tpu.pipeline_mode<synchronous>, transform_indices = @transform_4, window_bounds = array<i64: 1, 256>}, {pipeline_mode = #tpu.pipeline_mode<synchronous>, transform_indices = @transform_5, window_bounds = array<i64: 256, 128>}, {transform_indices = @transform_6, window_bounds = array<i64: 1, 1>}, {transform_indices = @transform_7, window_bounds = array<i64: 2, 128>}]} {
    %c0 = arith.constant 0 : index
    %c0_0 = arith.constant 0 : index
    %0 = vector.load %arg1[%c0, %c0_0] : memref<2x6400xf32, #tpu.memory_space<vmem>>, vector<2x6400xf32>
    %1 = arith.truncf %0 : vector<2x6400xf32> to vector<2x6400xbf16>
    %c0_1 = arith.constant 0 : index
    %c0_2 = arith.constant 0 : index
    %2 = vector.load %arg2[%c0_1, %c0_2] : memref<6400x256xbf16, #tpu.memory_space<vmem>>, vector<6400x256xbf16>
    %cst = arith.constant dense<0.000000e+00> : vector<2x256xf32>
    %3 = tpu.matmul %1, %2, %cst {dimension_numbers = #tpu.dot_dimension_numbers<[1], [0], [0], [1], [0, 0, 1, 1], [], []>} : vector<2x6400xbf16>, vector<6400x256xbf16>, vector<2x256xf32> -> vector<2x256xf32>
    %c0_3 = arith.constant 0 : index
    %c0_4 = arith.constant 0 : index
    %4 = vector.load %arg3[%c0_3, %c0_4] : memref<1x256xf32, #tpu.memory_space<vmem>>, vector<1x256xf32>
    %5 = vector.broadcast %4 : vector<1x256xf32> to vector<2x256xf32>
    %6 = arith.addf %3, %5 : vector<2x256xf32>
    %cst_5 = arith.constant 0.000000e+00 : f32
    %7 = vector.broadcast %cst_5 : f32 to vector<2x256xf32>
    %8 = arith.cmpf ogt, %6, %7 : vector<2x256xf32>
    %cst_6 = arith.constant 2.000000e-01 : f32
    %9 = vector.broadcast %cst_6 : f32 to vector<2x256xf32>
    %10 = arith.mulf %9, %6 : vector<2x256xf32>
    %11 = arith.select %8, %6, %10 : vector<2x256xi1>, vector<2x256xf32>
    %12 = arith.truncf %11 : vector<2x256xf32> to vector<2x256xbf16>
    %c0_7 = arith.constant 0 : index
    %c0_8 = arith.constant 0 : index
    %13 = vector.load %arg4[%c0_7, %c0_8] : memref<256x256xbf16, #tpu.memory_space<vmem>>, vector<256x256xbf16>
    %cst_9 = arith.constant dense<0.000000e+00> : vector<2x256xf32>
    %14 = tpu.matmul %12, %13, %cst_9 {dimension_numbers = #tpu.dot_dimension_numbers<[1], [0], [0], [1], [0, 0, 1, 1], [], []>} : vector<2x256xbf16>, vector<256x256xbf16>, vector<2x256xf32> -> vector<2x256xf32>
    %c0_10 = arith.constant 0 : index
    %c0_11 = arith.constant 0 : index
    %15 = vector.load %arg5[%c0_10, %c0_11] : memref<1x256xf32, #tpu.memory_space<vmem>>, vector<1x256xf32>
    %16 = vector.broadcast %15 : vector<1x256xf32> to vector<2x256xf32>
    %17 = arith.addf %14, %16 : vector<2x256xf32>
    %cst_12 = arith.constant 0.000000e+00 : f32
    %18 = vector.broadcast %cst_12 : f32 to vector<2x256xf32>
    %19 = arith.cmpf ogt, %17, %18 : vector<2x256xf32>
    %cst_13 = arith.constant 2.000000e-01 : f32
    %20 = vector.broadcast %cst_13 : f32 to vector<2x256xf32>
    %21 = arith.mulf %20, %17 : vector<2x256xf32>
    %22 = arith.select %19, %17, %21 : vector<2x256xi1>, vector<2x256xf32>
    %23 = arith.truncf %22 : vector<2x256xf32> to vector<2x256xbf16>
    %c0_14 = arith.constant 0 : index
    %c0_15 = arith.constant 0 : index
    %24 = vector.load %arg6[%c0_14, %c0_15] : memref<256x128xbf16, #tpu.memory_space<vmem>>, vector<256x128xbf16>
    %cst_16 = arith.constant dense<0.000000e+00> : vector<2x128xf32>
    %25 = tpu.matmul %23, %24, %cst_16 {dimension_numbers = #tpu.dot_dimension_numbers<[1], [0], [0], [1], [0, 0, 1, 1], [], []>} : vector<2x256xbf16>, vector<256x128xbf16>, vector<2x128xf32> -> vector<2x128xf32>
    %c0_17 = arith.constant 0 : index
    %c0_18 = arith.constant 0 : index
    %26 = memref.load %arg7[%c0_17, %c0_18] : memref<1x1xf32, #tpu.memory_space<smem>>
    %27 = vector.broadcast %26 : f32 to vector<2x128xf32>
    %28 = arith.addf %25, %27 : vector<2x128xf32>
    %29 = arith.negf %28 : vector<2x128xf32>
    %30 = math.exp %29 : vector<2x128xf32>
    %cst_19 = arith.constant 1.000000e+00 : f32
    %31 = vector.broadcast %cst_19 : f32 to vector<2x128xf32>
    %32 = arith.addf %31, %30 : vector<2x128xf32>
    %33 = arith.divf %31, %32 : vector<2x128xf32>
    %34 = arith.truncf %33 : vector<2x128xf32> to vector<2x128xbf16>
    %c0_20 = arith.constant 0 : index
    %c0_21 = arith.constant 0 : index
    %35 = vector.load %arg8[%c0_20, %c0_21] : memref<2x128xbf16, #tpu.memory_space<vmem>>, vector<2x128xbf16>
    tpu.vector_store %arg8[%c0_20, %c0_21], %34 {strides = array<i32>} : memref<2x128xbf16, #tpu.memory_space<vmem>>, vector<2x128xbf16>,
    return
  }
  func.func @transform_0(%arg0: i32) -> (i32, i32) {
    %c0_i32 = arith.constant 0 : i32
    %c0_i32_0 = arith.constant 0 : i32
    return %arg0, %c0_i32 : i32, i32
  }
  func.func @transform_1(%arg0: i32) -> (i32, i32) {
    %c0_i32 = arith.constant 0 : i32
    %c0_i32_0 = arith.constant 0 : i32
    %c0_i32_1 = arith.constant 0 : i32
    return %c0_i32, %c0_i32_0 : i32, i32
  }
  func.func @transform_2(%arg0: i32) -> (i32, i32) {
    %c0_i32 = arith.constant 0 : i32
    %c0_i32_0 = arith.constant 0 : i32
    %c0_i32_1 = arith.constant 0 : i32
    return %c0_i32, %c0_i32_0 : i32, i32
  }
  func.func @transform_3(%arg0: i32) -> (i32, i32) {
    %c0_i32 = arith.constant 0 : i32
    %c0_i32_0 = arith.constant 0 : i32
    %c0_i32_1 = arith.constant 0 : i32
    return %c0_i32, %c0_i32_0 : i32, i32
  }
  func.func @transform_4(%arg0: i32) -> (i32, i32) {
    %c0_i32 = arith.constant 0 : i32
    %c0_i32_0 = arith.constant 0 : i32
    %c0_i32_1 = arith.constant 0 : i32
    return %c0_i32, %c0_i32_0 : i32, i32
  }
  func.func @transform_5(%arg0: i32) -> (i32, i32) {
    %c0_i32 = arith.constant 0 : i32
    %c0_i32_0 = arith.constant 0 : i32
    %c0_i32_1 = arith.constant 0 : i32
    return %c0_i32, %c0_i32_0 : i32, i32
  }
  func.func @transform_6(%arg0: i32) -> (i32, i32) {
    %c0_i32 = arith.constant 0 : i32
    %c0_i32_0 = arith.constant 0 : i32
    %c0_i32_1 = arith.constant 0 : i32
    return %c0_i32, %c0_i32_0 : i32, i32
  }
  func.func @transform_7(%arg0: i32) -> (i32, i32) {
    %c0_i32 = arith.constant 0 : i32
    %c0_i32_0 = arith.constant 0 : i32
    return %arg0, %c0_i32 : i32, i32
  }
}

</mosaic_0001>

<bundles_post_ra>
// kernel: tpu_custom_call.1
= control target key start
LH: loop header
LB: loop body
LE: loop exit
PB: predicated region body
PF: predicated region fallthrough
CT: control target
= control target key end

     0   :  { %13 = vsyncpa [#allocation4], 0  ;;  %s9364_s0 = inlined_call_operand.hbm [shape: f32[2,6400], index: 0, kind: input, shape index: {}]   ;;  %s9365_s1 = inlined_call_operand.hbm [shape: bf16[6400,256], index: 1, kind: input, shape index: {}]   ;;  %s9366_s2 = inlined_call_operand.hbm [shape: f32[1,256], index: 2, kind: input, shape index: {}]   ;;  %s9367_s3 = inlined_call_operand.hbm [shape: bf16[256,256], index: 3, kind: input, shape index: {}]   ;;  %s9368_s4 = inlined_call_operand.hbm [shape: f32[1,256], index: 4, kind: input, shape index: {}]   ;;  %s9369_s5 = inlined_call_operand.hbm [shape: bf16[256,128], index: 5, kind: input, shape index: {}]   ;;  %s9370_s6 = inlined_call_operand.<no memory space> [shape: f32[1,1], index: 6, kind: input, shape index: {}]   ;;  %s9371_s7 = inlined_call_operand.hbm [shape: bf16[2,128], index: 7, kind: output, shape index: {}]  }
   0x1   :  { %14 = vsyncpa [#allocation7], 0 }
   0x2   :  { %15 = vsyncpa [#allocation10], 0 }
   0x3   :  { %16 = vsyncpa [#allocation13], 0 }
   0x4   :  { %17 = vsyncpa [#allocation5], 0  ;;  %s9051_s24 = smov [#allocation6]  }
   0x5   :  { %s33_s25 = sshll.u32 %s9051_s24, 4  ;;  %s34_s25 = int_to_ptr.vmem [resolvable:$true] %s33_s25 }
   0x6   :  { %s8909_s26 = scalar_lea.vmem %s34_s25, 102400  ;;  %p8914_p1 = scmp.lt.s32.totalorder %s34_s25, %s34_s25 }
   0x7   :  { %p8910_p0 = scmp.ne.s32.totalorder %s34_s25, %s8909_s26  ;;  %p8915_p2 = scmp.lt.s32.totalorder %s8909_s26, %s8909_s26 }
   0x9   :  { %p8916_p3 = por %p8915_p2, %p8914_p1 }
   0xb   :  { %p8917_p4 = pnand %p8916_p3, %p8910_p0 }
   0xd   :  { %8920 = shalt.err (!%p8917_p4)
}
   0xe   :  { %s9052_s27 = smov 128   ;;  %s9053_s28 = smov 8  }
   0xf   :  { %39 = dma.hbm_to_vmem [thread:$0]  %s9365_s1, 102400, %s34_s25, [#allocation7], %s9052_s27, %s9052_s27, %s9053_s28  }
  0x10   :  { %s9054_s8 = smov [#allocation9]   ;;  %s9055_s10 = smov [#allocation3]  }
  0x11   :  { %s55_s9 = sshll.u32 %s9054_s8, 4  ;;  %s24_s11 = sshll.u32 %s9055_s10, 4  ;;  %s56_s9 = int_to_ptr.vmem [resolvable:$true] %s55_s9  ;;  %s25_s11 = int_to_ptr.vmem [resolvable:$true] %s24_s11 }
  0x12   :  { %s8929_s12 = scalar_lea.vmem %s56_s9, 4096  ;;  %p8934_p6 = scmp.lt.s32.totalorder %s56_s9, %s56_s9 }
  0x13   :  { %p8930_p5 = scmp.ne.s32.totalorder %s56_s9, %s8929_s12  ;;  %p8935_p7 = scmp.lt.s32.totalorder %s8929_s12, %s8929_s12 }
  0x15   :  { %p8936_p8 = por %p8935_p7, %p8934_p6 }
  0x17   :  { %p8937_p9 = pnand %p8936_p8, %p8930_p5 }
  0x19   :  { %8940 = shalt.err (!%p8937_p9)
}
  0x1a   :  { %61 = dma.hbm_to_vmem [thread:$0]  %s9367_s3, 4096, %s56_s9, [#allocation10], %s9052_s27, %s9052_s27, %s9053_s28  }
  0x1b   :  { %s8949_s15 = scalar_lea.vmem %s25_s11, 1600  ;;  %p8954_p11 = scmp.lt.s32.totalorder %s25_s11, %s25_s11 }
  0x1c   :  { %p8950_p10 = scmp.ne.s32.totalorder %s25_s11, %s8949_s15  ;;  %p8955_p12 = scmp.lt.s32.totalorder %s8949_s15, %s8949_s15 }
  0x1e   :  { %p8956_p13 = por %p8955_p12, %p8954_p11 }
  0x20   :  { %p8957_p0 = pnand %p8956_p13, %p8950_p10 }
  0x22   :  { %8960 = shalt.err (!%p8957_p0)
}
  0x23   :  { %27 = dma.hbm_to_vmem [thread:$0]  %s9364_s0, 1600, %s25_s11, [#allocation4]  }
  0x24   :  { %s9056_s17 = smov [#allocation8]   ;;  %s9057_s19 = smov [#allocation11]  }
  0x25   :  { %s46_s18 = sshll.u32 %s9056_s17, 4  ;;  %s68_s20 = sshll.u32 %s9057_s19, 4  ;;  %s47_s18 = int_to_ptr.vmem [resolvable:$true] %s46_s18  ;;  %s69_s20 = int_to_ptr.vmem [resolvable:$true] %s68_s20 }
  0x26   :  { %s8969_s21 = scalar_lea.vmem %s47_s18, 32  ;;  %p8974_p2 = scmp.lt.s32.totalorder %s47_s18, %s47_s18 }
  0x27   :  { %p8970_p1 = scmp.ne.s32.totalorder %s47_s18, %s8969_s21  ;;  %p8975_p3 = scmp.lt.s32.totalorder %s8969_s21, %s8969_s21 }
  0x29   :  { %p8976_p4 = por %p8975_p3, %p8974_p2 }
  0x2b   :  { %p8977_p5 = pnand %p8976_p4, %p8970_p1 }
  0x2d   :  { %8980 = shalt.err (!%p8977_p5)
}
  0x2e   :  { %49 = dma.hbm_to_vmem [thread:$0]  %s9366_s2, 32, %s47_s18, [#allocation7]  }
  0x2f   :  { %s8989_s23 = scalar_lea.vmem %s69_s20, 32  ;;  %p8994_p7 = scmp.lt.s32.totalorder %s69_s20, %s69_s20 }
  0x30   :  { %p8990_p6 = scmp.ne.s32.totalorder %s69_s20, %s8989_s23  ;;  %p8995_p8 = scmp.lt.s32.totalorder %s8989_s23, %s8989_s23 }
  0x32   :  { %p8996_p9 = por %p8995_p8, %p8994_p7 }
  0x34   :  { %p8997_p10 = pnand %p8996_p9, %p8990_p6 }
  0x36   :  { %9000 = shalt.err (!%p8997_p10)
}
  0x37   :  { %71 = dma.hbm_to_vmem [thread:$0]  %s9368_s4, 32, %s69_s20, [#allocation10]  }
  0x38   :  { %s9058_s25 = smov [#allocation12]  }
  0x39   :  { %s77_s26 = sshll.u32 %s9058_s25, 4  ;;  %s78_s26 = int_to_ptr.vmem [resolvable:$true] %s77_s26 }
  0x3a   :  { %s9009_s27 = scalar_lea.vmem %s78_s26, 2048  ;;  %p9014_p12 = scmp.lt.s32.totalorder %s78_s26, %s78_s26 }
  0x3b   :  { %p9010_p11 = scmp.ne.s32.totalorder %s78_s26, %s9009_s27  ;;  %p9015_p13 = scmp.lt.s32.totalorder %s9009_s27, %s9009_s27 }
  0x3d   :  { %p9016_p0 = por %p9015_p13, %p9014_p12 }
  0x3f   :  { %p9017_p1 = pnand %p9016_p0, %p9010_p11 }
  0x41   :  { %9020 = shalt.err (!%p9017_p1)
}
  0x42   :  { %s9059_s2 = smov 64   ;;  %s9060_s28 = smov 4  }
  0x43   :  { %83 = dma.hbm_to_vmem [thread:$0]  %s9369_s5, 2048, %s78_s26, [#allocation13], %s9059_s2, %s9059_s2, %s9060_s28  }
  0x44   :  { %9041 = dma.done.wait [#allocation4], 1600  }
  0x45   :  { %9042 = vsyncadd [#allocation4], 4294965696 }
  0x46   :  { %9043 = dma.done.wait [#allocation7], 102432  }
  0x47   :  { %9044 = vsyncadd [#allocation7], 4294864864 }
  0x48   :  { %9045 = dma.done.wait [#allocation10], 4128  }
  0x49   :  { %9046 = vsyncadd [#allocation10], 4294963168 }
  0x4a   :  { %9047 = dma.done.wait [#allocation13], 2048  }
  0x4b   :  { %9048 = vsyncadd [#allocation13], 4294965248  ;;  %v7621_v0 = vld [vmem:[#allocation6 + $0x74] ss:$8 sps:$4 sm:$0xff]   ;;  %v7623_v1 = vld [vmem:[#allocation6 + $0x70] ss:$8 sps:$4 sm:$0xff]   ;;  %v135_v37 = vlaneseq }
  0x4c   :  { %5255 = vmatprep.subr.bf16.mxu0 %v7621_v0  ;;  %v7624_v2 = vld [vmem:[#allocation6 + $0x174] ss:$8 sps:$4 sm:$0xff]   ;;  %v7626_v3 = vld [vmem:[#allocation6 + $0x170] ss:$8 sps:$4 sm:$0xff]   ;;  %v7627_v4 = vld [vmem:[#allocation6 + $0x64] ss:$8 sps:$4 sm:$0xff]  }
  0x4d   :  { %5256 = vmatpush1.bf16.msra.mxu0 %v7623_v1  ;;  %v7629_v5 = vld [vmem:[#allocation6 + $0x60] ss:$8 sps:$4 sm:$0xff]   ;;  %5296 = vmatprep.subr.bf16.mxu1 %v7624_v2  ;;  %v7630_v6 = vld [vmem:[#allocation6 + $0x164] ss:$8 sps:$4 sm:$0xff]   ;;  %v7633_v8 = vld [vmem:[#allocation6 + $0x54] ss:$8 sps:$4 sm:$0xff]  }
  0x4e   :  { %5297 = vmatpush1.bf16.msra.mxu1 %v7626_v3  ;;  %5257 = vmatprep.subr.bf16.mxu0 %v7627_v4  ;;  %v7632_v7 = vld [vmem:[#allocation6 + $0x160] ss:$8 sps:$4 sm:$0xff]   ;;  %v7635_v9 = vld [vmem:[#allocation6 + $0x50] ss:$8 sps:$4 sm:$0xff]   ;;  %v7636_v10 = vld [vmem:[#allocation6 + $0x154] ss:$8 sps:$4 sm:$0xff]  }
  0x4f   :  { %5298 = vmatprep.subr.bf16.mxu1 %v7630_v6  ;;  %v7639_v11 = vld [vmem:[#allocation6 + $0x44] ss:$8 sps:$4 sm:$0xff]   ;;  %v7638_v12 = vld [vmem:[#allocation6 + $0x150] ss:$8 sps:$4 sm:$0xff]   ;;  %v7641_v14 = vld [vmem:[#allocation6 + $0x40] ss:$8 sps:$4 sm:$0xff]  }
  0x50   :  { %v7642_v13 = vld [vmem:[#allocation6 + $0x144] ss:$8 sps:$4 sm:$0xff]   ;;  %v7645_v15 = vld [vmem:[#allocation6 + $0x34] ss:$8 sps:$4 sm:$0xff]   ;;  %v7644_v16 = vld [vmem:[#allocation6 + $0x140] ss:$8 sps:$4 sm:$0xff]  }
  0x51   :  { %5258 = vmatpush1.bf16.msra.mxu0 %v7629_v5  ;;  %v7648_v17 = vld [vmem:[#allocation6 + $0x134] ss:$8 sps:$4 sm:$0xff]   ;;  %v7647_v18 = vld [vmem:[#allocation6 + $0x30] ss:$8 sps:$4 sm:$0xff]   ;;  %v7651_v19 = vld [vmem:[#allocation6 + $0x24] ss:$8 sps:$4 sm:$0xff]  }
  0x52   :  { %5259 = vmatprep.subr.bf16.mxu0 %v7633_v8  ;;  %5299 = vmatpush1.bf16.msra.mxu1 %v7632_v7  ;;  %v7650_v20 = vld [vmem:[#allocation6 + $0x130] ss:$8 sps:$4 sm:$0xff]   ;;  %v7654_v21 = vld [vmem:[#allocation6 + $0x124] ss:$8 sps:$4 sm:$0xff]   ;;  %v7653_v22 = vld [vmem:[#allocation6 + $0x20] ss:$8 sps:$4 sm:$0xff]  }
  0x53   :  { %5300 = vmatprep.subr.bf16.mxu1 %v7636_v10  ;;  %v7657_v23 = vld [vmem:[#allocation6 + $0x14] ss:$8 sps:$4 sm:$0xff]   ;;  %v7656_v24 = vld [vmem:[#allocation6 + $0x120] ss:$8 sps:$4 sm:$0xff]   ;;  %v7659_v26 = vld [vmem:[#allocation6 + $0x10] ss:$8 sps:$4 sm:$0xff]  }
  0x54   :  { %v7660_v25 = vld [vmem:[#allocation6 + $0x114] ss:$8 sps:$4 sm:$0xff]   ;;  %v7663_v27 = vld [vmem:[#allocation6 + $0x4] ss:$8 sps:$4 sm:$0xff]   ;;  %v7662_v28 = vld [vmem:[#allocation6 + $0x110] ss:$8 sps:$4 sm:$0xff]  }
  0x55   :  { %5260 = vmatpush1.bf16.msra.mxu0 %v7635_v9  ;;  %v7666_v29 = vld [vmem:[#allocation6 + $0x104] ss:$8 sps:$4 sm:$0xff]   ;;  %v7665_v30 = vld [vmem:[#allocation6] ss:$8 sps:$4 sm:$0xff]   ;;  %v7669_v31 = vld [vmem:[#allocation6 + $0xf4] ss:$8 sps:$4 sm:$0xff]  }
  0x56   :  { %5261 = vmatprep.subr.bf16.mxu0 %v7639_v11  ;;  %5301 = vmatpush1.bf16.msra.mxu1 %v7638_v12  ;;  %v7668_v32 = vld [vmem:[#allocation6 + $0x100] ss:$8 sps:$4 sm:$0xff]   ;;  %v7672_v33 = vld [vmem:[#allocation6 + $0x1f4] ss:$8 sps:$4 sm:$0xff]   ;;  %v7671_v34 = vld [vmem:[#allocation6 + $0xf0] ss:$8 sps:$4 sm:$0xff]  }
  0x57   :  { %5302 = vmatprep.subr.bf16.mxu1 %v7642_v13  ;;  %v9061_v35 = vmov 1983009808   ;;  %v7675_v38 = vld [vmem:[#allocation6 + $0xe4] ss:$8 sps:$4 sm:$0xff]   ;;  %v7674_v39 = vld [vmem:[#allocation6 + $0x1f0] ss:$8 sps:$4 sm:$0xff]  }
  0x58   :  { %v133_v36 = vunpack.c.l.s4 %v9061_v35  ;;  %v7678_v40 = vld [vmem:[#allocation6 + $0x1e4] ss:$8 sps:$4 sm:$0xff]   ;;  %v7677_v41 = vld [vmem:[#allocation6 + $0xe0] ss:$8 sps:$4 sm:$0xff]   ;;  %v9121_v43 = vshrl.u32 %v135_v37, 7  ;;  %s9062_s8 = smov [#allocation14]  }
  0x59   :  { %5262 = vmatpush1.bf16.msra.mxu0 %v7641_v14  ;;  %v7681_v44 = vld [vmem:[#allocation6 + $0xd4] ss:$8 sps:$4 sm:$0xff]   ;;  %v7680_v45 = vld [vmem:[#allocation6 + $0x1e0] ss:$8 sps:$4 sm:$0xff]   ;;  %v7683_v47 = vld [vmem:[#allocation6 + $0xd0] ss:$8 sps:$4 sm:$0xff]  }
  0x5a   :  { %5263 = vmatprep.subr.bf16.mxu0 %v7645_v15  ;;  %5303 = vmatpush1.bf16.msra.mxu1 %v7644_v16  ;;  %v134_v42 = vunpack.c.0.s8 %v133_v36  ;;  %v7684_v46 = vld [vmem:[#allocation6 + $0x1d4] ss:$8 sps:$4 sm:$0xff]   ;;  %v7687_v49 = vld [vmem:[#allocation6 + $0xc4] ss:$8 sps:$4 sm:$0xff]   ;;  %v7686_v50 = vld [vmem:[#allocation6 + $0x1d0] ss:$8 sps:$4 sm:$0xff]  }
  0x5b   :  { %5304 = vmatprep.subr.bf16.mxu1 %v7648_v17  ;;  %v7690_v51 = vld [vmem:[#allocation6 + $0x1c4] ss:$8 sps:$4 sm:$0xff]   ;;  %v105_v52 = vld [vmem:[#allocation3] sm:$0xff]  ;;  %v7695_v61 = vld [vmem:[#allocation6 + $0xb0] ss:$8 sps:$4 sm:$0xff]   ;;  %s6725_s9 = sshll.u32 %s9062_s8, 4  ;;  %s6726_s9 = int_to_ptr.vmem [resolvable:$true] %s6725_s9 }
  0x5c   :  { %v9124_v48 = vsub.s32 %v134_v42, %v9121_v43  ;;  %v7689_v53 = vld [vmem:[#allocation6 + $0xc0] ss:$8 sps:$4 sm:$0xff]   ;;  %v131_v55 = vcombine.high %v105_v52, %v105_v52  ;;  %v7693_v56 = vld [vmem:[#allocation6 + $0xb4] ss:$8 sps:$4 sm:$0xff]   ;;  %v7699_v0 = vld [vmem:[#allocation6 + $0xa4] ss:$8 sps:$4 sm:$0xff]   ;;  %p9026_p3 = scmp.lt.s32.totalorder %s6726_s9, %s6726_s9 }
  0x5d   :  { %5264 = vmatpush1.bf16.msra.mxu0 %v7647_v18  ;;  %v7692_v57 = vld [vmem:[#allocation6 + $0x1c0] ss:$8 sps:$4 sm:$0xff]   ;;  %v7696_v60 = vld [vmem:[#allocation6 + $0x1b4] ss:$8 sps:$4 sm:$0xff]   ;;  %v7698_v1 = vld [vmem:[#allocation6 + $0x1b0] ss:$8 sps:$4 sm:$0xff]  }
  0x5e   :  { %5265 = vmatprep.subr.bf16.mxu0 %v7651_v19  ;;  %5305 = vmatpush1.bf16.msra.mxu1 %v7650_v20  ;;  %v138_v54 = vrot.slane %v105_v52, %v9124_v48  ;;  %v145_v59 = vrot.slane %v131_v55, %v9124_v48  ;;  %v7702_v3 = vld [vmem:[#allocation6 + $0x1a4] ss:$8 sps:$4 sm:$0xff]   ;;  %v7701_v4 = vld [vmem:[#allocation6 + $0xa0] ss:$8 sps:$4 sm:$0xff]   ;;  %v7705_v5 = vld [vmem:[#allocation6 + $0x94] ss:$8 sps:$4 sm:$0xff]  }
  0x5f   :  { %5306 = vmatprep.subr.bf16.mxu1 %v7654_v21  ;;  %v7704_v6 = vld [vmem:[#allocation6 + $0x1a0] ss:$8 sps:$4 sm:$0xff]   ;;  %v7708_v7 = vld [vmem:[#allocation6 + $0x194] ss:$8 sps:$4 sm:$0xff]   ;;  %v7707_v8 = vld [vmem:[#allocation6 + $0x90] ss:$8 sps:$4 sm:$0xff]  }
  0x60   :  { %v146_v58 = vcombine.high %v138_v54, %v138_v54  ;;  %v147_v63 = vcombine.high %v145_v59, %v145_v59  ;;  %v7711_v9 = vld [vmem:[#allocation6 + $0x84] ss:$8 sps:$4 sm:$0xff]   ;;  %v7710_v10 = vld [vmem:[#allocation6 + $0x190] ss:$8 sps:$4 sm:$0xff]   ;;  %v7713_v12 = vld [vmem:[#allocation6 + $0x80] ss:$8 sps:$4 sm:$0xff]   ;;  %v393_v15 = vpack.c.bf16 %v138_v54, %v138_v54  ;;  %v395_v18 = vpack.c.bf16 %v145_v59, %v145_v59 }
  0x61   :  { %5266 = vmatpush1.bf16.msra.mxu0 %v7653_v22  ;;  %v7714_v11 = vld [vmem:[#allocation6 + $0x184] ss:$8 sps:$4 sm:$0xff]   ;;  %v7719_v13 = vld [vmem:[#allocation6 + $0x274] ss:$8 sps:$4 sm:$0xff]   ;;  %v7716_v14 = vld [vmem:[#allocation6 + $0x180] ss:$8 sps:$4 sm:$0xff]  }
  0x62   :  { %5267 = vmatprep.subr.bf16.mxu0 %v7657_v23  ;;  %5307 = vmatpush1.bf16.msra.mxu1 %v7656_v24  ;;  %v394_v62 = vpack.c.bf16 %v146_v58, %v146_v58  ;;  %v396_v2 = vpack.c.bf16 %v147_v63, %v147_v63  ;;  %v7723_v16 = vld [vmem:[#allocation6 + $0x374] ss:$8 sps:$4 sm:$0xff]   ;;  %v7717_v17 = vld [vmem:[#allocation6 + $0x270] ss:$8 sps:$4 sm:$0xff]   ;;  %v7726_v19 = vld [vmem:[#allocation6 + $0x264] ss:$8 sps:$4 sm:$0xff]  }
  0x63   :  { %5308 = vmatprep.subr.bf16.mxu1 %v7660_v25  ;;  %v7721_v20 = vld [vmem:[#allocation6 + $0x370] ss:$8 sps:$4 sm:$0xff]   ;;  %v7729_v21 = vld [vmem:[#allocation6 + $0x364] ss:$8 sps:$4 sm:$0xff]   ;;  %v7724_v22 = vld [vmem:[#allocation6 + $0x260] ss:$8 sps:$4 sm:$0xff]  }
  0x64   :  { %5287 = vmatprep.mubr.bf16.mxu0 %v394_v62  ;;  %5328 = vmatprep.mubr.bf16.mxu1 %v396_v2  ;;  %v7732_v23 = vld [vmem:[#allocation6 + $0x254] ss:$8 sps:$4 sm:$0xff]   ;;  %v7727_v24 = vld [vmem:[#allocation6 + $0x360] ss:$8 sps:$4 sm:$0xff]   ;;  %v7750_v35 = vld [vmem:[#allocation6 + $0x224] ss:$8 sps:$4 sm:$0xff]  }
  0x65   :  { %5268 = vmatpush1.bf16.msra.mxu0 %v7659_v26  ;;  %v7735_v25 = vld [vmem:[#allocation6 + $0x354] ss:$8 sps:$4 sm:$0xff]   ;;  %v7730_v26 = vld [vmem:[#allocation6 + $0x250] ss:$8 sps:$4 sm:$0xff]   ;;  %v7753_v37 = vld [vmem:[#allocation6 + $0x324] ss:$8 sps:$4 sm:$0xff]  }
  0x66   :  { %5269 = vmatprep.subr.bf16.mxu0 %v7663_v27  ;;  %5309 = vmatpush1.bf16.msra.mxu1 %v7662_v28  ;;  %v7738_v27 = vld [vmem:[#allocation6 + $0x244] ss:$8 sps:$4 sm:$0xff]   ;;  %v7733_v28 = vld [vmem:[#allocation6 + $0x350] ss:$8 sps:$4 sm:$0xff]   ;;  %v7759_v42 = vld [vmem:[#allocation6 + $0x314] ss:$8 sps:$4 sm:$0xff]  }
  0x67   :  { %5310 = vmatprep.subr.bf16.mxu1 %v7666_v29  ;;  %v7741_v29 = vld [vmem:[#allocation6 + $0x344] ss:$8 sps:$4 sm:$0xff]   ;;  %v7745_v36 = vld [vmem:[#allocation6 + $0x330] ss:$8 sps:$4 sm:$0xff]   ;;  %v7760_v55 = vld [vmem:[#allocation6 + $0x200] ss:$8 sps:$4 sm:$0xff]  }
  0x68   :  { %v7765_v52 = vld [vmem:[#allocation6 + $0x304] ss:$8 sps:$4 sm:$0xff]   ;;  %v7763_v58 = vld [vmem:[#allocation6 + $0x300] ss:$8 sps:$4 sm:$0xff]   ;;  %v7771_v59 = vld [vmem:[#allocation6 + $0x3f4] ss:$8 sps:$4 sm:$0xff]  }
  0x69   :  { %5270 = vmatpush1.bf16.msra.mxu0 %v7665_v30  ;;  %v7736_v30 = vld [vmem:[#allocation6 + $0x240] ss:$8 sps:$4 sm:$0xff]   ;;  %v7769_v62 = vld [vmem:[#allocation6 + $0x3f0] ss:$8 sps:$4 sm:$0xff]   ;;  %v7777_v63 = vld [vmem:[#allocation6 + $0x3e4] ss:$8 sps:$4 sm:$0xff]  }
  0x6a   :  { %5271 = vmatprep.subr.bf16.mxu0 %v7669_v31  ;;  %5311 = vmatpush1.bf16.msra.mxu1 %v7668_v32  ;;  %v7744_v31 = vld [vmem:[#allocation6 + $0x234] ss:$8 sps:$4 sm:$0xff]   ;;  %v7739_v32 = vld [vmem:[#allocation6 + $0x340] ss:$8 sps:$4 sm:$0xff]   ;;  %s9021_s10 = scalar_lea.vmem %s6726_s9, 16  ;;  %s9025_s11 = scalar_lea.vmem %s6726_s9, 32 }
  0x6b   :  { %5312 = vmatprep.subr.bf16.mxu1 %v7672_v33  ;;  %v7747_v33 = vld [vmem:[#allocation6 + $0x334] ss:$8 sps:$4 sm:$0xff]   ;;  %v7775_v2 = vld [vmem:[#allocation6 + $0x3e0] ss:$8 sps:$4 sm:$0xff]   ;;  %p9022_p2 = scmp.ne.s32.totalorder %s6726_s9, %s9021_s10  ;;  %p9027_p4 = scmp.lt.s32.totalorder %s9025_s11, %s9021_s10 }
  0x6d   :  { %5272 = vmatpush2.bf16.msra.mxu0 %v7671_v34  ;;  %v7742_v34 = vld [vmem:[#allocation6 + $0x230] ss:$8 sps:$4 sm:$0xff]   ;;  %p9028_p5 = por %p9027_p4, %p9026_p3 }
  0x6e   :  { %5273 = vmatprep.subr.bf16.mxu0 %v7675_v38  ;;  %5313 = vmatpush2.bf16.msra.mxu1 %v7674_v39  ;;  %v7748_v38 = vld [vmem:[#allocation6 + $0x220] ss:$8 sps:$4 sm:$0xff]   ;;  %v7756_v39 = vld [vmem:[#allocation6 + $0x214] ss:$8 sps:$4 sm:$0xff]  }
  0x6f   :  { %5314 = vmatprep.subr.bf16.mxu1 %v7678_v40  ;;  %v7751_v40 = vld [vmem:[#allocation6 + $0x320] ss:$8 sps:$4 sm:$0xff]   ;;  %p9029_p6 = pnand %p9028_p5, %p9022_p2 }
  0x71   :  { %5274 = vmatpush2.bf16.msra.mxu0 %v7677_v41  ;;  %v106_v41 = vld [vmem:[#allocation3 + $0x8] sm:$0xff] }
  0x72   :  { %5275 = vmatprep.subr.bf16.mxu0 %v7681_v44  ;;  %5315 = vmatpush2.bf16.msra.mxu1 %v7680_v45  ;;  %v9129_v44 = vrot.slane %v106_v41, %v9124_v48  ;;  %v148_v45 = vcombine.high %v106_v41, %v106_v41  ;;  %v7824_v41 = vld [vmem:[#allocation6 + $0x560] ss:$8 sps:$4 sm:$0xff]  }
  0x73   :  { %5316 = vmatprep.subr.bf16.mxu1 %v7684_v46  ;;  %v7754_v46 = vld [vmem:[#allocation6 + $0x210] ss:$8 sps:$4 sm:$0xff]  }
  0x75   :  { %5276 = vmatpush2.bf16.msra.mxu0 %v7683_v47  ;;  %v7762_v47 = vld [vmem:[#allocation6 + $0x204] ss:$8 sps:$4 sm:$0xff]  }
  0x76   :  { %5277 = vmatprep.subr.bf16.mxu0 %v7687_v49  ;;  %5317 = vmatpush2.bf16.msra.mxu1 %v7686_v50  ;;  %v163_v49 = vcombine.high %v9129_v44, %v9129_v44  ;;  %v9134_v50 = vrot.slane %v148_v45, %v9124_v48  ;;  %v7832_v45 = vld [vmem:[#allocation6 + $0x554] ss:$8 sps:$4 sm:$0xff]  }
  0x77   :  { %5318 = vmatprep.subr.bf16.mxu1 %v7690_v51  ;;  %v7757_v51 = vld [vmem:[#allocation6 + $0x310] ss:$8 sps:$4 sm:$0xff]  }
  0x78   :  { %v164_v54 = vcombine.high %v9134_v50, %v9134_v50 }
  0x79   :  { %5278 = vmatpush2.bf16.msra.mxu0 %v7689_v53  ;;  %v398_v53 = vpack.c.bf16 %v163_v49, %v163_v49  ;;  %v7835_v49 = vld [vmem:[#allocation6 + $0x444] ss:$8 sps:$4 sm:$0xff]  }
  0x7a   :  { %5279 = vmatprep.subr.bf16.mxu0 %v7693_v56  ;;  %5319 = vmatpush2.bf16.msra.mxu1 %v7692_v57  ;;  %v7768_v56 = vld [vmem:[#allocation6 + $0x2f4] ss:$8 sps:$4 sm:$0xff]   ;;  %v400_v57 = vpack.c.bf16 %v164_v54, %v164_v54  ;;  %v7836_v54 = vld [vmem:[#allocation6 + $0x540] ss:$8 sps:$4 sm:$0xff]  }
  0x7b   :  { %5320 = vmatprep.subr.bf16.mxu1 %v7696_v60  ;;  %v7766_v60 = vld [vmem:[#allocation6 + $0x2f0] ss:$8 sps:$4 sm:$0xff]  }
  0x7d   :  { %5280 = vmatpush2.bf16.msra.mxu0 %v7695_v61  ;;  %v7774_v61 = vld [vmem:[#allocation6 + $0x2e4] ss:$8 sps:$4 sm:$0xff]  }
  0x7e   :  { %5281 = vmatprep.subr.bf16.mxu0 %v7699_v0  ;;  %5321 = vmatpush2.bf16.msra.mxu1 %v7698_v1  ;;  %v7772_v0 = vld [vmem:[#allocation6 + $0x2e0] ss:$8 sps:$4 sm:$0xff]   ;;  %v7780_v1 = vld [vmem:[#allocation6 + $0x2d4] ss:$8 sps:$4 sm:$0xff]  }
  0x7f   :  { %5322 = vmatprep.subr.bf16.mxu1 %v7702_v3  ;;  %v7783_v3 = vld [vmem:[#allocation6 + $0x3d4] ss:$8 sps:$4 sm:$0xff]  }
  0x81   :  { %5282 = vmatpush2.bf16.msra.mxu0 %v7701_v4  ;;  %v7778_v4 = vld [vmem:[#allocation6 + $0x2d0] ss:$8 sps:$4 sm:$0xff]  }
  0x82   :  { %5283 = vmatprep.subr.bf16.mxu0 %v7705_v5  ;;  %5323 = vmatpush2.bf16.msra.mxu1 %v7704_v6  ;;  %v7786_v5 = vld [vmem:[#allocation6 + $0x2c4] ss:$8 sps:$4 sm:$0xff]   ;;  %v7781_v6 = vld [vmem:[#allocation6 + $0x3d0] ss:$8 sps:$4 sm:$0xff]  }
  0x83   :  { %5324 = vmatprep.subr.bf16.mxu1 %v7708_v7  ;;  %v7789_v7 = vld [vmem:[#allocation6 + $0x3c4] ss:$8 sps:$4 sm:$0xff]  }
  0x85   :  { %5284 = vmatpush2.bf16.msra.mxu0 %v7707_v8  ;;  %v7784_v8 = vld [vmem:[#allocation6 + $0x2c0] ss:$8 sps:$4 sm:$0xff]  }
  0x86   :  { %5285 = vmatprep.subr.bf16.mxu0 %v7711_v9  ;;  %5325 = vmatpush2.bf16.msra.mxu1 %v7710_v10  ;;  %v7792_v9 = vld [vmem:[#allocation6 + $0x2b4] ss:$8 sps:$4 sm:$0xff]   ;;  %v7787_v10 = vld [vmem:[#allocation6 + $0x3c0] ss:$8 sps:$4 sm:$0xff]  }
  0x87   :  { %5326 = vmatprep.subr.bf16.mxu1 %v7714_v11  ;;  %v7795_v11 = vld [vmem:[#allocation6 + $0x3b4] ss:$8 sps:$4 sm:$0xff]  }
  0x89   :  { %5286 = vmatpush2.bf16.msra.mxu0 %v7713_v12  ;;  %v7790_v12 = vld [vmem:[#allocation6 + $0x2b0] ss:$8 sps:$4 sm:$0xff]  }
  0x8a   :  { %5337 = vmatprep.subr.bf16.mxu0 %v7719_v13  ;;  %5327 = vmatpush2.bf16.msra.mxu1 %v7716_v14  ;;  %v7798_v13 = vld [vmem:[#allocation6 + $0x2a4] ss:$8 sps:$4 sm:$0xff]   ;;  %v7793_v14 = vld [vmem:[#allocation6 + $0x3b0] ss:$8 sps:$4 sm:$0xff]  }
  0x8b   :  { %5378 = vmatprep.subr.bf16.mxu1 %v7723_v16  ;;  %v7796_v16 = vld [vmem:[#allocation6 + $0x2a0] ss:$8 sps:$4 sm:$0xff]  }
  0x8c   :  { %5288 = vmatmul.mubr.bf16.vlgmr.msra.gmra.mxu0 %v393_v15  ;;  %v7801_v15 = vld [vmem:[#allocation6 + $0x3a4] ss:$8 sps:$4 sm:$0xff]  }
  0x8d   :  { %5338 = vmatpush1.bf16.msra.mxu0 %v7717_v17  ;;  %5329 = vmatmul.mubr.bf16.vlgmr.msra.gmra.mxu1 %v395_v18  ;;  %v7804_v17 = vld [vmem:[#allocation6 + $0x294] ss:$8 sps:$4 sm:$0xff]   ;;  %v7799_v18 = vld [vmem:[#allocation6 + $0x3a0] ss:$8 sps:$4 sm:$0xff]  }
  0x8e   :  { %5339 = vmatprep.subr.bf16.mxu0 %v7726_v19  ;;  %5379 = vmatpush1.bf16.msra.mxu1 %v7721_v20  ;;  %v7807_v19 = vld [vmem:[#allocation6 + $0x394] ss:$8 sps:$4 sm:$0xff]   ;;  %v7802_v20 = vld [vmem:[#allocation6 + $0x290] ss:$8 sps:$4 sm:$0xff]  }
  0x8f   :  { %5380 = vmatprep.subr.bf16.mxu1 %v7729_v21  ;;  %5369 = vmatprep.mubr.bf16.mxu0 %v398_v53  ;;  %v7810_v21 = vld [vmem:[#allocation6 + $0x284] ss:$8 sps:$4 sm:$0xff]   ;;  %v7841_v53 = vld [vmem:[#allocation6 + $0x434] ss:$8 sps:$4 sm:$0xff]  }
  0x90   :  { %5410 = vmatprep.mubr.bf16.mxu1 %v400_v57  ;;  %v7847_v57 = vld [vmem:[#allocation6 + $0x424] ss:$8 sps:$4 sm:$0xff]  }
  0x91   :  { %5340 = vmatpush1.bf16.msra.mxu0 %v7724_v22  ;;  %v7805_v22 = vld [vmem:[#allocation6 + $0x390] ss:$8 sps:$4 sm:$0xff]  }
  0x92   :  { %5341 = vmatprep.subr.bf16.mxu0 %v7732_v23  ;;  %5381 = vmatpush1.bf16.msra.mxu1 %v7727_v24  ;;  %v7813_v23 = vld [vmem:[#allocation6 + $0x384] ss:$8 sps:$4 sm:$0xff]   ;;  %v7808_v24 = vld [vmem:[#allocation6 + $0x280] ss:$8 sps:$4 sm:$0xff]  }
  0x93   :  { %5382 = vmatprep.subr.bf16.mxu1 %v7735_v25  ;;  %v7816_v25 = vld [vmem:[#allocation6 + $0x474] ss:$8 sps:$4 sm:$0xff]  }
  0x95   :  { %5342 = vmatpush1.bf16.msra.mxu0 %v7730_v26  ;;  %v7811_v26 = vld [vmem:[#allocation6 + $0x380] ss:$8 sps:$4 sm:$0xff]  }
  0x96   :  { %5343 = vmatprep.subr.bf16.mxu0 %v7738_v27  ;;  %5383 = vmatpush1.bf16.msra.mxu1 %v7733_v28  ;;  %v397_v27 = vpack.c.bf16 %v9129_v44, %v9129_v44  ;;  %v7820_v28 = vld [vmem:[#allocation6 + $0x574] ss:$8 sps:$4 sm:$0xff]  }
  0x97   :  { %5384 = vmatprep.subr.bf16.mxu1 %v7741_v29  ;;  %v7814_v29 = vld [vmem:[#allocation6 + $0x470] ss:$8 sps:$4 sm:$0xff]  }
  0x99   :  { %5344 = vmatpush1.bf16.msra.mxu0 %v7736_v30  ;;  %v399_v30 = vpack.c.bf16 %v9134_v50, %v9134_v50  ;;  %v7830_v50 = vld [vmem:[#allocation6 + $0x550] ss:$8 sps:$4 sm:$0xff]  }
  0x9a   :  { %5345 = vmatprep.subr.bf16.mxu0 %v7744_v31  ;;  %5385 = vmatpush1.bf16.msra.mxu1 %v7739_v32  ;;  %v7823_v31 = vld [vmem:[#allocation6 + $0x464] ss:$8 sps:$4 sm:$0xff]  }
  0x9b   :  { %5386 = vmatprep.subr.bf16.mxu1 %v7747_v33  ;;  %v107_v32 = vld [vmem:[#allocation3 + $0x10] sm:$0xff] }
  0x9c   :  { %v7818_v33 = vld [vmem:[#allocation6 + $0x570] ss:$8 sps:$4 sm:$0xff]  }
  0x9d   :  { %5346 = vmatpush1.bf16.msra.mxu0 %v7742_v34  ;;  %v9143_v34 = vrot.slane %v107_v32, %v9124_v48 }
  0x9e   :  { %5347 = vmatprep.subr.bf16.mxu0 %v7750_v35  ;;  %5387 = vmatpush1.bf16.msra.mxu1 %v7745_v36  ;;  %v165_v35 = vcombine.high %v107_v32, %v107_v32  ;;  %v7826_v36 = vld [vmem:[#allocation6 + $0x564] ss:$8 sps:$4 sm:$0xff]  }
  0x9f   :  { %5388 = vmatprep.subr.bf16.mxu1 %v7753_v37  ;;  %v7821_v37 = vld [vmem:[#allocation6 + $0x460] ss:$8 sps:$4 sm:$0xff]  }
  0xa1   :  { %5348 = vmatpush1.bf16.msra.mxu0 %v7748_v38  ;;  %v180_v38 = vcombine.high %v9143_v34, %v9143_v34 }
  0xa2   :  { %5349 = vmatprep.subr.bf16.mxu0 %v7756_v39  ;;  %5389 = vmatpush1.bf16.msra.mxu1 %v7751_v40  ;;  %v9148_v39 = vrot.slane %v165_v35, %v9124_v48  ;;  %v7829_v40 = vld [vmem:[#allocation6 + $0x454] ss:$8 sps:$4 sm:$0xff]   ;;  %v7899_v35 = vld [vmem:[#allocation6 + $0x490] ss:$8 sps:$4 sm:$0xff]  }
  0xa3   :  { %5390 = vmatprep.subr.bf16.mxu1 %v7759_v42  ;;  %v402_v42 = vpack.c.bf16 %v180_v38, %v180_v38  ;;  %v7902_v38 = vld [vmem:[#allocation6 + $0x590] ss:$8 sps:$4 sm:$0xff]  }
  0xa4   :  { %v181_v44 = vcombine.high %v9148_v39, %v9148_v39 }
  0xa5   :  { %5350 = vmatpush1.bf16.msra.mxu0 %v7754_v46  ;;  %v7827_v46 = vld [vmem:[#allocation6 + $0x450] ss:$8 sps:$4 sm:$0xff]  }
  0xa6   :  { %5351 = vmatprep.subr.bf16.mxu0 %v7762_v47  ;;  %5391 = vmatpush1.bf16.msra.mxu1 %v7757_v51  ;;  %v404_v47 = vpack.c.bf16 %v181_v44, %v181_v44  ;;  %v7838_v51 = vld [vmem:[#allocation6 + $0x544] ss:$8 sps:$4 sm:$0xff]  }
  0xa7   :  { %5392 = vmatprep.subr.bf16.mxu1 %v7765_v52  ;;  %v7833_v52 = vld [vmem:[#allocation6 + $0x440] ss:$8 sps:$4 sm:$0xff]  }
  0xa9   :  { %5352 = vmatpush1.bf16.msra.mxu0 %v7760_v55  ;;  %v7844_v55 = vld [vmem:[#allocation6 + $0x534] ss:$8 sps:$4 sm:$0xff]  }
  0xaa   :  { %5353 = vmatprep.subr.bf16.mxu0 %v7768_v56  ;;  %5393 = vmatpush1.bf16.msra.mxu1 %v7763_v58  ;;  %v7839_v56 = vld [vmem:[#allocation6 + $0x430] ss:$8 sps:$4 sm:$0xff]  }
  0xab   :  { %5394 = vmatprep.subr.bf16.mxu1 %v7771_v59  ;;  %v7842_v58 = vld [vmem:[#allocation6 + $0x530] ss:$8 sps:$4 sm:$0xff]   ;;  %v7850_v59 = vld [vmem:[#allocation6 + $0x524] ss:$8 sps:$4 sm:$0xff]  }
  0xad   :  { %5354 = vmatpush2.bf16.msra.mxu0 %v7766_v60  ;;  %v7845_v60 = vld [vmem:[#allocation6 + $0x420] ss:$8 sps:$4 sm:$0xff]  }
  0xae   :  { %5355 = vmatprep.subr.bf16.mxu0 %v7774_v61  ;;  %5395 = vmatpush2.bf16.msra.mxu1 %v7769_v62  ;;  %v7853_v61 = vld [vmem:[#allocation6 + $0x414] ss:$8 sps:$4 sm:$0xff]   ;;  %v7848_v62 = vld [vmem:[#allocation6 + $0x520] ss:$8 sps:$4 sm:$0xff]  }
  0xaf   :  { %5396 = vmatprep.subr.bf16.mxu1 %v7777_v63  ;;  %v7856_v63 = vld [vmem:[#allocation6 + $0x514] ss:$8 sps:$4 sm:$0xff]  }
  0xb1   :  { %5356 = vmatpush2.bf16.msra.mxu0 %v7772_v0  ;;  %v7851_v0 = vld [vmem:[#allocation6 + $0x410] ss:$8 sps:$4 sm:$0xff]  }
  0xb2   :  { %5357 = vmatprep.subr.bf16.mxu0 %v7780_v1  ;;  %5397 = vmatpush2.bf16.msra.mxu1 %v7775_v2  ;;  %v7859_v1 = vld [vmem:[#allocation6 + $0x404] ss:$8 sps:$4 sm:$0xff]   ;;  %v7854_v2 = vld [vmem:[#allocation6 + $0x510] ss:$8 sps:$4 sm:$0xff]  }
  0xb3   :  { %5398 = vmatprep.subr.bf16.mxu1 %v7783_v3  ;;  %v7862_v3 = vld [vmem:[#allocation6 + $0x504] ss:$8 sps:$4 sm:$0xff]  }
  0xb5   :  { %5358 = vmatpush2.bf16.msra.mxu0 %v7778_v4  ;;  %v7857_v4 = vld [vmem:[#allocation6 + $0x400] ss:$8 sps:$4 sm:$0xff]  }
  0xb6   :  { %5359 = vmatprep.subr.bf16.mxu0 %v7786_v5  ;;  %5399 = vmatpush2.bf16.msra.mxu1 %v7781_v6  ;;  %v7865_v5 = vld [vmem:[#allocation6 + $0x4f4] ss:$8 sps:$4 sm:$0xff]   ;;  %v7860_v6 = vld [vmem:[#allocation6 + $0x500] ss:$8 sps:$4 sm:$0xff]  }
  0xb7   :  { %5400 = vmatprep.subr.bf16.mxu1 %v7789_v7  ;;  %v7868_v7 = vld [vmem:[#allocation6 + $0x5f4] ss:$8 sps:$4 sm:$0xff]  }
  0xb9   :  { %5360 = vmatpush2.bf16.msra.mxu0 %v7784_v8  ;;  %v7863_v8 = vld [vmem:[#allocation6 + $0x4f0] ss:$8 sps:$4 sm:$0xff]  }
  0xba   :  { %5361 = vmatprep.subr.bf16.mxu0 %v7792_v9  ;;  %5401 = vmatpush2.bf16.msra.mxu1 %v7787_v10  ;;  %v7871_v9 = vld [vmem:[#allocation6 + $0x4e4] ss:$8 sps:$4 sm:$0xff]   ;;  %v7866_v10 = vld [vmem:[#allocation6 + $0x5f0] ss:$8 sps:$4 sm:$0xff]  }
  0xbb   :  { %5402 = vmatprep.subr.bf16.mxu1 %v7795_v11  ;;  %v7874_v11 = vld [vmem:[#allocation6 + $0x5e4] ss:$8 sps:$4 sm:$0xff]  }
  0xbd   :  { %5362 = vmatpush2.bf16.msra.mxu0 %v7790_v12  ;;  %v7869_v12 = vld [vmem:[#allocation6 + $0x4e0] ss:$8 sps:$4 sm:$0xff]  }
  0xbe   :  { %5363 = vmatprep.subr.bf16.mxu0 %v7798_v13  ;;  %5403 = vmatpush2.bf16.msra.mxu1 %v7793_v14  ;;  %v7877_v13 = vld [vmem:[#allocation6 + $0x4d4] ss:$8 sps:$4 sm:$0xff]   ;;  %v7872_v14 = vld [vmem:[#allocation6 + $0x5e0] ss:$8 sps:$4 sm:$0xff]  }
  0xbf   :  { %5404 = vmatprep.subr.bf16.mxu1 %v7801_v15  ;;  %v7880_v15 = vld [vmem:[#allocation6 + $0x5d4] ss:$8 sps:$4 sm:$0xff]  }
  0xc1   :  { %5364 = vmatpush2.bf16.msra.mxu0 %v7796_v16  ;;  %v7875_v16 = vld [vmem:[#allocation6 + $0x4d0] ss:$8 sps:$4 sm:$0xff]  }
  0xc2   :  { %5365 = vmatprep.subr.bf16.mxu0 %v7804_v17  ;;  %5405 = vmatpush2.bf16.msra.mxu1 %v7799_v18  ;;  %v7883_v17 = vld [vmem:[#allocation6 + $0x4c4] ss:$8 sps:$4 sm:$0xff]   ;;  %v7878_v18 = vld [vmem:[#allocation6 + $0x5d0] ss:$8 sps:$4 sm:$0xff]  }
  0xc3   :  { %5406 = vmatprep.subr.bf16.mxu1 %v7807_v19  ;;  %v7886_v19 = vld [vmem:[#allocation6 + $0x5c4] ss:$8 sps:$4 sm:$0xff]  }
  0xc5   :  { %5366 = vmatpush2.bf16.msra.mxu0 %v7802_v20  ;;  %v7881_v20 = vld [vmem:[#allocation6 + $0x4c0] ss:$8 sps:$4 sm:$0xff]  }
  0xc6   :  { %5367 = vmatprep.subr.bf16.mxu0 %v7810_v21  ;;  %5407 = vmatpush2.bf16.msra.mxu1 %v7805_v22  ;;  %v7889_v21 = vld [vmem:[#allocation6 + $0x4b4] ss:$8 sps:$4 sm:$0xff]   ;;  %v7884_v22 = vld [vmem:[#allocation6 + $0x5c0] ss:$8 sps:$4 sm:$0xff]  }
  0xc7   :  { %5408 = vmatprep.subr.bf16.mxu1 %v7813_v23  ;;  %v7892_v23 = vld [vmem:[#allocation6 + $0x5b4] ss:$8 sps:$4 sm:$0xff]  }
  0xc9   :  { %5368 = vmatpush2.bf16.msra.mxu0 %v7808_v24  ;;  %v7887_v24 = vld [vmem:[#allocation6 + $0x4b0] ss:$8 sps:$4 sm:$0xff]  }
  0xca   :  { %5419 = vmatprep.subr.bf16.mxu0 %v7816_v25  ;;  %5409 = vmatpush2.bf16.msra.mxu1 %v7811_v26  ;;  %v7895_v25 = vld [vmem:[#allocation6 + $0x4a4] ss:$8 sps:$4 sm:$0xff]   ;;  %v7890_v26 = vld [vmem:[#allocation6 + $0x5b0] ss:$8 sps:$4 sm:$0xff]  }
  0xcb   :  { %5460 = vmatprep.subr.bf16.mxu1 %v7820_v28  ;;  %v108_v28 = vld [vmem:[#allocation3 + $0x18] sm:$0xff] }
  0xcc   :  { %5370 = vmatmul.mubr.bf16.vlgmr.msra.gmra.mxu0 %v397_v27  ;;  %v7898_v27 = vld [vmem:[#allocation6 + $0x5a4] ss:$8 sps:$4 sm:$0xff]   ;;  %v182_v32 = vcombine.high %v108_v28, %v108_v28 }
  0xcd   :  { %5420 = vmatpush1.bf16.msra.mxu0 %v7814_v29  ;;  %5411 = vmatmul.mubr.bf16.vlgmr.msra.gmra.mxu1 %v399_v30  ;;  %v7893_v29 = vld [vmem:[#allocation6 + $0x4a0] ss:$8 sps:$4 sm:$0xff]   ;;  %v7901_v30 = vld [vmem:[#allocation6 + $0x494] ss:$8 sps:$4 sm:$0xff]  }
  0xce   :  { %5421 = vmatprep.subr.bf16.mxu0 %v7823_v31  ;;  %5461 = vmatpush1.bf16.msra.mxu1 %v7818_v33  ;;  %v7896_v31 = vld [vmem:[#allocation6 + $0x5a0] ss:$8 sps:$4 sm:$0xff]   ;;  %v7904_v33 = vld [vmem:[#allocation6 + $0x594] ss:$8 sps:$4 sm:$0xff]  }
  0xcf   :  { %5462 = vmatprep.subr.bf16.mxu1 %v7826_v36  ;;  %5451 = vmatprep.mubr.bf16.mxu0 %v402_v42  ;;  %v9153_v36 = vrot.slane %v108_v28, %v9124_v48  ;;  %v7905_v42 = vld [vmem:[#allocation6 + $0x480] ss:$8 sps:$4 sm:$0xff]   ;;  %v7972_v28 = vld [vmem:[#allocation6 + $0x6d0] ss:$8 sps:$4 sm:$0xff]  }
  0xd0   :  { %5492 = vmatprep.mubr.bf16.mxu1 %v404_v47 }
  0xd1   :  { %5422 = vmatpush1.bf16.msra.mxu0 %v7821_v37  ;;  %v7907_v37 = vld [vmem:[#allocation6 + $0x484] ss:$8 sps:$4 sm:$0xff]   ;;  %v197_v44 = vcombine.high %v9153_v36, %v9153_v36 }
  0xd2   :  { %5423 = vmatprep.subr.bf16.mxu0 %v7829_v40  ;;  %5463 = vmatpush1.bf16.msra.mxu1 %v7824_v41  ;;  %v9156_v40 = vrot.slane %v182_v32, %v9124_v48  ;;  %v7910_v41 = vld [vmem:[#allocation6 + $0x584] ss:$8 sps:$4 sm:$0xff]   ;;  %v7978_v32 = vld [vmem:[#allocation6 + $0x6c0] ss:$8 sps:$4 sm:$0xff]  }
  0xd3   :  { %5464 = vmatprep.subr.bf16.mxu1 %v7832_v45  ;;  %v7913_v45 = vld [vmem:[#allocation6 + $0x674] ss:$8 sps:$4 sm:$0xff]  }
  0xd4   :  { %v198_v47 = vcombine.high %v9156_v40, %v9156_v40 }
  0xd5   :  { %5424 = vmatpush1.bf16.msra.mxu0 %v7827_v46  ;;  %v7908_v46 = vld [vmem:[#allocation6 + $0x580] ss:$8 sps:$4 sm:$0xff]  }
  0xd6   :  { %5425 = vmatprep.subr.bf16.mxu0 %v7835_v49  ;;  %5465 = vmatpush1.bf16.msra.mxu1 %v7830_v50  ;;  %v401_v49 = vpack.c.bf16 %v9143_v34, %v9143_v34  ;;  %v7917_v50 = vld [vmem:[#allocation6 + $0x774] ss:$8 sps:$4 sm:$0xff]  }
  0xd7   :  { %5466 = vmatprep.subr.bf16.mxu1 %v7838_v51  ;;  %v7911_v51 = vld [vmem:[#allocation6 + $0x670] ss:$8 sps:$4 sm:$0xff]   ;;  %v7926_v34 = vld [vmem:[#allocation6 + $0x654] ss:$8 sps:$4 sm:$0xff]  }
  0xd9   :  { %5426 = vmatpush1.bf16.msra.mxu0 %v7833_v52  ;;  %v406_v52 = vpack.c.bf16 %v197_v44, %v197_v44  ;;  %v7995_v44 = vld [vmem:[#allocation6 + $0x7a4] ss:$8 sps:$4 sm:$0xff]  }
  0xda   :  { %5427 = vmatprep.subr.bf16.mxu0 %v7841_v53  ;;  %5467 = vmatpush1.bf16.msra.mxu1 %v7836_v54  ;;  %v403_v53 = vpack.c.bf16 %v9148_v39, %v9148_v39  ;;  %v7920_v54 = vld [vmem:[#allocation6 + $0x664] ss:$8 sps:$4 sm:$0xff]   ;;  %v7924_v39 = vld [vmem:[#allocation6 + $0x650] ss:$8 sps:$4 sm:$0xff]  }
  0xdb   :  { %5468 = vmatprep.subr.bf16.mxu1 %v7844_v55  ;;  %v7915_v55 = vld [vmem:[#allocation6 + $0x770] ss:$8 sps:$4 sm:$0xff]  }
  0xdd   :  { %5428 = vmatpush1.bf16.msra.mxu0 %v7839_v56  ;;  %v408_v56 = vpack.c.bf16 %v198_v47, %v198_v47  ;;  %v7998_v47 = vld [vmem:[#allocation6 + $0x694] ss:$8 sps:$4 sm:$0xff]  }
  0xde   :  { %5429 = vmatprep.subr.bf16.mxu0 %v7847_v57  ;;  %5469 = vmatpush1.bf16.msra.mxu1 %v7842_v58  ;;  %v7923_v57 = vld [vmem:[#allocation6 + $0x764] ss:$8 sps:$4 sm:$0xff]   ;;  %v7918_v58 = vld [vmem:[#allocation6 + $0x660] ss:$8 sps:$4 sm:$0xff]  }
  0xdf   :  { %5470 = vmatprep.subr.bf16.mxu1 %v7850_v59  ;;  %v7921_v59 = vld [vmem:[#allocation6 + $0x760] ss:$8 sps:$4 sm:$0xff]  }
  0xe1   :  { %5430 = vmatpush1.bf16.msra.mxu0 %v7845_v60  ;;  %v7929_v60 = vld [vmem:[#allocation6 + $0x754] ss:$8 sps:$4 sm:$0xff]  }
  0xe2   :  { %5431 = vmatprep.subr.bf16.mxu0 %v7853_v61  ;;  %5471 = vmatpush1.bf16.msra.mxu1 %v7848_v62  ;;  %v7932_v61 = vld [vmem:[#allocation6 + $0x644] ss:$8 sps:$4 sm:$0xff]   ;;  %v7927_v62 = vld [vmem:[#allocation6 + $0x750] ss:$8 sps:$4 sm:$0xff]  }
  0xe3   :  { %5472 = vmatprep.subr.bf16.mxu1 %v7856_v63  ;;  %v7935_v63 = vld [vmem:[#allocation6 + $0x744] ss:$8 sps:$4 sm:$0xff]  }
  0xe5   :  { %5432 = vmatpush1.bf16.msra.mxu0 %v7851_v0  ;;  %v7930_v0 = vld [vmem:[#allocation6 + $0x640] ss:$8 sps:$4 sm:$0xff]  }
  0xe6   :  { %5433 = vmatprep.subr.bf16.mxu0 %v7859_v1  ;;  %5473 = vmatpush1.bf16.msra.mxu1 %v7854_v2  ;;  %v7938_v1 = vld [vmem:[#allocation6 + $0x634] ss:$8 sps:$4 sm:$0xff]   ;;  %v7933_v2 = vld [vmem:[#allocation6 + $0x740] ss:$8 sps:$4 sm:$0xff]  }
  0xe7   :  { %5474 = vmatprep.subr.bf16.mxu1 %v7862_v3  ;;  %v7941_v3 = vld [vmem:[#allocation6 + $0x734] ss:$8 sps:$4 sm:$0xff]  }
  0xe9   :  { %5434 = vmatpush1.bf16.msra.mxu0 %v7857_v4  ;;  %v7936_v4 = vld [vmem:[#allocation6 + $0x630] ss:$8 sps:$4 sm:$0xff]  }
  0xea   :  { %5435 = vmatprep.subr.bf16.mxu0 %v7865_v5  ;;  %5475 = vmatpush1.bf16.msra.mxu1 %v7860_v6  ;;  %v7944_v5 = vld [vmem:[#allocation6 + $0x624] ss:$8 sps:$4 sm:$0xff]   ;;  %v7939_v6 = vld [vmem:[#allocation6 + $0x730] ss:$8 sps:$4 sm:$0xff]  }
  0xeb   :  { %5476 = vmatprep.subr.bf16.mxu1 %v7868_v7  ;;  %v7947_v7 = vld [vmem:[#allocation6 + $0x724] ss:$8 sps:$4 sm:$0xff]  }
  0xed   :  { %5436 = vmatpush2.bf16.msra.mxu0 %v7863_v8  ;;  %v7942_v8 = vld [vmem:[#allocation6 + $0x620] ss:$8 sps:$4 sm:$0xff]  }
  0xee   :  { %5437 = vmatprep.subr.bf16.mxu0 %v7871_v9  ;;  %5477 = vmatpush2.bf16.msra.mxu1 %v7866_v10  ;;  %v7950_v9 = vld [vmem:[#allocation6 + $0x614] ss:$8 sps:$4 sm:$0xff]   ;;  %v7945_v10 = vld [vmem:[#allocation6 + $0x720] ss:$8 sps:$4 sm:$0xff]  }
  0xef   :  { %5478 = vmatprep.subr.bf16.mxu1 %v7874_v11  ;;  %v7953_v11 = vld [vmem:[#allocation6 + $0x714] ss:$8 sps:$4 sm:$0xff]  }
  0xf1   :  { %5438 = vmatpush2.bf16.msra.mxu0 %v7869_v12  ;;  %v7948_v12 = vld [vmem:[#allocation6 + $0x610] ss:$8 sps:$4 sm:$0xff]  }
  0xf2   :  { %5439 = vmatprep.subr.bf16.mxu0 %v7877_v13  ;;  %5479 = vmatpush2.bf16.msra.mxu1 %v7872_v14  ;;  %v7956_v13 = vld [vmem:[#allocation6 + $0x604] ss:$8 sps:$4 sm:$0xff]   ;;  %v7951_v14 = vld [vmem:[#allocation6 + $0x710] ss:$8 sps:$4 sm:$0xff]  }
  0xf3   :  { %5480 = vmatprep.subr.bf16.mxu1 %v7880_v15  ;;  %v7959_v15 = vld [vmem:[#allocation6 + $0x704] ss:$8 sps:$4 sm:$0xff]  }
  0xf5   :  { %5440 = vmatpush2.bf16.msra.mxu0 %v7875_v16  ;;  %v7954_v16 = vld [vmem:[#allocation6 + $0x600] ss:$8 sps:$4 sm:$0xff]  }
  0xf6   :  { %5441 = vmatprep.subr.bf16.mxu0 %v7883_v17  ;;  %5481 = vmatpush2.bf16.msra.mxu1 %v7878_v18  ;;  %v7962_v17 = vld [vmem:[#allocation6 + $0x6f4] ss:$8 sps:$4 sm:$0xff]   ;;  %v7957_v18 = vld [vmem:[#allocation6 + $0x700] ss:$8 sps:$4 sm:$0xff]  }
  0xf7   :  { %5482 = vmatprep.subr.bf16.mxu1 %v7886_v19  ;;  %v7965_v19 = vld [vmem:[#allocation6 + $0x7f4] ss:$8 sps:$4 sm:$0xff]  }
  0xf9   :  { %5442 = vmatpush2.bf16.msra.mxu0 %v7881_v20  ;;  %v7960_v20 = vld [vmem:[#allocation6 + $0x6f0] ss:$8 sps:$4 sm:$0xff]  }
  0xfa   :  { %5443 = vmatprep.subr.bf16.mxu0 %v7889_v21  ;;  %5483 = vmatpush2.bf16.msra.mxu1 %v7884_v22  ;;  %v7968_v21 = vld [vmem:[#allocation6 + $0x6e4] ss:$8 sps:$4 sm:$0xff]   ;;  %v7963_v22 = vld [vmem:[#allocation6 + $0x7f0] ss:$8 sps:$4 sm:$0xff]  }
  0xfb   :  { %5484 = vmatprep.subr.bf16.mxu1 %v7892_v23  ;;  %v7971_v23 = vld [vmem:[#allocation6 + $0x7e4] ss:$8 sps:$4 sm:$0xff]  }
  0xfd   :  { %5444 = vmatpush2.bf16.msra.mxu0 %v7887_v24  ;;  %v7966_v24 = vld [vmem:[#allocation6 + $0x6e0] ss:$8 sps:$4 sm:$0xff]  }
  0xfe   :  { %5445 = vmatprep.subr.bf16.mxu0 %v7895_v25  ;;  %5485 = vmatpush2.bf16.msra.mxu1 %v7890_v26  ;;  %v7974_v25 = vld [vmem:[#allocation6 + $0x6d4] ss:$8 sps:$4 sm:$0xff]   ;;  %v7969_v26 = vld [vmem:[#allocation6 + $0x7e0] ss:$8 sps:$4 sm:$0xff]  }
  0xff   :  { %5486 = vmatprep.subr.bf16.mxu1 %v7898_v27  ;;  %v7977_v27 = vld [vmem:[#allocation6 + $0x7d4] ss:$8 sps:$4 sm:$0xff]  }
 0x101   :  { %5446 = vmatpush2.bf16.msra.mxu0 %v7893_v29  ;;  %v7980_v29 = vld [vmem:[#allocation6 + $0x6c4] ss:$8 sps:$4 sm:$0xff]  }
 0x102   :  { %5447 = vmatprep.subr.bf16.mxu0 %v7901_v30  ;;  %5487 = vmatpush2.bf16.msra.mxu1 %v7896_v31  ;;  %v7975_v30 = vld [vmem:[#allocation6 + $0x7d0] ss:$8 sps:$4 sm:$0xff]   ;;  %v7983_v31 = vld [vmem:[#allocation6 + $0x7c4] ss:$8 sps:$4 sm:$0xff]  }
 0x103   :  { %5488 = vmatprep.subr.bf16.mxu1 %v7904_v33  ;;  %v7986_v33 = vld [vmem:[#allocation6 + $0x6b4] ss:$8 sps:$4 sm:$0xff]  }
 0x105   :  { %5448 = vmatpush2.bf16.msra.mxu0 %v7899_v35  ;;  %v7981_v35 = vld [vmem:[#allocation6 + $0x7c0] ss:$8 sps:$4 sm:$0xff]  }
 0x106   :  { %5449 = vmatprep.subr.bf16.mxu0 %v7907_v37  ;;  %5489 = vmatpush2.bf16.msra.mxu1 %v7902_v38  ;;  %v7989_v37 = vld [vmem:[#allocation6 + $0x7b4] ss:$8 sps:$4 sm:$0xff]   ;;  %v7984_v38 = vld [vmem:[#allocation6 + $0x6b0] ss:$8 sps:$4 sm:$0xff]  }
 0x107   :  { %5490 = vmatprep.subr.bf16.mxu1 %v7910_v41  ;;  %v7992_v41 = vld [vmem:[#allocation6 + $0x6a4] ss:$8 sps:$4 sm:$0xff]  }
 0x109   :  { %5450 = vmatpush2.bf16.msra.mxu0 %v7905_v42  ;;  %v7987_v42 = vld [vmem:[#allocation6 + $0x7b0] ss:$8 sps:$4 sm:$0xff]  }
 0x10a   :  { %5501 = vmatprep.subr.bf16.mxu0 %v7913_v45  ;;  %5491 = vmatpush2.bf16.msra.mxu1 %v7908_v46  ;;  %v109_v45 = vld [vmem:[#allocation3 + $0x20] sm:$0xff] }
 0x10b   :  { %5542 = vmatprep.subr.bf16.mxu1 %v7917_v50  ;;  %v7990_v46 = vld [vmem:[#allocation6 + $0x6a0] ss:$8 sps:$4 sm:$0xff]   ;;  %v199_v50 = vcombine.high %v109_v45, %v109_v45 }
 0x10c   :  { %5452 = vmatmul.mubr.bf16.vlgmr.msra.gmra.mxu0 %v401_v49  ;;  %v7993_v49 = vld [vmem:[#allocation6 + $0x7a0] ss:$8 sps:$4 sm:$0xff]  }
 0x10d   :  { %5502 = vmatpush1.bf16.msra.mxu0 %v7911_v51  ;;  %5533 = vmatprep.mubr.bf16.mxu0 %v406_v52  ;;  %v8001_v51 = vld [vmem:[#allocation6 + $0x794] ss:$8 sps:$4 sm:$0xff]   ;;  %v7996_v52 = vld [vmem:[#allocation6 + $0x690] ss:$8 sps:$4 sm:$0xff]  }
 0x10e   :  { %5493 = vmatmul.mubr.bf16.vlgmr.msra.gmra.mxu1 %v403_v53  ;;  %5503 = vmatprep.subr.bf16.mxu0 %v7920_v54  ;;  %v9167_v53 = vrot.slane %v109_v45, %v9124_v48  ;;  %v8004_v54 = vld [vmem:[#allocation6 + $0x684] ss:$8 sps:$4 sm:$0xff]   ;;  %v8045_v45 = vld [vmem:[#allocation6 + $0x810] ss:$8 sps:$4 sm:$0xff]  }
 0x10f   :  { %5543 = vmatpush1.bf16.msra.mxu1 %v7915_v55  ;;  %5574 = vmatprep.mubr.bf16.mxu1 %v408_v56  ;;  %v7999_v55 = vld [vmem:[#allocation6 + $0x790] ss:$8 sps:$4 sm:$0xff]   ;;  %v9170_v56 = vrot.slane %v199_v50, %v9124_v48  ;;  %v8051_v50 = vld [vmem:[#allocation6 + $0x800] ss:$8 sps:$4 sm:$0xff]  }
 0x110   :  { %5544 = vmatprep.subr.bf16.mxu1 %v7923_v57  ;;  %v8007_v57 = vld [vmem:[#allocation6 + $0x784] ss:$8 sps:$4 sm:$0xff]  }
 0x111   :  { %5504 = vmatpush1.bf16.msra.mxu0 %v7918_v58  ;;  %v8002_v58 = vld [vmem:[#allocation6 + $0x680] ss:$8 sps:$4 sm:$0xff]  }
 0x112   :  { %5505 = vmatprep.subr.bf16.mxu0 %v7926_v34  ;;  %v1247_v34 = vsub.s32 0, %v9121_v43 }
 0x113   :  { %5545 = vmatpush1.bf16.msra.mxu1 %v7921_v59  ;;  %v214_v59 = vcombine.high %v9167_v53, %v9167_v53 }
 0x114   :  { %5546 = vmatprep.subr.bf16.mxu1 %v7929_v60  ;;  %v1243_v60 = vld [vmem:[#allocation8] sm:$0x3] }
 0x115   :  { %5506 = vmatpush1.bf16.msra.mxu0 %v7924_v39  ;;  %v8010_v39 = vld [vmem:[#allocation6 + $0x874] ss:$8 sps:$4 sm:$0xff]  }
 0x116   :  { %5507 = vmatprep.subr.bf16.mxu0 %v7932_v61  ;;  %v8005_v61 = vld [vmem:[#allocation6 + $0x780] ss:$8 sps:$4 sm:$0xff]  }
 0x117   :  { %5547 = vmatpush1.bf16.msra.mxu1 %v7927_v62  ;;  %v1251_v62 = vsub.s32 1, %v9121_v43  ;;  %v6574_v43 = vstv %s9370_s6 }
 0x118   :  { %5548 = vmatprep.subr.bf16.mxu1 %v7935_v63  ;;  %v215_v63 = vcombine.high %v9170_v56, %v9170_v56 }
 0x119   :  { %5508 = vmatpush1.bf16.msra.mxu0 %v7930_v0  ;;  %v405_v0 = vpack.c.bf16 %v9153_v36, %v9153_v36  ;;  %v8020_v36 = vld [vmem:[#allocation6 + $0x964] ss:$8 sps:$4 sm:$0xff]  }
 0x11a   :  { %5509 = vmatprep.subr.bf16.mxu0 %v7938_v1  ;;  %v8014_v1 = vld [vmem:[#allocation6 + $0x974] ss:$8 sps:$4 sm:$0xff]  }
 0x11b   :  { %5549 = vmatpush1.bf16.msra.mxu1 %v7933_v2  ;;  %v1248_v2 = vrot.slane %v1243_v60, %v1247_v34 }
 0x11c   :  { %5550 = vmatprep.subr.bf16.mxu1 %v7941_v3  ;;  %v8008_v3 = vld [vmem:[#allocation6 + $0x870] ss:$8 sps:$4 sm:$0xff]  }
 0x11d   :  { %5510 = vmatpush1.bf16.msra.mxu0 %v7936_v4  ;;  %v410_v4 = vpack.c.bf16 %v214_v59, %v214_v59  ;;  %v8065_v59 = vld [vmem:[#allocation6 + $0x8e4] ss:$8 sps:$4 sm:$0xff]  }
 0x11e   :  { %5511 = vmatprep.subr.bf16.mxu0 %v7944_v5  ;;  %v407_v5 = vpack.c.bf16 %v9156_v40, %v9156_v40  ;;  %v8023_v40 = vld [vmem:[#allocation6 + $0x854] ss:$8 sps:$4 sm:$0xff]  }
 0x11f   :  { %5551 = vmatpush1.bf16.msra.mxu1 %v7939_v6  ;;  %v8017_v6 = vld [vmem:[#allocation6 + $0x864] ss:$8 sps:$4 sm:$0xff]  }
 0x120   :  { %5552 = vmatprep.subr.bf16.mxu1 %v7947_v7  ;;  %v1252_v7 = vrot.slane %v1243_v60, %v1251_v62  ;;  %v8063_v60 = vld [vmem:[#allocation6 + $0x8e0] ss:$8 sps:$4 sm:$0xff]  }
 0x121   :  { %5512 = vmatpush1.bf16.msra.mxu0 %v7942_v8  ;;  %v8012_v8 = vld [vmem:[#allocation6 + $0x970] ss:$8 sps:$4 sm:$0xff]  }
 0x122   :  { %5513 = vmatprep.subr.bf16.mxu0 %v7950_v9  ;;  %v412_v9 = vpack.c.bf16 %v215_v63, %v215_v63  ;;  %v8071_v63 = vld [vmem:[#allocation6 + $0x8d4] ss:$8 sps:$4 sm:$0xff]  }
 0x123   :  { %5553 = vmatpush1.bf16.msra.mxu1 %v7945_v10 }
 0x124   :  { %5554 = vmatprep.subr.bf16.mxu1 %v7953_v11 }
 0x125   :  { %5514 = vmatpush1.bf16.msra.mxu0 %v7948_v12  ;;  %v8015_v12 = vld [vmem:[#allocation6 + $0x860] ss:$8 sps:$4 sm:$0xff]  }
 0x126   :  { %5515 = vmatprep.subr.bf16.mxu0 %v7956_v13 }
 0x127   :  { %5555 = vmatpush1.bf16.msra.mxu1 %v7951_v14 }
 0x128   :  { %5556 = vmatprep.subr.bf16.mxu1 %v7959_v15 }
 0x129   :  { %5516 = vmatpush1.bf16.msra.mxu0 %v7954_v16 }
 0x12a   :  { %5517 = vmatprep.subr.bf16.mxu0 %v7962_v17  ;;  %v8018_v17 = vld [vmem:[#allocation6 + $0x960] ss:$8 sps:$4 sm:$0xff]  }
 0x12b   :  { %5557 = vmatpush1.bf16.msra.mxu1 %v7957_v18 }
 0x12c   :  { %5558 = vmatprep.subr.bf16.mxu1 %v7965_v19 }
 0x12d   :  { %5518 = vmatpush2.bf16.msra.mxu0 %v7960_v20  ;;  %v8026_v20 = vld [vmem:[#allocation6 + $0x954] ss:$8 sps:$4 sm:$0xff]  }
 0x12e   :  { %5519 = vmatprep.subr.bf16.mxu0 %v7968_v21 }
 0x12f   :  { %5559 = vmatpush2.bf16.msra.mxu1 %v7963_v22  ;;  %v8021_v22 = vld [vmem:[#allocation6 + $0x850] ss:$8 sps:$4 sm:$0xff]  }
 0x130   :  { %5560 = vmatprep.subr.bf16.mxu1 %v7971_v23  ;;  %v8024_v23 = vld [vmem:[#allocation6 + $0x950] ss:$8 sps:$4 sm:$0xff]  }
 0x131   :  { %5520 = vmatpush2.bf16.msra.mxu0 %v7966_v24 }
 0x132   :  { %5521 = vmatprep.subr.bf16.mxu0 %v7974_v25  ;;  %v8029_v25 = vld [vmem:[#allocation6 + $0x844] ss:$8 sps:$4 sm:$0xff]  }
 0x133   :  { %5561 = vmatpush2.bf16.msra.mxu1 %v7969_v26 }
 0x134   :  { %5562 = vmatprep.subr.bf16.mxu1 %v7977_v27  ;;  %v8027_v27 = vld [vmem:[#allocation6 + $0x840] ss:$8 sps:$4 sm:$0xff]  }
 0x135   :  { %5522 = vmatpush2.bf16.msra.mxu0 %v7972_v28  ;;  %v8032_v28 = vld [vmem:[#allocation6 + $0x944] ss:$8 sps:$4 sm:$0xff]  }
 0x136   :  { %5523 = vmatprep.subr.bf16.mxu0 %v7980_v29 }
 0x137   :  { %5563 = vmatpush2.bf16.msra.mxu1 %v7975_v30  ;;  %v8030_v30 = vld [vmem:[#allocation6 + $0x940] ss:$8 sps:$4 sm:$0xff]  }
 0x138   :  { %5564 = vmatprep.subr.bf16.mxu1 %v7983_v31  ;;  %v8035_v31 = vld [vmem:[#allocation6 + $0x834] ss:$8 sps:$4 sm:$0xff]  }
 0x139   :  { %5524 = vmatpush2.bf16.msra.mxu0 %v7978_v32  ;;  %v8033_v32 = vld [vmem:[#allocation6 + $0x830] ss:$8 sps:$4 sm:$0xff]  }
 0x13a   :  { %5525 = vmatprep.subr.bf16.mxu0 %v7986_v33  ;;  %v8038_v33 = vld [vmem:[#allocation6 + $0x934] ss:$8 sps:$4 sm:$0xff]  }
 0x13b   :  { %5565 = vmatpush2.bf16.msra.mxu1 %v7981_v35  ;;  %v8036_v35 = vld [vmem:[#allocation6 + $0x930] ss:$8 sps:$4 sm:$0xff]  }
 0x13c   :  { %5566 = vmatprep.subr.bf16.mxu1 %v7989_v37  ;;  %v8041_v37 = vld [vmem:[#allocation6 + $0x824] ss:$8 sps:$4 sm:$0xff]  }
 0x13d   :  { %5526 = vmatpush2.bf16.msra.mxu0 %v7984_v38  ;;  %v8039_v38 = vld [vmem:[#allocation6 + $0x820] ss:$8 sps:$4 sm:$0xff]  }
 0x13e   :  { %5527 = vmatprep.subr.bf16.mxu0 %v7992_v41  ;;  %v8044_v41 = vld [vmem:[#allocation6 + $0x924] ss:$8 sps:$4 sm:$0xff]  }
 0x13f   :  { %5567 = vmatpush2.bf16.msra.mxu1 %v7987_v42  ;;  %v8042_v42 = vld [vmem:[#allocation6 + $0x920] ss:$8 sps:$4 sm:$0xff]  }
 0x140   :  { %5568 = vmatprep.subr.bf16.mxu1 %v7995_v44  ;;  %v8047_v44 = vld [vmem:[#allocation6 + $0x814] ss:$8 sps:$4 sm:$0xff]  }
 0x141   :  { %5528 = vmatpush2.bf16.msra.mxu0 %v7990_v46  ;;  %v8050_v46 = vld [vmem:[#allocation6 + $0x914] ss:$8 sps:$4 sm:$0xff]  }
 0x142   :  { %5529 = vmatprep.subr.bf16.mxu0 %v7998_v47  ;;  %v8048_v47 = vld [vmem:[#allocation6 + $0x910] ss:$8 sps:$4 sm:$0xff]  }
 0x143   :  { %5569 = vmatpush2.bf16.msra.mxu1 %v7993_v49  ;;  %v8053_v49 = vld [vmem:[#allocation6 + $0x804] ss:$8 sps:$4 sm:$0xff]  }
 0x144   :  { %5570 = vmatprep.subr.bf16.mxu1 %v8001_v51  ;;  %v8056_v51 = vld [vmem:[#allocation6 + $0x904] ss:$8 sps:$4 sm:$0xff]  }
 0x145   :  { %5530 = vmatpush2.bf16.msra.mxu0 %v7996_v52  ;;  %v8054_v52 = vld [vmem:[#allocation6 + $0x900] ss:$8 sps:$4 sm:$0xff]  }
 0x146   :  { %5531 = vmatprep.subr.bf16.mxu0 %v8004_v54  ;;  %v8059_v54 = vld [vmem:[#allocation6 + $0x8f4] ss:$8 sps:$4 sm:$0xff]  }
 0x147   :  { %5571 = vmatpush2.bf16.msra.mxu1 %v7999_v55  ;;  %v8057_v55 = vld [vmem:[#allocation6 + $0x8f0] ss:$8 sps:$4 sm:$0xff]  }
 0x148   :  { %5572 = vmatprep.subr.bf16.mxu1 %v8007_v57  ;;  %v8062_v57 = vld [vmem:[#allocation6 + $0x9f4] ss:$8 sps:$4 sm:$0xff]  }
 0x149   :  { %5532 = vmatpush2.bf16.msra.mxu0 %v8002_v58  ;;  %v8060_v58 = vld [vmem:[#allocation6 + $0x9f0] ss:$8 sps:$4 sm:$0xff]  }
 0x14a   :  { %5583 = vmatprep.subr.bf16.mxu0 %v8010_v39  ;;  %v8068_v39 = vld [vmem:[#allocation6 + $0x9e4] ss:$8 sps:$4 sm:$0xff]  }
 0x14b   :  { %5573 = vmatpush2.bf16.msra.mxu1 %v8005_v61  ;;  %v8066_v61 = vld [vmem:[#allocation6 + $0x9e0] ss:$8 sps:$4 sm:$0xff]  }
 0x14c   :  { %v5289_v10 = vpop.f32.mrf.mxu0  ;;  %5534 = vmatmul.mubr.bf16.vlgmr.msra.gmra.mxu0 %v405_v0  ;;  %5624 = vmatprep.subr.bf16.mxu1 %v8014_v1  ;;  %v8069_v0 = vld [vmem:[#allocation6 + $0x8d0] ss:$8 sps:$4 sm:$0xff]   ;;  %v8074_v1 = vld [vmem:[#allocation6 + $0x9d4] ss:$8 sps:$4 sm:$0xff]  }
 0x14d   :  { %v5290_v11 = vadd.f32 %v5289_v10, %v1248_v2  ;;  %5584 = vmatpush1.bf16.msra.mxu0 %v8008_v3  ;;  %5615 = vmatprep.mubr.bf16.mxu0 %v410_v4  ;;  %v5330_v14 = vpop.f32.mrf.mxu1  ;;  %v8072_v2 = vld [vmem:[#allocation6 + $0x9d0] ss:$8 sps:$4 sm:$0xff]   ;;  %v8077_v3 = vld [vmem:[#allocation6 + $0x8c4] ss:$8 sps:$4 sm:$0xff]   ;;  %v8075_v4 = vld [vmem:[#allocation6 + $0x8c0] ss:$8 sps:$4 sm:$0xff]  }
 0x14e   :  { %v5291_v13 = vpop.f32.mrf.mxu0  ;;  %5575 = vmatmul.mubr.bf16.vlgmr.msra.gmra.mxu1 %v407_v5  ;;  %5585 = vmatprep.subr.bf16.mxu0 %v8017_v6  ;;  %v8080_v5 = vld [vmem:[#allocation6 + $0x9c4] ss:$8 sps:$4 sm:$0xff]   ;;  %v8078_v6 = vld [vmem:[#allocation6 + $0x9c0] ss:$8 sps:$4 sm:$0xff]   ;;  %v8084_v10 = vld [vmem:[#allocation6 + $0x9b0] ss:$8 sps:$4 sm:$0xff]  }
 0x14f   :  { %v5292_v15 = vadd.f32 %v5291_v13, %v1252_v7  ;;  %v9186_v16 = vadd.f32 %v5330_v14, %v5290_v11  ;;  %5625 = vmatpush1.bf16.msra.mxu1 %v8012_v8  ;;  %5656 = vmatprep.mubr.bf16.mxu1 %v412_v9  ;;  %v5332_v19 = vpop.f32.mrf.mxu1  ;;  %v8083_v7 = vld [vmem:[#allocation6 + $0x8b4] ss:$8 sps:$4 sm:$0xff]   ;;  %v8081_v8 = vld [vmem:[#allocation6 + $0x8b0] ss:$8 sps:$4 sm:$0xff]   ;;  %v8092_v11 = vld [vmem:[#allocation6 + $0x9a4] ss:$8 sps:$4 sm:$0xff]  }
 0x150   :  { %v5293_v18 = vpop.f32.mrf.mxu0  ;;  %5626 = vmatprep.subr.bf16.mxu1 %v8020_v36  ;;  %v8086_v9 = vld [vmem:[#allocation6 + $0x9b4] ss:$8 sps:$4 sm:$0xff]   ;;  %v8089_v36 = vld [vmem:[#allocation6 + $0x8a4] ss:$8 sps:$4 sm:$0xff]   ;;  %v8087_v13 = vld [vmem:[#allocation6 + $0x8a0] ss:$8 sps:$4 sm:$0xff]  }
 0x151   :  { %v9188_v21 = vadd.f32 %v5332_v19, %v5292_v15  ;;  %5586 = vmatpush1.bf16.msra.mxu0 %v8015_v12  ;;  %v5334_v26 = vpop.f32.mrf.mxu1  ;;  %v110_v12 = vld [vmem:[#allocation3 + $0x28] sm:$0xff]  ;;  %v8095_v14 = vld [vmem:[#allocation6 + $0x894] ss:$8 sps:$4 sm:$0xff]   ;;  %v8093_v18 = vld [vmem:[#allocation6 + $0x890] ss:$8 sps:$4 sm:$0xff]  }
 0x152   :  { %v5294_v24 = vpop.f32.mrf.mxu0  ;;  %5587 = vmatprep.subr.bf16.mxu0 %v8023_v40  ;;  %v8090_v40 = vld [vmem:[#allocation6 + $0x9a0] ss:$8 sps:$4 sm:$0xff]   ;;  %v216_v15 = vcombine.high %v110_v12, %v110_v12  ;;  %v9191_v19 = vrot.slane %v110_v12, %v9124_v48  ;;  %v8150_v12 = vld [vmem:[#allocation6 + $0xa04] ss:$8 sps:$4 sm:$0xff]  }
 0x153   :  { %5627 = vmatpush1.bf16.msra.mxu1 %v8018_v17  ;;  %v5335_v29 = vpop.f32.mrf.mxu1  ;;  %v8098_v17 = vld [vmem:[#allocation6 + $0x994] ss:$8 sps:$4 sm:$0xff]   ;;  %v8099_v24 = vld [vmem:[#allocation6 + $0x880] ss:$8 sps:$4 sm:$0xff]  }
 0x154   :  { %5628 = vmatprep.subr.bf16.mxu1 %v8026_v20  ;;  %v8101_v20 = vld [vmem:[#allocation6 + $0x884] ss:$8 sps:$4 sm:$0xff]   ;;  %v8102_v26 = vld [vmem:[#allocation6 + $0x980] ss:$8 sps:$4 sm:$0xff]   ;;  %v8105_v29 = vld [vmem:[#allocation6 + $0xa70] ss:$8 sps:$4 sm:$0xff]  }
 0x155   :  { %5588 = vmatpush1.bf16.msra.mxu0 %v8021_v22  ;;  %v8096_v22 = vld [vmem:[#allocation6 + $0x990] ss:$8 sps:$4 sm:$0xff]  }
 0x156   :  { %5589 = vmatprep.subr.bf16.mxu0 %v8029_v25  ;;  %v8104_v25 = vld [vmem:[#allocation6 + $0x984] ss:$8 sps:$4 sm:$0xff]  }
 0x157   :  { %5629 = vmatpush1.bf16.msra.mxu1 %v8024_v23  ;;  %v9194_v23 = vrot.slane %v216_v15, %v9124_v48  ;;  %v8156_v15 = vld [vmem:[#allocation6 + $0xaf4] ss:$8 sps:$4 sm:$0xff]  }
 0x158   :  { %5630 = vmatprep.subr.bf16.mxu1 %v8032_v28  ;;  %v8107_v28 = vld [vmem:[#allocation6 + $0xa74] ss:$8 sps:$4 sm:$0xff]  }
 0x159   :  { %5590 = vmatpush1.bf16.msra.mxu0 %v8027_v27  ;;  %v231_v27 = vcombine.high %v9191_v19, %v9191_v19 }
 0x15a   :  { %5591 = vmatprep.subr.bf16.mxu0 %v8035_v31  ;;  %v409_v31 = vpack.c.bf16 %v9167_v53, %v9167_v53  ;;  %v8115_v53 = vld [vmem:[#allocation6 + $0xb60] ss:$8 sps:$4 sm:$0xff]  }
 0x15b   :  { %5631 = vmatpush1.bf16.msra.mxu1 %v8030_v30  ;;  %v232_v30 = vcombine.high %v9194_v23, %v9194_v23 }
 0x15c   :  { %5632 = vmatprep.subr.bf16.mxu1 %v8038_v33  ;;  %v8109_v33 = vld [vmem:[#allocation6 + $0xb70] ss:$8 sps:$4 sm:$0xff]  }
 0x15d   :  { %5592 = vmatpush1.bf16.msra.mxu0 %v8033_v32  ;;  %v8111_v32 = vld [vmem:[#allocation6 + $0xb74] ss:$8 sps:$4 sm:$0xff]  }
 0x15e   :  { %5593 = vmatprep.subr.bf16.mxu0 %v8041_v37  ;;  %v411_v37 = vpack.c.bf16 %v9170_v56, %v9170_v56 }
 0x15f   :  { %5633 = vmatpush1.bf16.msra.mxu1 %v8036_v35  ;;  %v414_v35 = vpack.c.bf16 %v231_v27, %v231_v27  ;;  %v8168_v27 = vld [vmem:[#allocation6 + $0xad4] ss:$8 sps:$4 sm:$0xff]  }
 0x160   :  { %5634 = vmatprep.subr.bf16.mxu1 %v8044_v41  ;;  %v8112_v41 = vld [vmem:[#allocation6 + $0xa60] ss:$8 sps:$4 sm:$0xff]  }
 0x161   :  { %5594 = vmatpush1.bf16.msra.mxu0 %v8039_v38  ;;  %v8114_v38 = vld [vmem:[#allocation6 + $0xa64] ss:$8 sps:$4 sm:$0xff]  }
 0x162   :  { %5595 = vmatprep.subr.bf16.mxu0 %v8047_v44 }
 0x163   :  { %5635 = vmatpush1.bf16.msra.mxu1 %v8042_v42  ;;  %v416_v42 = vpack.c.bf16 %v232_v30, %v232_v30  ;;  %v8169_v30 = vld [vmem:[#allocation6 + $0xbd0] ss:$8 sps:$4 sm:$0xff]  }
 0x164   :  { %5636 = vmatprep.subr.bf16.mxu1 %v8050_v46 }
 0x165   :  { %5596 = vmatpush1.bf16.msra.mxu0 %v8045_v45  ;;  %v8117_v45 = vld [vmem:[#allocation6 + $0xb64] ss:$8 sps:$4 sm:$0xff]  }
 0x166   :  { %5597 = vmatprep.subr.bf16.mxu0 %v8053_v49 }
 0x167   :  { %5637 = vmatpush1.bf16.msra.mxu1 %v8048_v47 }
 0x168   :  { %5638 = vmatprep.subr.bf16.mxu1 %v8056_v51 }
 0x169   :  { %5598 = vmatpush1.bf16.msra.mxu0 %v8051_v50  ;;  %v8120_v50 = vld [vmem:[#allocation6 + $0xa54] ss:$8 sps:$4 sm:$0xff]  }
 0x16a   :  { %5599 = vmatprep.subr.bf16.mxu0 %v8059_v54 }
 0x16b   :  { %5639 = vmatpush1.bf16.msra.mxu1 %v8054_v52  ;;  %v8118_v52 = vld [vmem:[#allocation6 + $0xa50] ss:$8 sps:$4 sm:$0xff]  }
 0x16c   :  { %5640 = vmatprep.subr.bf16.mxu1 %v8062_v57  ;;  %v8123_v57 = vld [vmem:[#allocation6 + $0xb54] ss:$8 sps:$4 sm:$0xff]  }
 0x16d   :  { %5600 = vmatpush2.bf16.msra.mxu0 %v8057_v55 }
 0x16e   :  { %5601 = vmatprep.subr.bf16.mxu0 %v8065_v59 }
 0x16f   :  { %5641 = vmatpush2.bf16.msra.mxu1 %v8060_v58  ;;  %v8121_v58 = vld [vmem:[#allocation6 + $0xb50] ss:$8 sps:$4 sm:$0xff]  }
 0x170   :  { %5642 = vmatprep.subr.bf16.mxu1 %v8068_v39 }
 0x171   :  { %5602 = vmatpush2.bf16.msra.mxu0 %v8063_v60  ;;  %v8126_v60 = vld [vmem:[#allocation6 + $0xa44] ss:$8 sps:$4 sm:$0xff]  }
 0x172   :  { %5603 = vmatprep.subr.bf16.mxu0 %v8071_v63 }
 0x173   :  { %5643 = vmatpush2.bf16.msra.mxu1 %v8066_v61  ;;  %v8124_v61 = vld [vmem:[#allocation6 + $0xa40] ss:$8 sps:$4 sm:$0xff]  }
 0x174   :  { %5644 = vmatprep.subr.bf16.mxu1 %v8074_v1  ;;  %v8132_v1 = vld [vmem:[#allocation6 + $0xa34] ss:$8 sps:$4 sm:$0xff]  }
 0x175   :  { %5604 = vmatpush2.bf16.msra.mxu0 %v8069_v0  ;;  %v8127_v0 = vld [vmem:[#allocation6 + $0xb40] ss:$8 sps:$4 sm:$0xff]  }
 0x176   :  { %5605 = vmatprep.subr.bf16.mxu0 %v8077_v3  ;;  %v8135_v3 = vld [vmem:[#allocation6 + $0xb34] ss:$8 sps:$4 sm:$0xff]  }
 0x177   :  { %5645 = vmatpush2.bf16.msra.mxu1 %v8072_v2  ;;  %v8130_v2 = vld [vmem:[#allocation6 + $0xa30] ss:$8 sps:$4 sm:$0xff]  }
 0x178   :  { %5646 = vmatprep.subr.bf16.mxu1 %v8080_v5  ;;  %v8138_v5 = vld [vmem:[#allocation6 + $0xa24] ss:$8 sps:$4 sm:$0xff]  }
 0x179   :  { %5606 = vmatpush2.bf16.msra.mxu0 %v8075_v4  ;;  %v8133_v4 = vld [vmem:[#allocation6 + $0xb30] ss:$8 sps:$4 sm:$0xff]  }
 0x17a   :  { %5607 = vmatprep.subr.bf16.mxu0 %v8083_v7  ;;  %v8141_v7 = vld [vmem:[#allocation6 + $0xb24] ss:$8 sps:$4 sm:$0xff]  }
 0x17b   :  { %5647 = vmatpush2.bf16.msra.mxu1 %v8078_v6  ;;  %v8136_v6 = vld [vmem:[#allocation6 + $0xa20] ss:$8 sps:$4 sm:$0xff]  }
 0x17c   :  { %5648 = vmatprep.subr.bf16.mxu1 %v8086_v9  ;;  %v8144_v9 = vld [vmem:[#allocation6 + $0xa14] ss:$8 sps:$4 sm:$0xff]  }
 0x17d   :  { %5608 = vmatpush2.bf16.msra.mxu0 %v8081_v8  ;;  %v8139_v8 = vld [vmem:[#allocation6 + $0xb20] ss:$8 sps:$4 sm:$0xff]  }
 0x17e   :  { %5609 = vmatprep.subr.bf16.mxu0 %v8089_v36  ;;  %v8147_v36 = vld [vmem:[#allocation6 + $0xb14] ss:$8 sps:$4 sm:$0xff]  }
 0x17f   :  { %5649 = vmatpush2.bf16.msra.mxu1 %v8084_v10  ;;  %v8142_v10 = vld [vmem:[#allocation6 + $0xa10] ss:$8 sps:$4 sm:$0xff]  }
 0x180   :  { %5650 = vmatprep.subr.bf16.mxu1 %v8092_v11  ;;  %v8145_v11 = vld [vmem:[#allocation6 + $0xb10] ss:$8 sps:$4 sm:$0xff]  }
 0x181   :  { %5610 = vmatpush2.bf16.msra.mxu0 %v8087_v13  ;;  %v8148_v13 = vld [vmem:[#allocation6 + $0xa00] ss:$8 sps:$4 sm:$0xff]  }
 0x182   :  { %5611 = vmatprep.subr.bf16.mxu0 %v8095_v14  ;;  %v8153_v14 = vld [vmem:[#allocation6 + $0xb04] ss:$8 sps:$4 sm:$0xff]  }
 0x183   :  { %5651 = vmatpush2.bf16.msra.mxu1 %v8090_v40  ;;  %v8151_v40 = vld [vmem:[#allocation6 + $0xb00] ss:$8 sps:$4 sm:$0xff]  }
 0x184   :  { %5652 = vmatprep.subr.bf16.mxu1 %v8098_v17  ;;  %v8154_v17 = vld [vmem:[#allocation6 + $0xaf0] ss:$8 sps:$4 sm:$0xff]  }
 0x185   :  { %5612 = vmatpush2.bf16.msra.mxu0 %v8093_v18  ;;  %v8159_v18 = vld [vmem:[#allocation6 + $0xbf4] ss:$8 sps:$4 sm:$0xff]  }
 0x186   :  { %5613 = vmatprep.subr.bf16.mxu0 %v8101_v20  ;;  %v8157_v20 = vld [vmem:[#allocation6 + $0xbf0] ss:$8 sps:$4 sm:$0xff]  }
 0x187   :  { %5653 = vmatpush2.bf16.msra.mxu1 %v8096_v22  ;;  %v8162_v22 = vld [vmem:[#allocation6 + $0xae4] ss:$8 sps:$4 sm:$0xff]  }
 0x188   :  { %5654 = vmatprep.subr.bf16.mxu1 %v8104_v25  ;;  %v8165_v25 = vld [vmem:[#allocation6 + $0xbe4] ss:$8 sps:$4 sm:$0xff]  }
 0x189   :  { %5614 = vmatpush2.bf16.msra.mxu0 %v8099_v24  ;;  %v8160_v24 = vld [vmem:[#allocation6 + $0xae0] ss:$8 sps:$4 sm:$0xff]  }
 0x18a   :  { %5665 = vmatprep.subr.bf16.mxu0 %v8107_v28  ;;  %v8166_v28 = vld [vmem:[#allocation6 + $0xad0] ss:$8 sps:$4 sm:$0xff]  }
 0x18b   :  { %5655 = vmatpush2.bf16.msra.mxu1 %v8102_v26  ;;  %v8163_v26 = vld [vmem:[#allocation6 + $0xbe0] ss:$8 sps:$4 sm:$0xff]  }
 0x18c   :  { %v5371_v44 = vpop.f32.mrf.mxu0  ;;  %5616 = vmatmul.mubr.bf16.vlgmr.msra.gmra.mxu0 %v409_v31  ;;  %5706 = vmatprep.subr.bf16.mxu1 %v8111_v32  ;;  %v8174_v31 = vld [vmem:[#allocation6 + $0xac4] ss:$8 sps:$4 sm:$0xff]   ;;  %v8172_v32 = vld [vmem:[#allocation6 + $0xac0] ss:$8 sps:$4 sm:$0xff]  }
 0x18d   :  { %v5372_v46 = vadd.f32 %v5371_v44, %v9186_v16  ;;  %5666 = vmatpush1.bf16.msra.mxu0 %v8105_v29  ;;  %5697 = vmatprep.mubr.bf16.mxu0 %v414_v35  ;;  %v5412_v49 = vpop.f32.mrf.mxu1  ;;  %v8171_v29 = vld [vmem:[#allocation6 + $0xbd4] ss:$8 sps:$4 sm:$0xff]   ;;  %v8175_v35 = vld [vmem:[#allocation6 + $0xbc0] ss:$8 sps:$4 sm:$0xff]   ;;  %v8186_v44 = vld [vmem:[#allocation6 + $0xaa4] ss:$8 sps:$4 sm:$0xff]  }
 0x18e   :  { %v5373_v47 = vpop.f32.mrf.mxu0  ;;  %5657 = vmatmul.mubr.bf16.vlgmr.msra.gmra.mxu1 %v411_v37  ;;  %5667 = vmatprep.subr.bf16.mxu0 %v8114_v38  ;;  %v8180_v37 = vld [vmem:[#allocation6 + $0xab4] ss:$8 sps:$4 sm:$0xff]   ;;  %v8178_v38 = vld [vmem:[#allocation6 + $0xab0] ss:$8 sps:$4 sm:$0xff]  }
 0x18f   :  { %v5374_v56 = vadd.f32 %v5373_v47, %v9188_v21  ;;  %v9206_v51 = vadd.f32 %v5412_v49, %v5372_v46  ;;  %5707 = vmatpush1.bf16.msra.mxu1 %v8109_v33  ;;  %5738 = vmatprep.mubr.bf16.mxu1 %v416_v42  ;;  %v5414_v55 = vpop.f32.mrf.mxu1  ;;  %v8129_v21 = vld [vmem:[#allocation6 + $0xb44] ss:$8 sps:$4 sm:$0xff]   ;;  %v8181_v42 = vld [vmem:[#allocation6 + $0xbb0] ss:$8 sps:$4 sm:$0xff]   ;;  %v8192_v47 = vld [vmem:[#allocation6 + $0xa94] ss:$8 sps:$4 sm:$0xff]  }
 0x190   :  { %v5375_v54 = vpop.f32.mrf.mxu0  ;;  %5708 = vmatprep.subr.bf16.mxu1 %v8117_v45  ;;  %v8177_v33 = vld [vmem:[#allocation6 + $0xbc4] ss:$8 sps:$4 sm:$0xff]   ;;  %v8187_v49 = vld [vmem:[#allocation6 + $0xba0] ss:$8 sps:$4 sm:$0xff]  }
 0x191   :  { %v9208_v16 = vadd.f32 %v5414_v55, %v5374_v56  ;;  %5668 = vmatpush1.bf16.msra.mxu0 %v8112_v41  ;;  %v5416_v39 = vpop.f32.mrf.mxu1  ;;  %v8183_v41 = vld [vmem:[#allocation6 + $0xbb4] ss:$8 sps:$4 sm:$0xff]   ;;  %v8189_v45 = vld [vmem:[#allocation6 + $0xba4] ss:$8 sps:$4 sm:$0xff]  }
 0x192   :  { %v5376_v59 = vpop.f32.mrf.mxu0  ;;  %5669 = vmatprep.subr.bf16.mxu0 %v8120_v50  ;;  %v111_v46 = vld [vmem:[#allocation3 + $0x30] sm:$0xff]  ;;  %v8195_v56 = vld [vmem:[#allocation6 + $0xb94] ss:$8 sps:$4 sm:$0xff]   ;;  %v8199_v39 = vld [vmem:[#allocation6 + $0xb80] ss:$8 sps:$4 sm:$0xff]  }
 0x193   :  { %5709 = vmatpush1.bf16.msra.mxu1 %v8115_v53  ;;  %v5417_v63 = vpop.f32.mrf.mxu1  ;;  %v8184_v53 = vld [vmem:[#allocation6 + $0xaa0] ss:$8 sps:$4 sm:$0xff]   ;;  %v233_v50 = vcombine.high %v111_v46, %v111_v46  ;;  %v9211_v54 = vrot.slane %v111_v46, %v9124_v48  ;;  %v8198_v55 = vld [vmem:[#allocation6 + $0xa84] ss:$8 sps:$4 sm:$0xff]  }
 0x194   :  { %5710 = vmatprep.subr.bf16.mxu1 %v8123_v57  ;;  %v8193_v57 = vld [vmem:[#allocation6 + $0xb90] ss:$8 sps:$4 sm:$0xff]   ;;  %v8196_v59 = vld [vmem:[#allocation6 + $0xa80] ss:$8 sps:$4 sm:$0xff]   ;;  %v8247_v46 = vld [vmem:[#allocation6 + $0xc04] ss:$8 sps:$4 sm:$0xff]  }
 0x195   :  { %5670 = vmatpush1.bf16.msra.mxu0 %v8118_v52  ;;  %v8190_v52 = vld [vmem:[#allocation6 + $0xa90] ss:$8 sps:$4 sm:$0xff]  }
 0x196   :  { %5671 = vmatprep.subr.bf16.mxu0 %v8126_v60  ;;  %v8201_v60 = vld [vmem:[#allocation6 + $0xb84] ss:$8 sps:$4 sm:$0xff]   ;;  %v8202_v63 = vld [vmem:[#allocation6 + $0xc70] ss:$8 sps:$4 sm:$0xff]  }
 0x197   :  { %5711 = vmatpush1.bf16.msra.mxu1 %v8121_v58  ;;  %v9214_v58 = vrot.slane %v233_v50, %v9124_v48  ;;  %v8253_v50 = vld [vmem:[#allocation6 + $0xcf4] ss:$8 sps:$4 sm:$0xff]  }
 0x198   :  { %5712 = vmatprep.subr.bf16.mxu1 %v8129_v21  ;;  %v8204_v21 = vld [vmem:[#allocation6 + $0xc74] ss:$8 sps:$4 sm:$0xff]  }
 0x199   :  { %5672 = vmatpush1.bf16.msra.mxu0 %v8124_v61  ;;  %v248_v61 = vcombine.high %v9211_v54, %v9211_v54 }
 0x19a   :  { %5673 = vmatprep.subr.bf16.mxu0 %v8132_v1  ;;  %v413_v1 = vpack.c.bf16 %v9191_v19, %v9191_v19  ;;  %v8212_v19 = vld [vmem:[#allocation6 + $0xd60] ss:$8 sps:$4 sm:$0xff]  }
 0x19b   :  { %5713 = vmatpush1.bf16.msra.mxu1 %v8127_v0  ;;  %v249_v0 = vcombine.high %v9214_v58, %v9214_v58 }
 0x19c   :  { %5714 = vmatprep.subr.bf16.mxu1 %v8135_v3  ;;  %v8206_v3 = vld [vmem:[#allocation6 + $0xd70] ss:$8 sps:$4 sm:$0xff]  }
 0x19d   :  { %5674 = vmatpush1.bf16.msra.mxu0 %v8130_v2  ;;  %v8208_v2 = vld [vmem:[#allocation6 + $0xd74] ss:$8 sps:$4 sm:$0xff]  }
 0x19e   :  { %5675 = vmatprep.subr.bf16.mxu0 %v8138_v5  ;;  %v415_v5 = vpack.c.bf16 %v9194_v23, %v9194_v23 }
 0x19f   :  { %5715 = vmatpush1.bf16.msra.mxu1 %v8133_v4  ;;  %v418_v4 = vpack.c.bf16 %v248_v61, %v248_v61  ;;  %v8265_v61 = vld [vmem:[#allocation6 + $0xcd4] ss:$8 sps:$4 sm:$0xff]  }
 0x1a0   :  { %5716 = vmatprep.subr.bf16.mxu1 %v8141_v7  ;;  %v8209_v7 = vld [vmem:[#allocation6 + $0xc60] ss:$8 sps:$4 sm:$0xff]  }
 0x1a1   :  { %5676 = vmatpush1.bf16.msra.mxu0 %v8136_v6  ;;  %v8211_v6 = vld [vmem:[#allocation6 + $0xc64] ss:$8 sps:$4 sm:$0xff]  }
 0x1a2   :  { %5677 = vmatprep.subr.bf16.mxu0 %v8144_v9 }
 0x1a3   :  { %5717 = vmatpush1.bf16.msra.mxu1 %v8139_v8  ;;  %v420_v8 = vpack.c.bf16 %v249_v0, %v249_v0  ;;  %v8266_v0 = vld [vmem:[#allocation6 + $0xdd0] ss:$8 sps:$4 sm:$0xff]  }
 0x1a4   :  { %5718 = vmatprep.subr.bf16.mxu1 %v8147_v36 }
 0x1a5   :  { %5678 = vmatpush1.bf16.msra.mxu0 %v8142_v10  ;;  %v8214_v10 = vld [vmem:[#allocation6 + $0xd64] ss:$8 sps:$4 sm:$0xff]  }
 0x1a6   :  { %5679 = vmatprep.subr.bf16.mxu0 %v8150_v12 }
 0x1a7   :  { %5719 = vmatpush1.bf16.msra.mxu1 %v8145_v11 }
 0x1a8   :  { %5720 = vmatprep.subr.bf16.mxu1 %v8153_v14 }
 0x1a9   :  { %5680 = vmatpush1.bf16.msra.mxu0 %v8148_v13  ;;  %v8217_v13 = vld [vmem:[#allocation6 + $0xc54] ss:$8 sps:$4 sm:$0xff]  }
 0x1aa   :  { %5681 = vmatprep.subr.bf16.mxu0 %v8156_v15 }
 0x1ab   :  { %5721 = vmatpush1.bf16.msra.mxu1 %v8151_v40  ;;  %v8215_v40 = vld [vmem:[#allocation6 + $0xc50] ss:$8 sps:$4 sm:$0xff]  }
 0x1ac   :  { %5722 = vmatprep.subr.bf16.mxu1 %v8159_v18  ;;  %v8220_v18 = vld [vmem:[#allocation6 + $0xd54] ss:$8 sps:$4 sm:$0xff]  }
 0x1ad   :  { %5682 = vmatpush2.bf16.msra.mxu0 %v8154_v17 }
 0x1ae   :  { %5683 = vmatprep.subr.bf16.mxu0 %v8162_v22 }
 0x1af   :  { %5723 = vmatpush2.bf16.msra.mxu1 %v8157_v20  ;;  %v8218_v20 = vld [vmem:[#allocation6 + $0xd50] ss:$8 sps:$4 sm:$0xff]  }
 0x1b0   :  { %5724 = vmatprep.subr.bf16.mxu1 %v8165_v25 }
 0x1b1   :  { %5684 = vmatpush2.bf16.msra.mxu0 %v8160_v24  ;;  %v8223_v24 = vld [vmem:[#allocation6 + $0xc44] ss:$8 sps:$4 sm:$0xff]  }
 0x1b2   :  { %5685 = vmatprep.subr.bf16.mxu0 %v8168_v27 }
 0x1b3   :  { %5725 = vmatpush2.bf16.msra.mxu1 %v8163_v26  ;;  %v8221_v26 = vld [vmem:[#allocation6 + $0xc40] ss:$8 sps:$4 sm:$0xff]  }
 0x1b4   :  { %5726 = vmatprep.subr.bf16.mxu1 %v8171_v29  ;;  %v8229_v29 = vld [vmem:[#allocation6 + $0xc34] ss:$8 sps:$4 sm:$0xff]  }
 0x1b5   :  { %5686 = vmatpush2.bf16.msra.mxu0 %v8166_v28  ;;  %v8224_v28 = vld [vmem:[#allocation6 + $0xd40] ss:$8 sps:$4 sm:$0xff]  }
 0x1b6   :  { %5687 = vmatprep.subr.bf16.mxu0 %v8174_v31  ;;  %v8232_v31 = vld [vmem:[#allocation6 + $0xd34] ss:$8 sps:$4 sm:$0xff]  }
 0x1b7   :  { %5727 = vmatpush2.bf16.msra.mxu1 %v8169_v30  ;;  %v8227_v30 = vld [vmem:[#allocation6 + $0xc30] ss:$8 sps:$4 sm:$0xff]  }
 0x1b8   :  { %5728 = vmatprep.subr.bf16.mxu1 %v8177_v33  ;;  %v8235_v33 = vld [vmem:[#allocation6 + $0xc24] ss:$8 sps:$4 sm:$0xff]  }
 0x1b9   :  { %5688 = vmatpush2.bf16.msra.mxu0 %v8172_v32  ;;  %v8230_v32 = vld [vmem:[#allocation6 + $0xd30] ss:$8 sps:$4 sm:$0xff]  }
 0x1ba   :  { %5689 = vmatprep.subr.bf16.mxu0 %v8180_v37  ;;  %v8238_v37 = vld [vmem:[#allocation6 + $0xd24] ss:$8 sps:$4 sm:$0xff]  }
 0x1bb   :  { %5729 = vmatpush2.bf16.msra.mxu1 %v8175_v35  ;;  %v8233_v35 = vld [vmem:[#allocation6 + $0xc20] ss:$8 sps:$4 sm:$0xff]  }
 0x1bc   :  { %5730 = vmatprep.subr.bf16.mxu1 %v8183_v41  ;;  %v8241_v41 = vld [vmem:[#allocation6 + $0xc14] ss:$8 sps:$4 sm:$0xff]  }
 0x1bd   :  { %5690 = vmatpush2.bf16.msra.mxu0 %v8178_v38  ;;  %v8236_v38 = vld [vmem:[#allocation6 + $0xd20] ss:$8 sps:$4 sm:$0xff]  }
 0x1be   :  { %5691 = vmatprep.subr.bf16.mxu0 %v8186_v44  ;;  %v8244_v44 = vld [vmem:[#allocation6 + $0xd14] ss:$8 sps:$4 sm:$0xff]  }
 0x1bf   :  { %5731 = vmatpush2.bf16.msra.mxu1 %v8181_v42  ;;  %v8239_v42 = vld [vmem:[#allocation6 + $0xc10] ss:$8 sps:$4 sm:$0xff]  }
 0x1c0   :  { %5732 = vmatprep.subr.bf16.mxu1 %v8189_v45  ;;  %v8242_v45 = vld [vmem:[#allocation6 + $0xd10] ss:$8 sps:$4 sm:$0xff]  }
 0x1c1   :  { %5692 = vmatpush2.bf16.msra.mxu0 %v8184_v53  ;;  %v8245_v53 = vld [vmem:[#allocation6 + $0xc00] ss:$8 sps:$4 sm:$0xff]  }
 0x1c2   :  { %5693 = vmatprep.subr.bf16.mxu0 %v8192_v47  ;;  %v8250_v47 = vld [vmem:[#allocation6 + $0xd04] ss:$8 sps:$4 sm:$0xff]  }
 0x1c3   :  { %5733 = vmatpush2.bf16.msra.mxu1 %v8187_v49  ;;  %v8248_v49 = vld [vmem:[#allocation6 + $0xd00] ss:$8 sps:$4 sm:$0xff]  }
 0x1c4   :  { %5734 = vmatprep.subr.bf16.mxu1 %v8195_v56  ;;  %v8251_v56 = vld [vmem:[#allocation6 + $0xcf0] ss:$8 sps:$4 sm:$0xff]  }
 0x1c5   :  { %5694 = vmatpush2.bf16.msra.mxu0 %v8190_v52  ;;  %v8256_v52 = vld [vmem:[#allocation6 + $0xdf4] ss:$8 sps:$4 sm:$0xff]  }
 0x1c6   :  { %5695 = vmatprep.subr.bf16.mxu0 %v8198_v55  ;;  %v8254_v55 = vld [vmem:[#allocation6 + $0xdf0] ss:$8 sps:$4 sm:$0xff]  }
 0x1c7   :  { %5735 = vmatpush2.bf16.msra.mxu1 %v8193_v57  ;;  %v8259_v57 = vld [vmem:[#allocation6 + $0xce4] ss:$8 sps:$4 sm:$0xff]  }
 0x1c8   :  { %5736 = vmatprep.subr.bf16.mxu1 %v8201_v60  ;;  %v8262_v60 = vld [vmem:[#allocation6 + $0xde4] ss:$8 sps:$4 sm:$0xff]  }
 0x1c9   :  { %5696 = vmatpush2.bf16.msra.mxu0 %v8196_v59  ;;  %v8257_v59 = vld [vmem:[#allocation6 + $0xce0] ss:$8 sps:$4 sm:$0xff]  }
 0x1ca   :  { %5747 = vmatprep.subr.bf16.mxu0 %v8204_v21  ;;  %v8263_v21 = vld [vmem:[#allocation6 + $0xcd0] ss:$8 sps:$4 sm:$0xff]  }
 0x1cb   :  { %5737 = vmatpush2.bf16.msra.mxu1 %v8199_v39  ;;  %v8260_v39 = vld [vmem:[#allocation6 + $0xde0] ss:$8 sps:$4 sm:$0xff]  }
 0x1cc   :  { %v5453_v9 = vpop.f32.mrf.mxu0  ;;  %5698 = vmatmul.mubr.bf16.vlgmr.msra.gmra.mxu0 %v413_v1  ;;  %5788 = vmatprep.subr.bf16.mxu1 %v8208_v2  ;;  %v8271_v1 = vld [vmem:[#allocation6 + $0xcc4] ss:$8 sps:$4 sm:$0xff]   ;;  %v8269_v2 = vld [vmem:[#allocation6 + $0xcc0] ss:$8 sps:$4 sm:$0xff]  }
 0x1cd   :  { %v5454_v36 = vadd.f32 %v5453_v9, %v9206_v51  ;;  %5748 = vmatpush1.bf16.msra.mxu0 %v8202_v63  ;;  %5779 = vmatprep.mubr.bf16.mxu0 %v418_v4  ;;  %v8268_v63 = vld [vmem:[#allocation6 + $0xdd4] ss:$8 sps:$4 sm:$0xff]   ;;  %v8272_v4 = vld [vmem:[#allocation6 + $0xdc0] ss:$8 sps:$4 sm:$0xff]   ;;  %v8283_v9 = vld [vmem:[#allocation6 + $0xca4] ss:$8 sps:$4 sm:$0xff]  }
 0x1ce   :  { %v5455_v11 = vpop.f32.mrf.mxu0  ;;  %v5494_v12 = vpop.f32.mrf.mxu1  ;;  %5739 = vmatmul.mubr.bf16.vlgmr.msra.gmra.mxu1 %v415_v5  ;;  %5749 = vmatprep.subr.bf16.mxu0 %v8211_v6  ;;  %v8277_v5 = vld [vmem:[#allocation6 + $0xcb4] ss:$8 sps:$4 sm:$0xff]   ;;  %v8275_v6 = vld [vmem:[#allocation6 + $0xcb0] ss:$8 sps:$4 sm:$0xff]  }
 0x1cf   :  { %v5456_v23 = vadd.f32 %v5455_v11, %v9208_v16  ;;  %v9226_v14 = vadd.f32 %v5494_v12, %v5454_v36  ;;  %5789 = vmatpush1.bf16.msra.mxu1 %v8206_v3  ;;  %5820 = vmatprep.mubr.bf16.mxu1 %v420_v8  ;;  %v8226_v16 = vld [vmem:[#allocation6 + $0xd44] ss:$8 sps:$4 sm:$0xff]   ;;  %v8278_v8 = vld [vmem:[#allocation6 + $0xdb0] ss:$8 sps:$4 sm:$0xff]   ;;  %v8289_v11 = vld [vmem:[#allocation6 + $0xc94] ss:$8 sps:$4 sm:$0xff]  }
 0x1d0   :  { %v5457_v15 = vpop.f32.mrf.mxu0  ;;  %v5496_v17 = vpop.f32.mrf.mxu1  ;;  %5790 = vmatprep.subr.bf16.mxu1 %v8214_v10  ;;  %v8274_v3 = vld [vmem:[#allocation6 + $0xdc4] ss:$8 sps:$4 sm:$0xff]   ;;  %v112_v36 = vld [vmem:[#allocation3 + $0x38] sm:$0xff]  ;;  %v8284_v12 = vld [vmem:[#allocation6 + $0xda0] ss:$8 sps:$4 sm:$0xff]  }
 0x1d1   :  { %v9228_v51 = vadd.f32 %v5496_v17, %v5456_v23  ;;  %5750 = vmatpush1.bf16.msra.mxu0 %v8209_v7  ;;  %v8280_v7 = vld [vmem:[#allocation6 + $0xdb4] ss:$8 sps:$4 sm:$0xff]   ;;  %v8286_v10 = vld [vmem:[#allocation6 + $0xda4] ss:$8 sps:$4 sm:$0xff]   ;;  %v9231_v15 = vrot.slane %v112_v36, %v9124_v48 }
 0x1d2   :  { %v5458_v22 = vpop.f32.mrf.mxu0  ;;  %5751 = vmatprep.subr.bf16.mxu0 %v8217_v13  ;;  %v5498_v25 = vpop.f32.mrf.mxu1  ;;  %v250_v13 = vcombine.high %v112_v36, %v112_v36  ;;  %v8292_v23 = vld [vmem:[#allocation6 + $0xd94] ss:$8 sps:$4 sm:$0xff]   ;;  %v8295_v17 = vld [vmem:[#allocation6 + $0xc84] ss:$8 sps:$4 sm:$0xff]  }
 0x1d3   :  { %5791 = vmatpush1.bf16.msra.mxu1 %v8212_v19  ;;  %v8281_v19 = vld [vmem:[#allocation6 + $0xca0] ss:$8 sps:$4 sm:$0xff]   ;;  %v8344_v36 = vld [vmem:[#allocation6 + $0xe04] ss:$8 sps:$4 sm:$0xff]  }
 0x1d4   :  { %5792 = vmatprep.subr.bf16.mxu1 %v8220_v18  ;;  %v5499_v27 = vpop.f32.mrf.mxu1  ;;  %v8290_v18 = vld [vmem:[#allocation6 + $0xd90] ss:$8 sps:$4 sm:$0xff]   ;;  %v8293_v22 = vld [vmem:[#allocation6 + $0xc80] ss:$8 sps:$4 sm:$0xff]  }
 0x1d5   :  { %5752 = vmatpush1.bf16.msra.mxu0 %v8215_v40  ;;  %v8287_v40 = vld [vmem:[#allocation6 + $0xc90] ss:$8 sps:$4 sm:$0xff]   ;;  %v8296_v25 = vld [vmem:[#allocation6 + $0xd80] ss:$8 sps:$4 sm:$0xff]  }
 0x1d6   :  { %5753 = vmatprep.subr.bf16.mxu0 %v8223_v24  ;;  %v8298_v24 = vld [vmem:[#allocation6 + $0xd84] ss:$8 sps:$4 sm:$0xff]   ;;  %v8299_v27 = vld [vmem:[#allocation6 + $0xe70] ss:$8 sps:$4 sm:$0xff]  }
 0x1d7   :  { %5793 = vmatpush1.bf16.msra.mxu1 %v8218_v20  ;;  %v9234_v20 = vrot.slane %v250_v13, %v9124_v48  ;;  %v8350_v13 = vld [vmem:[#allocation6 + $0xef4] ss:$8 sps:$4 sm:$0xff]  }
 0x1d8   :  { %5794 = vmatprep.subr.bf16.mxu1 %v8226_v16  ;;  %v8301_v16 = vld [vmem:[#allocation6 + $0xe74] ss:$8 sps:$4 sm:$0xff]  }
 0x1d9   :  { %5754 = vmatpush1.bf16.msra.mxu0 %v8221_v26  ;;  %v265_v26 = vcombine.high %v9231_v15, %v9231_v15 }
 0x1da   :  { %5755 = vmatprep.subr.bf16.mxu0 %v8229_v29  ;;  %v417_v29 = vpack.c.bf16 %v9211_v54, %v9211_v54  ;;  %v8309_v54 = vld [vmem:[#allocation6 + $0xf60] ss:$8 sps:$4 sm:$0xff]  }
 0x1db   :  { %5795 = vmatpush1.bf16.msra.mxu1 %v8224_v28  ;;  %v266_v28 = vcombine.high %v9234_v20, %v9234_v20 }
 0x1dc   :  { %5796 = vmatprep.subr.bf16.mxu1 %v8232_v31  ;;  %v8303_v31 = vld [vmem:[#allocation6 + $0xf70] ss:$8 sps:$4 sm:$0xff]  }
 0x1dd   :  { %5756 = vmatpush1.bf16.msra.mxu0 %v8227_v30  ;;  %v8305_v30 = vld [vmem:[#allocation6 + $0xf74] ss:$8 sps:$4 sm:$0xff]  }
 0x1de   :  { %5757 = vmatprep.subr.bf16.mxu0 %v8235_v33  ;;  %v419_v33 = vpack.c.bf16 %v9214_v58, %v9214_v58 }
 0x1df   :  { %5797 = vmatpush1.bf16.msra.mxu1 %v8230_v32  ;;  %v422_v32 = vpack.c.bf16 %v265_v26, %v265_v26  ;;  %v8362_v26 = vld [vmem:[#allocation6 + $0xed4] ss:$8 sps:$4 sm:$0xff]  }
 0x1e0   :  { %5798 = vmatprep.subr.bf16.mxu1 %v8238_v37  ;;  %v8306_v37 = vld [vmem:[#allocation6 + $0xe60] ss:$8 sps:$4 sm:$0xff]  }
 0x1e1   :  { %5758 = vmatpush1.bf16.msra.mxu0 %v8233_v35  ;;  %v8308_v35 = vld [vmem:[#allocation6 + $0xe64] ss:$8 sps:$4 sm:$0xff]  }
 0x1e2   :  { %5759 = vmatprep.subr.bf16.mxu0 %v8241_v41 }
 0x1e3   :  { %5799 = vmatpush1.bf16.msra.mxu1 %v8236_v38  ;;  %v424_v38 = vpack.c.bf16 %v266_v28, %v266_v28  ;;  %v8363_v28 = vld [vmem:[#allocation6 + $0xfd0] ss:$8 sps:$4 sm:$0xff]  }
 0x1e4   :  { %5800 = vmatprep.subr.bf16.mxu1 %v8244_v44 }
 0x1e5   :  { %5760 = vmatpush1.bf16.msra.mxu0 %v8239_v42  ;;  %v8311_v42 = vld [vmem:[#allocation6 + $0xf64] ss:$8 sps:$4 sm:$0xff]  }
 0x1e6   :  { %5761 = vmatprep.subr.bf16.mxu0 %v8247_v46 }
 0x1e7   :  { %5801 = vmatpush1.bf16.msra.mxu1 %v8242_v45 }
 0x1e8   :  { %5802 = vmatprep.subr.bf16.mxu1 %v8250_v47 }
 0x1e9   :  { %5762 = vmatpush1.bf16.msra.mxu0 %v8245_v53  ;;  %v8314_v53 = vld [vmem:[#allocation6 + $0xe54] ss:$8 sps:$4 sm:$0xff]  }
 0x1ea   :  { %5763 = vmatprep.subr.bf16.mxu0 %v8253_v50 }
 0x1eb   :  { %5803 = vmatpush1.bf16.msra.mxu1 %v8248_v49  ;;  %v8312_v49 = vld [vmem:[#allocation6 + $0xe50] ss:$8 sps:$4 sm:$0xff]  }
 0x1ec   :  { %5804 = vmatprep.subr.bf16.mxu1 %v8256_v52  ;;  %v8317_v52 = vld [vmem:[#allocation6 + $0xf54] ss:$8 sps:$4 sm:$0xff]  }
 0x1ed   :  { %5764 = vmatpush2.bf16.msra.mxu0 %v8251_v56 }
 0x1ee   :  { %5765 = vmatprep.subr.bf16.mxu0 %v8259_v57 }
 0x1ef   :  { %5805 = vmatpush2.bf16.msra.mxu1 %v8254_v55  ;;  %v8315_v55 = vld [vmem:[#allocation6 + $0xf50] ss:$8 sps:$4 sm:$0xff]  }
 0x1f0   :  { %5806 = vmatprep.subr.bf16.mxu1 %v8262_v60 }
 0x1f1   :  { %5766 = vmatpush2.bf16.msra.mxu0 %v8257_v59  ;;  %v8320_v59 = vld [vmem:[#allocation6 + $0xe44] ss:$8 sps:$4 sm:$0xff]  }
 0x1f2   :  { %5767 = vmatprep.subr.bf16.mxu0 %v8265_v61 }
 0x1f3   :  { %5807 = vmatpush2.bf16.msra.mxu1 %v8260_v39  ;;  %v8318_v39 = vld [vmem:[#allocation6 + $0xe40] ss:$8 sps:$4 sm:$0xff]  }
 0x1f4   :  { %5808 = vmatprep.subr.bf16.mxu1 %v8268_v63  ;;  %v8326_v63 = vld [vmem:[#allocation6 + $0xe34] ss:$8 sps:$4 sm:$0xff]  }
 0x1f5   :  { %5768 = vmatpush2.bf16.msra.mxu0 %v8263_v21  ;;  %v8321_v21 = vld [vmem:[#allocation6 + $0xf40] ss:$8 sps:$4 sm:$0xff]  }
 0x1f6   :  { %5769 = vmatprep.subr.bf16.mxu0 %v8271_v1  ;;  %v8329_v1 = vld [vmem:[#allocation6 + $0xf34] ss:$8 sps:$4 sm:$0xff]  }
 0x1f7   :  { %5809 = vmatpush2.bf16.msra.mxu1 %v8266_v0  ;;  %v8324_v0 = vld [vmem:[#allocation6 + $0xe30] ss:$8 sps:$4 sm:$0xff]  }
 0x1f8   :  { %5810 = vmatprep.subr.bf16.mxu1 %v8274_v3  ;;  %v8332_v3 = vld [vmem:[#allocation6 + $0xe24] ss:$8 sps:$4 sm:$0xff]  }
 0x1f9   :  { %5770 = vmatpush2.bf16.msra.mxu0 %v8269_v2  ;;  %v8327_v2 = vld [vmem:[#allocation6 + $0xf30] ss:$8 sps:$4 sm:$0xff]  }
 0x1fa   :  { %5771 = vmatprep.subr.bf16.mxu0 %v8277_v5  ;;  %v8335_v5 = vld [vmem:[#allocation6 + $0xf24] ss:$8 sps:$4 sm:$0xff]  }
 0x1fb   :  { %5811 = vmatpush2.bf16.msra.mxu1 %v8272_v4  ;;  %v8330_v4 = vld [vmem:[#allocation6 + $0xe20] ss:$8 sps:$4 sm:$0xff]  }
 0x1fc   :  { %5812 = vmatprep.subr.bf16.mxu1 %v8280_v7  ;;  %v8338_v7 = vld [vmem:[#allocation6 + $0xe14] ss:$8 sps:$4 sm:$0xff]  }
 0x1fd   :  { %5772 = vmatpush2.bf16.msra.mxu0 %v8275_v6  ;;  %v8333_v6 = vld [vmem:[#allocation6 + $0xf20] ss:$8 sps:$4 sm:$0xff]  }
 0x1fe   :  { %5773 = vmatprep.subr.bf16.mxu0 %v8283_v9  ;;  %v8341_v9 = vld [vmem:[#allocation6 + $0xf14] ss:$8 sps:$4 sm:$0xff]  }
 0x1ff   :  { %5813 = vmatpush2.bf16.msra.mxu1 %v8278_v8  ;;  %v8336_v8 = vld [vmem:[#allocation6 + $0xe10] ss:$8 sps:$4 sm:$0xff]  }
 0x200   :  { %5814 = vmatprep.subr.bf16.mxu1 %v8286_v10  ;;  %v8339_v10 = vld [vmem:[#allocation6 + $0xf10] ss:$8 sps:$4 sm:$0xff]  }
 0x201   :  { %5774 = vmatpush2.bf16.msra.mxu0 %v8281_v19  ;;  %v8342_v19 = vld [vmem:[#allocation6 + $0xe00] ss:$8 sps:$4 sm:$0xff]  }
 0x202   :  { %5775 = vmatprep.subr.bf16.mxu0 %v8289_v11  ;;  %v8347_v11 = vld [vmem:[#allocation6 + $0xf04] ss:$8 sps:$4 sm:$0xff]  }
 0x203   :  { %5815 = vmatpush2.bf16.msra.mxu1 %v8284_v12  ;;  %v8345_v12 = vld [vmem:[#allocation6 + $0xf00] ss:$8 sps:$4 sm:$0xff]  }
 0x204   :  { %5816 = vmatprep.subr.bf16.mxu1 %v8292_v23  ;;  %v8348_v23 = vld [vmem:[#allocation6 + $0xef0] ss:$8 sps:$4 sm:$0xff]  }
 0x205   :  { %5776 = vmatpush2.bf16.msra.mxu0 %v8287_v40  ;;  %v8353_v40 = vld [vmem:[#allocation6 + $0xff4] ss:$8 sps:$4 sm:$0xff]  }
 0x206   :  { %5777 = vmatprep.subr.bf16.mxu0 %v8295_v17  ;;  %v8351_v17 = vld [vmem:[#allocation6 + $0xff0] ss:$8 sps:$4 sm:$0xff]  }
 0x207   :  { %5817 = vmatpush2.bf16.msra.mxu1 %v8290_v18  ;;  %v8356_v18 = vld [vmem:[#allocation6 + $0xee4] ss:$8 sps:$4 sm:$0xff]  }
 0x208   :  { %5818 = vmatprep.subr.bf16.mxu1 %v8298_v24  ;;  %v8359_v24 = vld [vmem:[#allocation6 + $0xfe4] ss:$8 sps:$4 sm:$0xff]  }
 0x209   :  { %5778 = vmatpush2.bf16.msra.mxu0 %v8293_v22  ;;  %v8354_v22 = vld [vmem:[#allocation6 + $0xee0] ss:$8 sps:$4 sm:$0xff]  }
 0x20a   :  { %5829 = vmatprep.subr.bf16.mxu0 %v8301_v16  ;;  %v8360_v16 = vld [vmem:[#allocation6 + $0xed0] ss:$8 sps:$4 sm:$0xff]  }
 0x20b   :  { %5819 = vmatpush2.bf16.msra.mxu1 %v8296_v25  ;;  %v8357_v25 = vld [vmem:[#allocation6 + $0xfe0] ss:$8 sps:$4 sm:$0xff]  }
 0x20c   :  { %v5535_v41 = vpop.f32.mrf.mxu0  ;;  %5780 = vmatmul.mubr.bf16.vlgmr.msra.gmra.mxu0 %v417_v29  ;;  %5870 = vmatprep.subr.bf16.mxu1 %v8305_v30  ;;  %v8368_v29 = vld [vmem:[#allocation6 + $0xec4] ss:$8 sps:$4 sm:$0xff]   ;;  %v8366_v30 = vld [vmem:[#allocation6 + $0xec0] ss:$8 sps:$4 sm:$0xff]  }
 0x20d   :  { %v5536_v44 = vadd.f32 %v5535_v41, %v9226_v14  ;;  %5830 = vmatpush1.bf16.msra.mxu0 %v8299_v27  ;;  %5861 = vmatprep.mubr.bf16.mxu0 %v422_v32  ;;  %v8365_v27 = vld [vmem:[#allocation6 + $0xfd4] ss:$8 sps:$4 sm:$0xff]   ;;  %v8369_v32 = vld [vmem:[#allocation6 + $0xfc0] ss:$8 sps:$4 sm:$0xff]   ;;  %v8380_v41 = vld [vmem:[#allocation6 + $0xea4] ss:$8 sps:$4 sm:$0xff]  }
 0x20e   :  { %v5537_v45 = vpop.f32.mrf.mxu0  ;;  %v5576_v46 = vpop.f32.mrf.mxu1  ;;  %5821 = vmatmul.mubr.bf16.vlgmr.msra.gmra.mxu1 %v419_v33  ;;  %5831 = vmatprep.subr.bf16.mxu0 %v8308_v35  ;;  %v8374_v33 = vld [vmem:[#allocation6 + $0xeb4] ss:$8 sps:$4 sm:$0xff]   ;;  %v8372_v35 = vld [vmem:[#allocation6 + $0xeb0] ss:$8 sps:$4 sm:$0xff]  }
 0x20f   :  { %v5538_v58 = vadd.f32 %v5537_v45, %v9228_v51  ;;  %v9246_v47 = vadd.f32 %v5576_v46, %v5536_v44  ;;  %5871 = vmatpush1.bf16.msra.mxu1 %v8303_v31  ;;  %5902 = vmatprep.mubr.bf16.mxu1 %v424_v38  ;;  %v8323_v51 = vld [vmem:[#allocation6 + $0xf44] ss:$8 sps:$4 sm:$0xff]   ;;  %v8375_v38 = vld [vmem:[#allocation6 + $0xfb0] ss:$8 sps:$4 sm:$0xff]   ;;  %v113_v44 = vld [vmem:[#allocation3 + $0x40] sm:$0xff] }
 0x210   :  { %v5539_v50 = vpop.f32.mrf.mxu0  ;;  %v5578_v56 = vpop.f32.mrf.mxu1  ;;  %5872 = vmatprep.subr.bf16.mxu1 %v8311_v42  ;;  %v8371_v31 = vld [vmem:[#allocation6 + $0xfc4] ss:$8 sps:$4 sm:$0xff]   ;;  %v8386_v45 = vld [vmem:[#allocation6 + $0xe94] ss:$8 sps:$4 sm:$0xff]   ;;  %v8381_v46 = vld [vmem:[#allocation6 + $0xfa0] ss:$8 sps:$4 sm:$0xff]  }
 0x211   :  { %v9248_v14 = vadd.f32 %v5578_v56, %v5538_v58  ;;  %5832 = vmatpush1.bf16.msra.mxu0 %v8306_v37  ;;  %v8377_v37 = vld [vmem:[#allocation6 + $0xfb4] ss:$8 sps:$4 sm:$0xff]   ;;  %v8383_v42 = vld [vmem:[#allocation6 + $0xfa4] ss:$8 sps:$4 sm:$0xff]   ;;  %v9251_v50 = vrot.slane %v113_v44, %v9124_v48 }
 0x212   :  { %v5540_v57 = vpop.f32.mrf.mxu0  ;;  %5833 = vmatprep.subr.bf16.mxu0 %v8314_v53  ;;  %v5580_v60 = vpop.f32.mrf.mxu1  ;;  %v267_v53 = vcombine.high %v113_v44, %v113_v44  ;;  %v8389_v58 = vld [vmem:[#allocation6 + $0xf94] ss:$8 sps:$4 sm:$0xff]   ;;  %v8392_v56 = vld [vmem:[#allocation6 + $0xe84] ss:$8 sps:$4 sm:$0xff]   ;;  %v8436_v44 = vld [vmem:[#allocation6 + $0x1110] ss:$8 sps:$4 sm:$0xff]  }
 0x213   :  { %5873 = vmatpush1.bf16.msra.mxu1 %v8309_v54  ;;  %v8378_v54 = vld [vmem:[#allocation6 + $0xea0] ss:$8 sps:$4 sm:$0xff]   ;;  %v8395_v57 = vld [vmem:[#allocation6 + $0xf84] ss:$8 sps:$4 sm:$0xff]   ;;  %v282_v60 = vcombine.high %v9251_v50, %v9251_v50 }
 0x214   :  { %5874 = vmatprep.subr.bf16.mxu1 %v8317_v52  ;;  %v5581_v61 = vpop.f32.mrf.mxu1  ;;  %v8387_v52 = vld [vmem:[#allocation6 + $0xf90] ss:$8 sps:$4 sm:$0xff]  }
 0x215   :  { %5834 = vmatpush1.bf16.msra.mxu0 %v8312_v49  ;;  %v8384_v49 = vld [vmem:[#allocation6 + $0xe90] ss:$8 sps:$4 sm:$0xff]  }
 0x216   :  { %5835 = vmatprep.subr.bf16.mxu0 %v8320_v59  ;;  %v8390_v59 = vld [vmem:[#allocation6 + $0xe80] ss:$8 sps:$4 sm:$0xff]  }
 0x217   :  { %5875 = vmatpush1.bf16.msra.mxu1 %v8315_v55  ;;  %v9254_v55 = vrot.slane %v267_v53, %v9124_v48  ;;  %v8442_v53 = vld [vmem:[#allocation6 + $0x1100] ss:$8 sps:$4 sm:$0xff]  }
 0x218   :  { %5876 = vmatprep.subr.bf16.mxu1 %v8323_v51  ;;  %v8393_v51 = vld [vmem:[#allocation6 + $0xf80] ss:$8 sps:$4 sm:$0xff]  }
 0x219   :  { %5836 = vmatpush1.bf16.msra.mxu0 %v8318_v39  ;;  %v8398_v39 = vld [vmem:[#allocation6 + $0x1074] ss:$8 sps:$4 sm:$0xff]   ;;  %v283_v61 = vcombine.high %v9254_v55, %v9254_v55 }
 0x21a   :  { %5837 = vmatprep.subr.bf16.mxu0 %v8326_v63  ;;  %v8402_v63 = vld [vmem:[#allocation6 + $0x1174] ss:$8 sps:$4 sm:$0xff]  }
 0x21b   :  { %5877 = vmatpush1.bf16.msra.mxu1 %v8321_v21  ;;  %v421_v21 = vpack.c.bf16 %v9231_v15, %v9231_v15  ;;  %v8403_v15 = vld [vmem:[#allocation6 + $0x1060] ss:$8 sps:$4 sm:$0xff]  }
 0x21c   :  { %5878 = vmatprep.subr.bf16.mxu1 %v8329_v1  ;;  %v426_v1 = vpack.c.bf16 %v282_v60, %v282_v60  ;;  %v8459_v60 = vld [vmem:[#allocation6 + $0x10d4] ss:$8 sps:$4 sm:$0xff]  }
 0x21d   :  { %5838 = vmatpush1.bf16.msra.mxu0 %v8324_v0  ;;  %v8396_v0 = vld [vmem:[#allocation6 + $0x1070] ss:$8 sps:$4 sm:$0xff]  }
 0x21e   :  { %5839 = vmatprep.subr.bf16.mxu0 %v8332_v3  ;;  %v8405_v3 = vld [vmem:[#allocation6 + $0x1064] ss:$8 sps:$4 sm:$0xff]  }
 0x21f   :  { %5879 = vmatpush1.bf16.msra.mxu1 %v8327_v2  ;;  %v423_v2 = vpack.c.bf16 %v9234_v20, %v9234_v20 }
 0x220   :  { %5880 = vmatprep.subr.bf16.mxu1 %v8335_v5  ;;  %v428_v5 = vpack.c.bf16 %v283_v61, %v283_v61  ;;  %v8457_v61 = vld [vmem:[#allocation6 + $0x10d0] ss:$8 sps:$4 sm:$0xff]  }
 0x221   :  { %5840 = vmatpush1.bf16.msra.mxu0 %v8330_v4  ;;  %v8400_v4 = vld [vmem:[#allocation6 + $0x1170] ss:$8 sps:$4 sm:$0xff]  }
 0x222   :  { %5841 = vmatprep.subr.bf16.mxu0 %v8338_v7  ;;  %v8408_v7 = vld [vmem:[#allocation6 + $0x1164] ss:$8 sps:$4 sm:$0xff]  }
 0x223   :  { %5881 = vmatpush1.bf16.msra.mxu1 %v8333_v6 }
 0x224   :  { %5882 = vmatprep.subr.bf16.mxu1 %v8341_v9 }
 0x225   :  { %5842 = vmatpush1.bf16.msra.mxu0 %v8336_v8 }
 0x226   :  { %5843 = vmatprep.subr.bf16.mxu0 %v8344_v36  ;;  %v8411_v36 = vld [vmem:[#allocation6 + $0x1054] ss:$8 sps:$4 sm:$0xff]  }
 0x227   :  { %5883 = vmatpush1.bf16.msra.mxu1 %v8339_v10 }
 0x228   :  { %5884 = vmatprep.subr.bf16.mxu1 %v8347_v11  ;;  %v8406_v11 = vld [vmem:[#allocation6 + $0x1160] ss:$8 sps:$4 sm:$0xff]  }
 0x229   :  { %5844 = vmatpush1.bf16.msra.mxu0 %v8342_v19 }
 0x22a   :  { %5845 = vmatprep.subr.bf16.mxu0 %v8350_v13 }
 0x22b   :  { %5885 = vmatpush1.bf16.msra.mxu1 %v8345_v12 }
 0x22c   :  { %5886 = vmatprep.subr.bf16.mxu1 %v8353_v40  ;;  %v8409_v40 = vld [vmem:[#allocation6 + $0x1050] ss:$8 sps:$4 sm:$0xff]  }
 0x22d   :  { %5846 = vmatpush2.bf16.msra.mxu0 %v8348_v23  ;;  %v8414_v23 = vld [vmem:[#allocation6 + $0x1154] ss:$8 sps:$4 sm:$0xff]  }
 0x22e   :  { %5847 = vmatprep.subr.bf16.mxu0 %v8356_v18  ;;  %v8417_v18 = vld [vmem:[#allocation6 + $0x1044] ss:$8 sps:$4 sm:$0xff]  }
 0x22f   :  { %5887 = vmatpush2.bf16.msra.mxu1 %v8351_v17 }
 0x230   :  { %5888 = vmatprep.subr.bf16.mxu1 %v8359_v24  ;;  %v8412_v24 = vld [vmem:[#allocation6 + $0x1150] ss:$8 sps:$4 sm:$0xff]  }
 0x231   :  { %5848 = vmatpush2.bf16.msra.mxu0 %v8354_v22 }
 0x232   :  { %5849 = vmatprep.subr.bf16.mxu0 %v8362_v26  ;;  %v8415_v26 = vld [vmem:[#allocation6 + $0x1040] ss:$8 sps:$4 sm:$0xff]  }
 0x233   :  { %5889 = vmatpush2.bf16.msra.mxu1 %v8357_v25 }
 0x234   :  { %5890 = vmatprep.subr.bf16.mxu1 %v8365_v27  ;;  %v8418_v27 = vld [vmem:[#allocation6 + $0x1140] ss:$8 sps:$4 sm:$0xff]  }
 0x235   :  { %5850 = vmatpush2.bf16.msra.mxu0 %v8360_v16  ;;  %v8423_v16 = vld [vmem:[#allocation6 + $0x1034] ss:$8 sps:$4 sm:$0xff]  }
 0x236   :  { %5851 = vmatprep.subr.bf16.mxu0 %v8368_v29  ;;  %v8421_v29 = vld [vmem:[#allocation6 + $0x1030] ss:$8 sps:$4 sm:$0xff]  }
 0x237   :  { %5891 = vmatpush2.bf16.msra.mxu1 %v8363_v28  ;;  %v8426_v28 = vld [vmem:[#allocation6 + $0x1134] ss:$8 sps:$4 sm:$0xff]  }
 0x238   :  { %5892 = vmatprep.subr.bf16.mxu1 %v8371_v31  ;;  %v8424_v31 = vld [vmem:[#allocation6 + $0x1130] ss:$8 sps:$4 sm:$0xff]  }
 0x239   :  { %5852 = vmatpush2.bf16.msra.mxu0 %v8366_v30  ;;  %v8429_v30 = vld [vmem:[#allocation6 + $0x1024] ss:$8 sps:$4 sm:$0xff]  }
 0x23a   :  { %5853 = vmatprep.subr.bf16.mxu0 %v8374_v33  ;;  %v8427_v33 = vld [vmem:[#allocation6 + $0x1020] ss:$8 sps:$4 sm:$0xff]  }
 0x23b   :  { %5893 = vmatpush2.bf16.msra.mxu1 %v8369_v32  ;;  %v8432_v32 = vld [vmem:[#allocation6 + $0x1124] ss:$8 sps:$4 sm:$0xff]  }
 0x23c   :  { %5894 = vmatprep.subr.bf16.mxu1 %v8377_v37  ;;  %v8430_v37 = vld [vmem:[#allocation6 + $0x1120] ss:$8 sps:$4 sm:$0xff]  }
 0x23d   :  { %5854 = vmatpush2.bf16.msra.mxu0 %v8372_v35  ;;  %v8435_v35 = vld [vmem:[#allocation6 + $0x1014] ss:$8 sps:$4 sm:$0xff]  }
 0x23e   :  { %5855 = vmatprep.subr.bf16.mxu0 %v8380_v41  ;;  %v8433_v41 = vld [vmem:[#allocation6 + $0x1010] ss:$8 sps:$4 sm:$0xff]  }
 0x23f   :  { %5895 = vmatpush2.bf16.msra.mxu1 %v8375_v38  ;;  %v8438_v38 = vld [vmem:[#allocation6 + $0x1114] ss:$8 sps:$4 sm:$0xff]  }
 0x240   :  { %5896 = vmatprep.subr.bf16.mxu1 %v8383_v42  ;;  %v8441_v42 = vld [vmem:[#allocation6 + $0x1004] ss:$8 sps:$4 sm:$0xff]  }
 0x241   :  { %5856 = vmatpush2.bf16.msra.mxu0 %v8378_v54  ;;  %v8444_v54 = vld [vmem:[#allocation6 + $0x1104] ss:$8 sps:$4 sm:$0xff]  }
 0x242   :  { %5857 = vmatprep.subr.bf16.mxu0 %v8386_v45  ;;  %v8439_v45 = vld [vmem:[#allocation6 + $0x1000] ss:$8 sps:$4 sm:$0xff]  }
 0x243   :  { %5897 = vmatpush2.bf16.msra.mxu1 %v8381_v46  ;;  %v8447_v46 = vld [vmem:[#allocation6 + $0x10f4] ss:$8 sps:$4 sm:$0xff]  }
 0x244   :  { %5898 = vmatprep.subr.bf16.mxu1 %v8389_v58  ;;  %v8450_v58 = vld [vmem:[#allocation6 + $0x11f4] ss:$8 sps:$4 sm:$0xff]  }
 0x245   :  { %5858 = vmatpush2.bf16.msra.mxu0 %v8384_v49  ;;  %v8445_v49 = vld [vmem:[#allocation6 + $0x10f0] ss:$8 sps:$4 sm:$0xff]  }
 0x246   :  { %5859 = vmatprep.subr.bf16.mxu0 %v8392_v56  ;;  %v8453_v56 = vld [vmem:[#allocation6 + $0x10e4] ss:$8 sps:$4 sm:$0xff]  }
 0x247   :  { %5899 = vmatpush2.bf16.msra.mxu1 %v8387_v52  ;;  %v8448_v52 = vld [vmem:[#allocation6 + $0x11f0] ss:$8 sps:$4 sm:$0xff]  }
 0x248   :  { %5900 = vmatprep.subr.bf16.mxu1 %v8395_v57  ;;  %v8456_v57 = vld [vmem:[#allocation6 + $0x11e4] ss:$8 sps:$4 sm:$0xff]  }
 0x249   :  { %5860 = vmatpush2.bf16.msra.mxu0 %v8390_v59  ;;  %v8451_v59 = vld [vmem:[#allocation6 + $0x10e0] ss:$8 sps:$4 sm:$0xff]  }
 0x24a   :  { %5911 = vmatprep.subr.bf16.mxu0 %v8398_v39  ;;  %v8454_v39 = vld [vmem:[#allocation6 + $0x11e0] ss:$8 sps:$4 sm:$0xff]  }
 0x24b   :  { %5901 = vmatpush2.bf16.msra.mxu1 %v8393_v51  ;;  %v8462_v51 = vld [vmem:[#allocation6 + $0x11d4] ss:$8 sps:$4 sm:$0xff]  }
 0x24c   :  { %v5617_v6 = vpop.f32.mrf.mxu0  ;;  %5862 = vmatmul.mubr.bf16.vlgmr.msra.gmra.mxu0 %v421_v21  ;;  %5952 = vmatprep.subr.bf16.mxu1 %v8402_v63  ;;  %v8465_v21 = vld [vmem:[#allocation6 + $0x10c4] ss:$8 sps:$4 sm:$0xff]   ;;  %v8460_v63 = vld [vmem:[#allocation6 + $0x11d0] ss:$8 sps:$4 sm:$0xff]  }
 0x24d   :  { %v5618_v8 = vadd.f32 %v5617_v6, %v9246_v47  ;;  %5912 = vmatpush1.bf16.msra.mxu0 %v8396_v0  ;;  %5943 = vmatprep.mubr.bf16.mxu0 %v426_v1  ;;  %v8468_v0 = vld [vmem:[#allocation6 + $0x11c4] ss:$8 sps:$4 sm:$0xff]   ;;  %v8463_v1 = vld [vmem:[#allocation6 + $0x10c0] ss:$8 sps:$4 sm:$0xff]  }
 0x24e   :  { %v5619_v9 = vpop.f32.mrf.mxu0  ;;  %v5658_v10 = vpop.f32.mrf.mxu1  ;;  %5903 = vmatmul.mubr.bf16.vlgmr.msra.gmra.mxu1 %v423_v2  ;;  %5913 = vmatprep.subr.bf16.mxu0 %v8405_v3  ;;  %v8471_v2 = vld [vmem:[#allocation6 + $0x10b4] ss:$8 sps:$4 sm:$0xff]   ;;  %v8466_v3 = vld [vmem:[#allocation6 + $0x11c0] ss:$8 sps:$4 sm:$0xff]   ;;  %v8477_v6 = vld [vmem:[#allocation6 + $0x10a4] ss:$8 sps:$4 sm:$0xff]  }
 0x24f   :  { %v5620_v20 = vadd.f32 %v5619_v9, %v9248_v14  ;;  %v9266_v19 = vadd.f32 %v5658_v10, %v5618_v8  ;;  %5953 = vmatpush1.bf16.msra.mxu1 %v8400_v4  ;;  %5984 = vmatprep.mubr.bf16.mxu1 %v428_v5  ;;  %v8420_v14 = vld [vmem:[#allocation6 + $0x1144] ss:$8 sps:$4 sm:$0xff]   ;;  %v8474_v4 = vld [vmem:[#allocation6 + $0x11b4] ss:$8 sps:$4 sm:$0xff]   ;;  %v8469_v5 = vld [vmem:[#allocation6 + $0x10b0] ss:$8 sps:$4 sm:$0xff]  }
 0x250   :  { %v5621_v12 = vpop.f32.mrf.mxu0  ;;  %v5660_v13 = vpop.f32.mrf.mxu1  ;;  %5954 = vmatprep.subr.bf16.mxu1 %v8408_v7  ;;  %v8472_v7 = vld [vmem:[#allocation6 + $0x11b0] ss:$8 sps:$4 sm:$0xff]   ;;  %v8480_v8 = vld [vmem:[#allocation6 + $0x11a4] ss:$8 sps:$4 sm:$0xff]   ;;  %v8475_v9 = vld [vmem:[#allocation6 + $0x10a0] ss:$8 sps:$4 sm:$0xff]  }
 0x251   :  { %v9268_v47 = vadd.f32 %v5660_v13, %v5620_v20  ;;  %5914 = vmatpush1.bf16.msra.mxu0 %v8403_v15  ;;  %v114_v15 = vld [vmem:[#allocation3 + $0x48] sm:$0xff]  ;;  %v8483_v10 = vld [vmem:[#allocation6 + $0x1094] ss:$8 sps:$4 sm:$0xff]   ;;  %v8481_v12 = vld [vmem:[#allocation6 + $0x1090] ss:$8 sps:$4 sm:$0xff]  }
 0x252   :  { %v5622_v17 = vpop.f32.mrf.mxu0  ;;  %5915 = vmatprep.subr.bf16.mxu0 %v8411_v36  ;;  %v5662_v22 = vpop.f32.mrf.mxu1  ;;  %v8478_v36 = vld [vmem:[#allocation6 + $0x11a0] ss:$8 sps:$4 sm:$0xff]   ;;  %v284_v20 = vcombine.high %v114_v15, %v114_v15  ;;  %v9271_v13 = vrot.slane %v114_v15, %v9124_v48  ;;  %v8533_v15 = vld [vmem:[#allocation6 + $0x1310] ss:$8 sps:$4 sm:$0xff]  }
 0x253   :  { %5955 = vmatpush1.bf16.msra.mxu1 %v8406_v11  ;;  %v8486_v11 = vld [vmem:[#allocation6 + $0x1194] ss:$8 sps:$4 sm:$0xff]   ;;  %v8487_v22 = vld [vmem:[#allocation6 + $0x1080] ss:$8 sps:$4 sm:$0xff]  }
 0x254   :  { %5956 = vmatprep.subr.bf16.mxu1 %v8414_v23  ;;  %v5663_v25 = vpop.f32.mrf.mxu1  ;;  %v8489_v23 = vld [vmem:[#allocation6 + $0x1084] ss:$8 sps:$4 sm:$0xff]   ;;  %v9274_v17 = vrot.slane %v284_v20, %v9124_v48  ;;  %v8539_v20 = vld [vmem:[#allocation6 + $0x1300] ss:$8 sps:$4 sm:$0xff]  }
 0x255   :  { %5916 = vmatpush1.bf16.msra.mxu0 %v8409_v40  ;;  %v8484_v40 = vld [vmem:[#allocation6 + $0x1190] ss:$8 sps:$4 sm:$0xff]   ;;  %v8490_v25 = vld [vmem:[#allocation6 + $0x1180] ss:$8 sps:$4 sm:$0xff]  }
 0x256   :  { %5917 = vmatprep.subr.bf16.mxu0 %v8417_v18  ;;  %v8492_v18 = vld [vmem:[#allocation6 + $0x1184] ss:$8 sps:$4 sm:$0xff]  }
 0x257   :  { %5957 = vmatpush1.bf16.msra.mxu1 %v8412_v24  ;;  %v299_v24 = vcombine.high %v9271_v13, %v9271_v13 }
 0x258   :  { %5958 = vmatprep.subr.bf16.mxu1 %v8420_v14  ;;  %v8495_v14 = vld [vmem:[#allocation6 + $0x1274] ss:$8 sps:$4 sm:$0xff]  }
 0x259   :  { %5918 = vmatpush1.bf16.msra.mxu0 %v8415_v26  ;;  %v300_v26 = vcombine.high %v9274_v17, %v9274_v17 }
 0x25a   :  { %5919 = vmatprep.subr.bf16.mxu0 %v8423_v16  ;;  %v425_v16 = vpack.c.bf16 %v9251_v50, %v9251_v50  ;;  %v8500_v50 = vld [vmem:[#allocation6 + $0x1260] ss:$8 sps:$4 sm:$0xff]  }
 0x25b   :  { %5959 = vmatpush1.bf16.msra.mxu1 %v8418_v27  ;;  %v8499_v27 = vld [vmem:[#allocation6 + $0x1374] ss:$8 sps:$4 sm:$0xff]  }
 0x25c   :  { %5960 = vmatprep.subr.bf16.mxu1 %v8426_v28  ;;  %v8493_v28 = vld [vmem:[#allocation6 + $0x1270] ss:$8 sps:$4 sm:$0xff]  }
 0x25d   :  { %5920 = vmatpush1.bf16.msra.mxu0 %v8421_v29  ;;  %v430_v29 = vpack.c.bf16 %v299_v24, %v299_v24  ;;  %v8556_v24 = vld [vmem:[#allocation6 + $0x12d4] ss:$8 sps:$4 sm:$0xff]  }
 0x25e   :  { %5921 = vmatprep.subr.bf16.mxu0 %v8429_v30  ;;  %v427_v30 = vpack.c.bf16 %v9254_v55, %v9254_v55 }
 0x25f   :  { %5961 = vmatpush1.bf16.msra.mxu1 %v8424_v31  ;;  %v8502_v31 = vld [vmem:[#allocation6 + $0x1264] ss:$8 sps:$4 sm:$0xff]  }
 0x260   :  { %5962 = vmatprep.subr.bf16.mxu1 %v8432_v32  ;;  %v8497_v32 = vld [vmem:[#allocation6 + $0x1370] ss:$8 sps:$4 sm:$0xff]  }
 0x261   :  { %5922 = vmatpush1.bf16.msra.mxu0 %v8427_v33  ;;  %v432_v33 = vpack.c.bf16 %v300_v26, %v300_v26  ;;  %v8554_v26 = vld [vmem:[#allocation6 + $0x12d0] ss:$8 sps:$4 sm:$0xff]  }
 0x262   :  { %5923 = vmatprep.subr.bf16.mxu0 %v8435_v35 }
 0x263   :  { %5963 = vmatpush1.bf16.msra.mxu1 %v8430_v37  ;;  %v8505_v37 = vld [vmem:[#allocation6 + $0x1364] ss:$8 sps:$4 sm:$0xff]  }
 0x264   :  { %5964 = vmatprep.subr.bf16.mxu1 %v8438_v38 }
 0x265   :  { %5924 = vmatpush1.bf16.msra.mxu0 %v8433_v41 }
 0x266   :  { %5925 = vmatprep.subr.bf16.mxu0 %v8441_v42 }
 0x267   :  { %5965 = vmatpush1.bf16.msra.mxu1 %v8436_v44  ;;  %v8508_v44 = vld [vmem:[#allocation6 + $0x1254] ss:$8 sps:$4 sm:$0xff]  }
 0x268   :  { %5966 = vmatprep.subr.bf16.mxu1 %v8444_v54 }
 0x269   :  { %5926 = vmatpush1.bf16.msra.mxu0 %v8439_v45  ;;  %v8503_v45 = vld [vmem:[#allocation6 + $0x1360] ss:$8 sps:$4 sm:$0xff]  }
 0x26a   :  { %5927 = vmatprep.subr.bf16.mxu0 %v8447_v46 }
 0x26b   :  { %5967 = vmatpush1.bf16.msra.mxu1 %v8442_v53 }
 0x26c   :  { %5968 = vmatprep.subr.bf16.mxu1 %v8450_v58  ;;  %v8511_v58 = vld [vmem:[#allocation6 + $0x1354] ss:$8 sps:$4 sm:$0xff]  }
 0x26d   :  { %5928 = vmatpush2.bf16.msra.mxu0 %v8445_v49  ;;  %v8506_v49 = vld [vmem:[#allocation6 + $0x1250] ss:$8 sps:$4 sm:$0xff]  }
 0x26e   :  { %5929 = vmatprep.subr.bf16.mxu0 %v8453_v56 }
 0x26f   :  { %5969 = vmatpush2.bf16.msra.mxu1 %v8448_v52  ;;  %v8514_v52 = vld [vmem:[#allocation6 + $0x1244] ss:$8 sps:$4 sm:$0xff]  }
 0x270   :  { %5970 = vmatprep.subr.bf16.mxu1 %v8456_v57 }
 0x271   :  { %5930 = vmatpush2.bf16.msra.mxu0 %v8451_v59  ;;  %v8509_v59 = vld [vmem:[#allocation6 + $0x1350] ss:$8 sps:$4 sm:$0xff]  }
 0x272   :  { %5931 = vmatprep.subr.bf16.mxu0 %v8459_v60 }
 0x273   :  { %5971 = vmatpush2.bf16.msra.mxu1 %v8454_v39  ;;  %v8512_v39 = vld [vmem:[#allocation6 + $0x1240] ss:$8 sps:$4 sm:$0xff]  }
 0x274   :  { %5972 = vmatprep.subr.bf16.mxu1 %v8462_v51  ;;  %v8520_v51 = vld [vmem:[#allocation6 + $0x1234] ss:$8 sps:$4 sm:$0xff]  }
 0x275   :  { %5932 = vmatpush2.bf16.msra.mxu0 %v8457_v61  ;;  %v8515_v61 = vld [vmem:[#allocation6 + $0x1340] ss:$8 sps:$4 sm:$0xff]  }
 0x276   :  { %5933 = vmatprep.subr.bf16.mxu0 %v8465_v21  ;;  %v8523_v21 = vld [vmem:[#allocation6 + $0x1334] ss:$8 sps:$4 sm:$0xff]  }
 0x277   :  { %5973 = vmatpush2.bf16.msra.mxu1 %v8460_v63  ;;  %v8518_v63 = vld [vmem:[#allocation6 + $0x1230] ss:$8 sps:$4 sm:$0xff]  }
 0x278   :  { %5974 = vmatprep.subr.bf16.mxu1 %v8468_v0  ;;  %v8526_v0 = vld [vmem:[#allocation6 + $0x1224] ss:$8 sps:$4 sm:$0xff]  }
 0x279   :  { %5934 = vmatpush2.bf16.msra.mxu0 %v8463_v1  ;;  %v8521_v1 = vld [vmem:[#allocation6 + $0x1330] ss:$8 sps:$4 sm:$0xff]  }
 0x27a   :  { %5935 = vmatprep.subr.bf16.mxu0 %v8471_v2  ;;  %v8529_v2 = vld [vmem:[#allocation6 + $0x1324] ss:$8 sps:$4 sm:$0xff]  }
 0x27b   :  { %5975 = vmatpush2.bf16.msra.mxu1 %v8466_v3  ;;  %v8524_v3 = vld [vmem:[#allocation6 + $0x1220] ss:$8 sps:$4 sm:$0xff]  }
 0x27c   :  { %5976 = vmatprep.subr.bf16.mxu1 %v8474_v4  ;;  %v8532_v4 = vld [vmem:[#allocation6 + $0x1214] ss:$8 sps:$4 sm:$0xff]  }
 0x27d   :  { %5936 = vmatpush2.bf16.msra.mxu0 %v8469_v5  ;;  %v8527_v5 = vld [vmem:[#allocation6 + $0x1320] ss:$8 sps:$4 sm:$0xff]  }
 0x27e   :  { %5937 = vmatprep.subr.bf16.mxu0 %v8477_v6  ;;  %v8535_v6 = vld [vmem:[#allocation6 + $0x1314] ss:$8 sps:$4 sm:$0xff]  }
 0x27f   :  { %5977 = vmatpush2.bf16.msra.mxu1 %v8472_v7  ;;  %v8530_v7 = vld [vmem:[#allocation6 + $0x1210] ss:$8 sps:$4 sm:$0xff]  }
 0x280   :  { %5978 = vmatprep.subr.bf16.mxu1 %v8480_v8  ;;  %v8538_v8 = vld [vmem:[#allocation6 + $0x1204] ss:$8 sps:$4 sm:$0xff]  }
 0x281   :  { %5938 = vmatpush2.bf16.msra.mxu0 %v8475_v9  ;;  %v8541_v9 = vld [vmem:[#allocation6 + $0x1304] ss:$8 sps:$4 sm:$0xff]  }
 0x282   :  { %5939 = vmatprep.subr.bf16.mxu0 %v8483_v10  ;;  %v8536_v10 = vld [vmem:[#allocation6 + $0x1200] ss:$8 sps:$4 sm:$0xff]  }
 0x283   :  { %5979 = vmatpush2.bf16.msra.mxu1 %v8478_v36  ;;  %v8544_v36 = vld [vmem:[#allocation6 + $0x12f4] ss:$8 sps:$4 sm:$0xff]  }
 0x284   :  { %5980 = vmatprep.subr.bf16.mxu1 %v8486_v11  ;;  %v8547_v11 = vld [vmem:[#allocation6 + $0x13f4] ss:$8 sps:$4 sm:$0xff]  }
 0x285   :  { %5940 = vmatpush2.bf16.msra.mxu0 %v8481_v12  ;;  %v8542_v12 = vld [vmem:[#allocation6 + $0x12f0] ss:$8 sps:$4 sm:$0xff]  }
 0x286   :  { %5941 = vmatprep.subr.bf16.mxu0 %v8489_v23  ;;  %v8550_v23 = vld [vmem:[#allocation6 + $0x12e4] ss:$8 sps:$4 sm:$0xff]  }
 0x287   :  { %5981 = vmatpush2.bf16.msra.mxu1 %v8484_v40  ;;  %v8545_v40 = vld [vmem:[#allocation6 + $0x13f0] ss:$8 sps:$4 sm:$0xff]  }
 0x288   :  { %5982 = vmatprep.subr.bf16.mxu1 %v8492_v18  ;;  %v8553_v18 = vld [vmem:[#allocation6 + $0x13e4] ss:$8 sps:$4 sm:$0xff]  }
 0x289   :  { %5942 = vmatpush2.bf16.msra.mxu0 %v8487_v22  ;;  %v8548_v22 = vld [vmem:[#allocation6 + $0x12e0] ss:$8 sps:$4 sm:$0xff]  }
 0x28a   :  { %5993 = vmatprep.subr.bf16.mxu0 %v8495_v14  ;;  %v8551_v14 = vld [vmem:[#allocation6 + $0x13e0] ss:$8 sps:$4 sm:$0xff]  }
 0x28b   :  { %5983 = vmatpush2.bf16.msra.mxu1 %v8490_v25  ;;  %v8559_v25 = vld [vmem:[#allocation6 + $0x13d4] ss:$8 sps:$4 sm:$0xff]  }
 0x28c   :  { %v5699_v35 = vpop.f32.mrf.mxu0  ;;  %5944 = vmatmul.mubr.bf16.vlgmr.msra.gmra.mxu0 %v425_v16  ;;  %6034 = vmatprep.subr.bf16.mxu1 %v8499_v27  ;;  %v8562_v16 = vld [vmem:[#allocation6 + $0x12c4] ss:$8 sps:$4 sm:$0xff]   ;;  %v8557_v27 = vld [vmem:[#allocation6 + $0x13d0] ss:$8 sps:$4 sm:$0xff]  }
 0x28d   :  { %v5700_v38 = vadd.f32 %v5699_v35, %v9266_v19  ;;  %5994 = vmatpush1.bf16.msra.mxu0 %v8493_v28  ;;  %6025 = vmatprep.mubr.bf16.mxu0 %v430_v29  ;;  %v8565_v28 = vld [vmem:[#allocation6 + $0x13c4] ss:$8 sps:$4 sm:$0xff]   ;;  %v8560_v29 = vld [vmem:[#allocation6 + $0x12c0] ss:$8 sps:$4 sm:$0xff]  }
 0x28e   :  { %v5701_v41 = vpop.f32.mrf.mxu0  ;;  %v5740_v42 = vpop.f32.mrf.mxu1  ;;  %5985 = vmatmul.mubr.bf16.vlgmr.msra.gmra.mxu1 %v427_v30  ;;  %5995 = vmatprep.subr.bf16.mxu0 %v8502_v31  ;;  %v8568_v30 = vld [vmem:[#allocation6 + $0x12b4] ss:$8 sps:$4 sm:$0xff]   ;;  %v8563_v31 = vld [vmem:[#allocation6 + $0x13c0] ss:$8 sps:$4 sm:$0xff]   ;;  %v8574_v35 = vld [vmem:[#allocation6 + $0x12a4] ss:$8 sps:$4 sm:$0xff]  }
 0x28f   :  { %v5702_v55 = vadd.f32 %v5701_v41, %v9268_v47  ;;  %v9286_v54 = vadd.f32 %v5740_v42, %v5700_v38  ;;  %6035 = vmatpush1.bf16.msra.mxu1 %v8497_v32  ;;  %6066 = vmatprep.mubr.bf16.mxu1 %v432_v33  ;;  %v8517_v47 = vld [vmem:[#allocation6 + $0x1344] ss:$8 sps:$4 sm:$0xff]   ;;  %v8571_v32 = vld [vmem:[#allocation6 + $0x13b4] ss:$8 sps:$4 sm:$0xff]   ;;  %v8566_v33 = vld [vmem:[#allocation6 + $0x12b0] ss:$8 sps:$4 sm:$0xff]  }
 0x290   :  { %v5703_v46 = vpop.f32.mrf.mxu0  ;;  %v5742_v53 = vpop.f32.mrf.mxu1  ;;  %6036 = vmatprep.subr.bf16.mxu1 %v8505_v37  ;;  %v8569_v37 = vld [vmem:[#allocation6 + $0x13b0] ss:$8 sps:$4 sm:$0xff]   ;;  %v8577_v38 = vld [vmem:[#allocation6 + $0x13a4] ss:$8 sps:$4 sm:$0xff]   ;;  %v8572_v41 = vld [vmem:[#allocation6 + $0x12a0] ss:$8 sps:$4 sm:$0xff]  }
 0x291   :  { %v9288_v19 = vadd.f32 %v5742_v53, %v5702_v55  ;;  %5996 = vmatpush1.bf16.msra.mxu0 %v8500_v50  ;;  %v115_v50 = vld [vmem:[#allocation3 + $0x50] sm:$0xff]  ;;  %v8580_v42 = vld [vmem:[#allocation6 + $0x1294] ss:$8 sps:$4 sm:$0xff]  }
 0x292   :  { %v5704_v56 = vpop.f32.mrf.mxu0  ;;  %5997 = vmatprep.subr.bf16.mxu0 %v8508_v44  ;;  %v5744_v57 = vpop.f32.mrf.mxu1  ;;  %v8575_v44 = vld [vmem:[#allocation6 + $0x13a0] ss:$8 sps:$4 sm:$0xff]   ;;  %v301_v55 = vcombine.high %v115_v50, %v115_v50  ;;  %v8578_v46 = vld [vmem:[#allocation6 + $0x1290] ss:$8 sps:$4 sm:$0xff]   ;;  %v9291_v53 = vrot.slane %v115_v50, %v9124_v48 }
 0x293   :  { %6037 = vmatpush1.bf16.msra.mxu1 %v8503_v45  ;;  %v8583_v45 = vld [vmem:[#allocation6 + $0x1394] ss:$8 sps:$4 sm:$0xff]   ;;  %v8584_v57 = vld [vmem:[#allocation6 + $0x1280] ss:$8 sps:$4 sm:$0xff]   ;;  %v8630_v50 = vld [vmem:[#allocation6 + $0x1510] ss:$8 sps:$4 sm:$0xff]  }
 0x294   :  { %6038 = vmatprep.subr.bf16.mxu1 %v8511_v58  ;;  %v5745_v60 = vpop.f32.mrf.mxu1  ;;  %v8586_v58 = vld [vmem:[#allocation6 + $0x1284] ss:$8 sps:$4 sm:$0xff]   ;;  %v9294_v56 = vrot.slane %v301_v55, %v9124_v48  ;;  %v8636_v55 = vld [vmem:[#allocation6 + $0x1500] ss:$8 sps:$4 sm:$0xff]  }
 0x295   :  { %5998 = vmatpush1.bf16.msra.mxu0 %v8506_v49  ;;  %v8581_v49 = vld [vmem:[#allocation6 + $0x1390] ss:$8 sps:$4 sm:$0xff]   ;;  %v8587_v60 = vld [vmem:[#allocation6 + $0x1380] ss:$8 sps:$4 sm:$0xff]  }
 0x296   :  { %5999 = vmatprep.subr.bf16.mxu0 %v8514_v52  ;;  %v8589_v52 = vld [vmem:[#allocation6 + $0x1384] ss:$8 sps:$4 sm:$0xff]  }
 0x297   :  { %6039 = vmatpush1.bf16.msra.mxu1 %v8509_v59  ;;  %v316_v59 = vcombine.high %v9291_v53, %v9291_v53 }
 0x298   :  { %6040 = vmatprep.subr.bf16.mxu1 %v8517_v47  ;;  %v8592_v47 = vld [vmem:[#allocation6 + $0x1474] ss:$8 sps:$4 sm:$0xff]  }
 0x299   :  { %6000 = vmatpush1.bf16.msra.mxu0 %v8512_v39  ;;  %v317_v39 = vcombine.high %v9294_v56, %v9294_v56 }
 0x29a   :  { %6001 = vmatprep.subr.bf16.mxu0 %v8520_v51  ;;  %v429_v51 = vpack.c.bf16 %v9271_v13, %v9271_v13  ;;  %v8597_v13 = vld [vmem:[#allocation6 + $0x1460] ss:$8 sps:$4 sm:$0xff]  }
 0x29b   :  { %6041 = vmatpush1.bf16.msra.mxu1 %v8515_v61  ;;  %v8596_v61 = vld [vmem:[#allocation6 + $0x1574] ss:$8 sps:$4 sm:$0xff]  }
 0x29c   :  { %6042 = vmatprep.subr.bf16.mxu1 %v8523_v21  ;;  %v8590_v21 = vld [vmem:[#allocation6 + $0x1470] ss:$8 sps:$4 sm:$0xff]  }
 0x29d   :  { %6002 = vmatpush1.bf16.msra.mxu0 %v8518_v63  ;;  %v434_v63 = vpack.c.bf16 %v316_v59, %v316_v59  ;;  %v8653_v59 = vld [vmem:[#allocation6 + $0x14d4] ss:$8 sps:$4 sm:$0xff]  }
 0x29e   :  { %6003 = vmatprep.subr.bf16.mxu0 %v8526_v0  ;;  %v431_v0 = vpack.c.bf16 %v9274_v17, %v9274_v17 }
 0x29f   :  { %6043 = vmatpush1.bf16.msra.mxu1 %v8521_v1  ;;  %v8599_v1 = vld [vmem:[#allocation6 + $0x1464] ss:$8 sps:$4 sm:$0xff]  }
 0x2a0   :  { %6044 = vmatprep.subr.bf16.mxu1 %v8529_v2  ;;  %v8594_v2 = vld [vmem:[#allocation6 + $0x1570] ss:$8 sps:$4 sm:$0xff]  }
 0x2a1   :  { %6004 = vmatpush1.bf16.msra.mxu0 %v8524_v3  ;;  %v436_v3 = vpack.c.bf16 %v317_v39, %v317_v39  ;;  %v8651_v39 = vld [vmem:[#allocation6 + $0x14d0] ss:$8 sps:$4 sm:$0xff]  }
 0x2a2   :  { %6005 = vmatprep.subr.bf16.mxu0 %v8532_v4 }
 0x2a3   :  { %6045 = vmatpush1.bf16.msra.mxu1 %v8527_v5  ;;  %v8602_v5 = vld [vmem:[#allocation6 + $0x1564] ss:$8 sps:$4 sm:$0xff]  }
 0x2a4   :  { %6046 = vmatprep.subr.bf16.mxu1 %v8535_v6 }
 0x2a5   :  { %6006 = vmatpush1.bf16.msra.mxu0 %v8530_v7 }
 0x2a6   :  { %6007 = vmatprep.subr.bf16.mxu0 %v8538_v8 }
 0x2a7   :  { %6047 = vmatpush1.bf16.msra.mxu1 %v8533_v15  ;;  %v8605_v15 = vld [vmem:[#allocation6 + $0x1454] ss:$8 sps:$4 sm:$0xff]  }
 0x2a8   :  { %6048 = vmatprep.subr.bf16.mxu1 %v8541_v9 }
 0x2a9   :  { %6008 = vmatpush1.bf16.msra.mxu0 %v8536_v10  ;;  %v8600_v10 = vld [vmem:[#allocation6 + $0x1560] ss:$8 sps:$4 sm:$0xff]  }
 0x2aa   :  { %6009 = vmatprep.subr.bf16.mxu0 %v8544_v36 }
 0x2ab   :  { %6049 = vmatpush1.bf16.msra.mxu1 %v8539_v20 }
 0x2ac   :  { %6050 = vmatprep.subr.bf16.mxu1 %v8547_v11  ;;  %v8608_v11 = vld [vmem:[#allocation6 + $0x1554] ss:$8 sps:$4 sm:$0xff]  }
 0x2ad   :  { %6010 = vmatpush2.bf16.msra.mxu0 %v8542_v12  ;;  %v8603_v12 = vld [vmem:[#allocation6 + $0x1450] ss:$8 sps:$4 sm:$0xff]  }
 0x2ae   :  { %6011 = vmatprep.subr.bf16.mxu0 %v8550_v23 }
 0x2af   :  { %6051 = vmatpush2.bf16.msra.mxu1 %v8545_v40  ;;  %v8611_v40 = vld [vmem:[#allocation6 + $0x1444] ss:$8 sps:$4 sm:$0xff]  }
 0x2b0   :  { %6052 = vmatprep.subr.bf16.mxu1 %v8553_v18 }
 0x2b1   :  { %6012 = vmatpush2.bf16.msra.mxu0 %v8548_v22  ;;  %v8606_v22 = vld [vmem:[#allocation6 + $0x1550] ss:$8 sps:$4 sm:$0xff]  }
 0x2b2   :  { %6013 = vmatprep.subr.bf16.mxu0 %v8556_v24 }
 0x2b3   :  { %6053 = vmatpush2.bf16.msra.mxu1 %v8551_v14  ;;  %v8609_v14 = vld [vmem:[#allocation6 + $0x1440] ss:$8 sps:$4 sm:$0xff]  }
 0x2b4   :  { %6054 = vmatprep.subr.bf16.mxu1 %v8559_v25  ;;  %v8617_v25 = vld [vmem:[#allocation6 + $0x1434] ss:$8 sps:$4 sm:$0xff]  }
 0x2b5   :  { %6014 = vmatpush2.bf16.msra.mxu0 %v8554_v26  ;;  %v8612_v26 = vld [vmem:[#allocation6 + $0x1540] ss:$8 sps:$4 sm:$0xff]  }
 0x2b6   :  { %6015 = vmatprep.subr.bf16.mxu0 %v8562_v16  ;;  %v8620_v16 = vld [vmem:[#allocation6 + $0x1534] ss:$8 sps:$4 sm:$0xff]  }
 0x2b7   :  { %6055 = vmatpush2.bf16.msra.mxu1 %v8557_v27  ;;  %v8615_v27 = vld [vmem:[#allocation6 + $0x1430] ss:$8 sps:$4 sm:$0xff]  }
 0x2b8   :  { %6056 = vmatprep.subr.bf16.mxu1 %v8565_v28  ;;  %v8623_v28 = vld [vmem:[#allocation6 + $0x1424] ss:$8 sps:$4 sm:$0xff]  }
 0x2b9   :  { %6016 = vmatpush2.bf16.msra.mxu0 %v8560_v29  ;;  %v8618_v29 = vld [vmem:[#allocation6 + $0x1530] ss:$8 sps:$4 sm:$0xff]  }
 0x2ba   :  { %6017 = vmatprep.subr.bf16.mxu0 %v8568_v30  ;;  %v8626_v30 = vld [vmem:[#allocation6 + $0x1524] ss:$8 sps:$4 sm:$0xff]  }
 0x2bb   :  { %6057 = vmatpush2.bf16.msra.mxu1 %v8563_v31  ;;  %v8621_v31 = vld [vmem:[#allocation6 + $0x1420] ss:$8 sps:$4 sm:$0xff]  }
 0x2bc   :  { %6058 = vmatprep.subr.bf16.mxu1 %v8571_v32  ;;  %v8629_v32 = vld [vmem:[#allocation6 + $0x1414] ss:$8 sps:$4 sm:$0xff]  }
 0x2bd   :  { %6018 = vmatpush2.bf16.msra.mxu0 %v8566_v33  ;;  %v8624_v33 = vld [vmem:[#allocation6 + $0x1520] ss:$8 sps:$4 sm:$0xff]  }
 0x2be   :  { %6019 = vmatprep.subr.bf16.mxu0 %v8574_v35  ;;  %v8632_v35 = vld [vmem:[#allocation6 + $0x1514] ss:$8 sps:$4 sm:$0xff]  }
 0x2bf   :  { %6059 = vmatpush2.bf16.msra.mxu1 %v8569_v37  ;;  %v8627_v37 = vld [vmem:[#allocation6 + $0x1410] ss:$8 sps:$4 sm:$0xff]  }
 0x2c0   :  { %6060 = vmatprep.subr.bf16.mxu1 %v8577_v38  ;;  %v8635_v38 = vld [vmem:[#allocation6 + $0x1404] ss:$8 sps:$4 sm:$0xff]  }
 0x2c1   :  { %6020 = vmatpush2.bf16.msra.mxu0 %v8572_v41  ;;  %v8638_v41 = vld [vmem:[#allocation6 + $0x1504] ss:$8 sps:$4 sm:$0xff]  }
 0x2c2   :  { %6021 = vmatprep.subr.bf16.mxu0 %v8580_v42  ;;  %v8633_v42 = vld [vmem:[#allocation6 + $0x1400] ss:$8 sps:$4 sm:$0xff]  }
 0x2c3   :  { %6061 = vmatpush2.bf16.msra.mxu1 %v8575_v44  ;;  %v8641_v44 = vld [vmem:[#allocation6 + $0x14f4] ss:$8 sps:$4 sm:$0xff]  }
 0x2c4   :  { %6062 = vmatprep.subr.bf16.mxu1 %v8583_v45  ;;  %v8644_v45 = vld [vmem:[#allocation6 + $0x15f4] ss:$8 sps:$4 sm:$0xff]  }
 0x2c5   :  { %6022 = vmatpush2.bf16.msra.mxu0 %v8578_v46  ;;  %v8639_v46 = vld [vmem:[#allocation6 + $0x14f0] ss:$8 sps:$4 sm:$0xff]  }
 0x2c6   :  { %6023 = vmatprep.subr.bf16.mxu0 %v8586_v58  ;;  %v8647_v58 = vld [vmem:[#allocation6 + $0x14e4] ss:$8 sps:$4 sm:$0xff]  }
 0x2c7   :  { %6063 = vmatpush2.bf16.msra.mxu1 %v8581_v49  ;;  %v8642_v49 = vld [vmem:[#allocation6 + $0x15f0] ss:$8 sps:$4 sm:$0xff]  }
 0x2c8   :  { %6064 = vmatprep.subr.bf16.mxu1 %v8589_v52  ;;  %v8650_v52 = vld [vmem:[#allocation6 + $0x15e4] ss:$8 sps:$4 sm:$0xff]  }
 0x2c9   :  { %6024 = vmatpush2.bf16.msra.mxu0 %v8584_v57  ;;  %v8645_v57 = vld [vmem:[#allocation6 + $0x14e0] ss:$8 sps:$4 sm:$0xff]  }
 0x2ca   :  { %6075 = vmatprep.subr.bf16.mxu0 %v8592_v47  ;;  %v8648_v47 = vld [vmem:[#allocation6 + $0x15e0] ss:$8 sps:$4 sm:$0xff]  }
 0x2cb   :  { %6065 = vmatpush2.bf16.msra.mxu1 %v8587_v60  ;;  %v8656_v60 = vld [vmem:[#allocation6 + $0x15d4] ss:$8 sps:$4 sm:$0xff]  }
 0x2cc   :  { %v5781_v4 = vpop.f32.mrf.mxu0  ;;  %6026 = vmatmul.mubr.bf16.vlgmr.msra.gmra.mxu0 %v429_v51  ;;  %6116 = vmatprep.subr.bf16.mxu1 %v8596_v61  ;;  %v8659_v51 = vld [vmem:[#allocation6 + $0x14c4] ss:$8 sps:$4 sm:$0xff]   ;;  %v8654_v61 = vld [vmem:[#allocation6 + $0x15d0] ss:$8 sps:$4 sm:$0xff]  }
 0x2cd   :  { %v5782_v6 = vadd.f32 %v5781_v4, %v9286_v54  ;;  %6076 = vmatpush1.bf16.msra.mxu0 %v8590_v21  ;;  %6107 = vmatprep.mubr.bf16.mxu0 %v434_v63  ;;  %v8662_v21 = vld [vmem:[#allocation6 + $0x15c4] ss:$8 sps:$4 sm:$0xff]   ;;  %v8657_v63 = vld [vmem:[#allocation6 + $0x14c0] ss:$8 sps:$4 sm:$0xff]  }
 0x2ce   :  { %v5783_v7 = vpop.f32.mrf.mxu0  ;;  %v5822_v8 = vpop.f32.mrf.mxu1  ;;  %6067 = vmatmul.mubr.bf16.vlgmr.msra.gmra.mxu1 %v431_v0  ;;  %6077 = vmatprep.subr.bf16.mxu0 %v8599_v1  ;;  %v8665_v0 = vld [vmem:[#allocation6 + $0x14b4] ss:$8 sps:$4 sm:$0xff]   ;;  %v8660_v1 = vld [vmem:[#allocation6 + $0x15c0] ss:$8 sps:$4 sm:$0xff]   ;;  %v8671_v4 = vld [vmem:[#allocation6 + $0x14a4] ss:$8 sps:$4 sm:$0xff]  }
 0x2cf   :  { %v5784_v17 = vadd.f32 %v5783_v7, %v9288_v19  ;;  %v9306_v9 = vadd.f32 %v5822_v8, %v5782_v6  ;;  %6117 = vmatpush1.bf16.msra.mxu1 %v8594_v2  ;;  %6148 = vmatprep.mubr.bf16.mxu1 %v436_v3  ;;  %v8614_v19 = vld [vmem:[#allocation6 + $0x1544] ss:$8 sps:$4 sm:$0xff]   ;;  %v8668_v2 = vld [vmem:[#allocation6 + $0x15b4] ss:$8 sps:$4 sm:$0xff]   ;;  %v8663_v3 = vld [vmem:[#allocation6 + $0x14b0] ss:$8 sps:$4 sm:$0xff]  }
 0x2d0   :  { %v5785_v36 = vpop.f32.mrf.mxu0  ;;  %v5824_v20 = vpop.f32.mrf.mxu1  ;;  %6118 = vmatprep.subr.bf16.mxu1 %v8602_v5  ;;  %v8666_v5 = vld [vmem:[#allocation6 + $0x15b0] ss:$8 sps:$4 sm:$0xff]   ;;  %v8674_v6 = vld [vmem:[#allocation6 + $0x15a4] ss:$8 sps:$4 sm:$0xff]   ;;  %v8669_v7 = vld [vmem:[#allocation6 + $0x14a0] ss:$8 sps:$4 sm:$0xff]  }
 0x2d1   :  { %v9308_v54 = vadd.f32 %v5824_v20, %v5784_v17  ;;  %6078 = vmatpush1.bf16.msra.mxu0 %v8597_v13  ;;  %v116_v13 = vld [vmem:[#allocation3 + $0x58] sm:$0xff] }
 0x2d2   :  { %v5786_v23 = vpop.f32.mrf.mxu0  ;;  %6079 = vmatprep.subr.bf16.mxu0 %v8605_v15  ;;  %v5826_v18 = vpop.f32.mrf.mxu1  ;;  %v8677_v8 = vld [vmem:[#allocation6 + $0x1494] ss:$8 sps:$4 sm:$0xff]   ;;  %v8672_v15 = vld [vmem:[#allocation6 + $0x15a0] ss:$8 sps:$4 sm:$0xff]   ;;  %v318_v17 = vcombine.high %v116_v13, %v116_v13  ;;  %v8675_v36 = vld [vmem:[#allocation6 + $0x1490] ss:$8 sps:$4 sm:$0xff]   ;;  %v9311_v20 = vrot.slane %v116_v13, %v9124_v48 }
 0x2d3   :  { %6119 = vmatpush1.bf16.msra.mxu1 %v8600_v10  ;;  %v8680_v10 = vld [vmem:[#allocation6 + $0x1594] ss:$8 sps:$4 sm:$0xff]   ;;  %v8681_v18 = vld [vmem:[#allocation6 + $0x1480] ss:$8 sps:$4 sm:$0xff]   ;;  %v8735_v13 = vld [vmem:[#allocation6 + $0x1704] ss:$8 sps:$4 sm:$0xff]  }
 0x2d4   :  { %6120 = vmatprep.subr.bf16.mxu1 %v8608_v11  ;;  %v5827_v24 = vpop.f32.mrf.mxu1  ;;  %v8683_v11 = vld [vmem:[#allocation6 + $0x1484] ss:$8 sps:$4 sm:$0xff]   ;;  %v9314_v23 = vrot.slane %v318_v17, %v9124_v48  ;;  %v8693_v48 = vld [vmem:[#allocation6 + $0x1774] ss:$8 sps:$4 sm:$0xff]  }
 0x2d5   :  { %6080 = vmatpush1.bf16.msra.mxu0 %v8603_v12  ;;  %v8678_v12 = vld [vmem:[#allocation6 + $0x1590] ss:$8 sps:$4 sm:$0xff]   ;;  %v8684_v24 = vld [vmem:[#allocation6 + $0x1580] ss:$8 sps:$4 sm:$0xff]   ;;  %v8741_v17 = vld [vmem:[#allocation6 + $0x17f4] ss:$8 sps:$4 sm:$0xff]  }
 0x2d6   :  { %6081 = vmatprep.subr.bf16.mxu0 %v8611_v40  ;;  %v8686_v40 = vld [vmem:[#allocation6 + $0x1584] ss:$8 sps:$4 sm:$0xff]  }
 0x2d7   :  { %6121 = vmatpush1.bf16.msra.mxu1 %v8606_v22  ;;  %v333_v22 = vcombine.high %v9311_v20, %v9311_v20 }
 0x2d8   :  { %6122 = vmatprep.subr.bf16.mxu1 %v8614_v19  ;;  %v8689_v19 = vld [vmem:[#allocation6 + $0x1674] ss:$8 sps:$4 sm:$0xff]  }
 0x2d9   :  { %6082 = vmatpush1.bf16.msra.mxu0 %v8609_v14  ;;  %v334_v14 = vcombine.high %v9314_v23, %v9314_v23 }
 0x2da   :  { %6083 = vmatprep.subr.bf16.mxu0 %v8617_v25  ;;  %v433_v25 = vpack.c.bf16 %v9291_v53, %v9291_v53  ;;  %v8694_v53 = vld [vmem:[#allocation6 + $0x1660] ss:$8 sps:$4 sm:$0xff]  }
 0x2db   :  { %6123 = vmatpush1.bf16.msra.mxu1 %v8612_v26  ;;  %v8687_v26 = vld [vmem:[#allocation6 + $0x1670] ss:$8 sps:$4 sm:$0xff]  }
 0x2dc   :  { %6124 = vmatprep.subr.bf16.mxu1 %v8620_v16  ;;  %v438_v16 = vpack.c.bf16 %v333_v22, %v333_v22  ;;  %v8745_v22 = vld [vmem:[#allocation6 + $0x17e0] ss:$8 sps:$4 sm:$0xff]  }
 0x2dd   :  { %6084 = vmatpush1.bf16.msra.mxu0 %v8615_v27  ;;  %v435_v27 = vpack.c.bf16 %v9294_v56, %v9294_v56 }
 0x2de   :  { %6085 = vmatprep.subr.bf16.mxu0 %v8623_v28  ;;  %v8696_v28 = vld [vmem:[#allocation6 + $0x1664] ss:$8 sps:$4 sm:$0xff]  }
 0x2df   :  { %6125 = vmatpush1.bf16.msra.mxu1 %v8618_v29  ;;  %v8691_v29 = vld [vmem:[#allocation6 + $0x1770] ss:$8 sps:$4 sm:$0xff]  }
 0x2e0   :  { %6126 = vmatprep.subr.bf16.mxu1 %v8626_v30  ;;  %v440_v30 = vpack.c.bf16 %v334_v14, %v334_v14  ;;  %v8756_v14 = vld [vmem:[#allocation6 + $0x16c4] ss:$8 sps:$4 sm:$0xff]  }
 0x2e1   :  { %6086 = vmatpush1.bf16.msra.mxu0 %v8621_v31 }
 0x2e2   :  { %6087 = vmatprep.subr.bf16.mxu0 %v8629_v32  ;;  %v8699_v32 = vld [vmem:[#allocation6 + $0x1764] ss:$8 sps:$4 sm:$0xff]  }
 0x2e3   :  { %6127 = vmatpush1.bf16.msra.mxu1 %v8624_v33 }
 0x2e4   :  { %6128 = vmatprep.subr.bf16.mxu1 %v8632_v35 }
 0x2e5   :  { %6088 = vmatpush1.bf16.msra.mxu0 %v8627_v37 }
 0x2e6   :  { %6089 = vmatprep.subr.bf16.mxu0 %v8635_v38  ;;  %v8702_v38 = vld [vmem:[#allocation6 + $0x1654] ss:$8 sps:$4 sm:$0xff]  }
 0x2e7   :  { %6129 = vmatpush1.bf16.msra.mxu1 %v8630_v50 }
 0x2e8   :  { %6130 = vmatprep.subr.bf16.mxu1 %v8638_v41  ;;  %v8697_v41 = vld [vmem:[#allocation6 + $0x1760] ss:$8 sps:$4 sm:$0xff]  }
 0x2e9   :  { %6090 = vmatpush1.bf16.msra.mxu0 %v8633_v42 }
 0x2ea   :  { %6091 = vmatprep.subr.bf16.mxu0 %v8641_v44 }
 0x2eb   :  { %6131 = vmatpush1.bf16.msra.mxu1 %v8636_v55  ;;  %v8705_v55 = vld [vmem:[#allocation6 + $0x1754] ss:$8 sps:$4 sm:$0xff]  }
 0x2ec   :  { %6132 = vmatprep.subr.bf16.mxu1 %v8644_v45  ;;  %v8700_v45 = vld [vmem:[#allocation6 + $0x1650] ss:$8 sps:$4 sm:$0xff]  }
 0x2ed   :  { %6092 = vmatpush2.bf16.msra.mxu0 %v8639_v46 }
 0x2ee   :  { %6093 = vmatprep.subr.bf16.mxu0 %v8647_v58  ;;  %v8708_v58 = vld [vmem:[#allocation6 + $0x1644] ss:$8 sps:$4 sm:$0xff]  }
 0x2ef   :  { %6133 = vmatpush2.bf16.msra.mxu1 %v8642_v49 }
 0x2f0   :  { %6134 = vmatprep.subr.bf16.mxu1 %v8650_v52  ;;  %v8703_v52 = vld [vmem:[#allocation6 + $0x1750] ss:$8 sps:$4 sm:$0xff]  }
 0x2f1   :  { %6094 = vmatpush2.bf16.msra.mxu0 %v8645_v57 }
 0x2f2   :  { %6095 = vmatprep.subr.bf16.mxu0 %v8653_v59  ;;  %v8706_v59 = vld [vmem:[#allocation6 + $0x1640] ss:$8 sps:$4 sm:$0xff]  }
 0x2f3   :  { %6135 = vmatpush2.bf16.msra.mxu1 %v8648_v47  ;;  %v8714_v47 = vld [vmem:[#allocation6 + $0x1634] ss:$8 sps:$4 sm:$0xff]  }
 0x2f4   :  { %6136 = vmatprep.subr.bf16.mxu1 %v8656_v60  ;;  %v8709_v60 = vld [vmem:[#allocation6 + $0x1740] ss:$8 sps:$4 sm:$0xff]  }
 0x2f5   :  { %6096 = vmatpush2.bf16.msra.mxu0 %v8651_v39  ;;  %v8717_v39 = vld [vmem:[#allocation6 + $0x1734] ss:$8 sps:$4 sm:$0xff]  }
 0x2f6   :  { %6097 = vmatprep.subr.bf16.mxu0 %v8659_v51  ;;  %v8712_v51 = vld [vmem:[#allocation6 + $0x1630] ss:$8 sps:$4 sm:$0xff]  }
 0x2f7   :  { %6137 = vmatpush2.bf16.msra.mxu1 %v8654_v61  ;;  %v8720_v61 = vld [vmem:[#allocation6 + $0x1624] ss:$8 sps:$4 sm:$0xff]  }
 0x2f8   :  { %6138 = vmatprep.subr.bf16.mxu1 %v8662_v21  ;;  %v8715_v21 = vld [vmem:[#allocation6 + $0x1730] ss:$8 sps:$4 sm:$0xff]  }
 0x2f9   :  { %6098 = vmatpush2.bf16.msra.mxu0 %v8657_v63  ;;  %v8723_v63 = vld [vmem:[#allocation6 + $0x1724] ss:$8 sps:$4 sm:$0xff]  }
 0x2fa   :  { %6099 = vmatprep.subr.bf16.mxu0 %v8665_v0  ;;  %v8718_v0 = vld [vmem:[#allocation6 + $0x1620] ss:$8 sps:$4 sm:$0xff]  }
 0x2fb   :  { %6139 = vmatpush2.bf16.msra.mxu1 %v8660_v1  ;;  %v8726_v1 = vld [vmem:[#allocation6 + $0x1614] ss:$8 sps:$4 sm:$0xff]  }
 0x2fc   :  { %6140 = vmatprep.subr.bf16.mxu1 %v8668_v2  ;;  %v8721_v2 = vld [vmem:[#allocation6 + $0x1720] ss:$8 sps:$4 sm:$0xff]  }
 0x2fd   :  { %6100 = vmatpush2.bf16.msra.mxu0 %v8663_v3  ;;  %v8729_v3 = vld [vmem:[#allocation6 + $0x1714] ss:$8 sps:$4 sm:$0xff]  }
 0x2fe   :  { %6101 = vmatprep.subr.bf16.mxu0 %v8671_v4  ;;  %v8724_v4 = vld [vmem:[#allocation6 + $0x1610] ss:$8 sps:$4 sm:$0xff]  }
 0x2ff   :  { %6141 = vmatpush2.bf16.msra.mxu1 %v8666_v5  ;;  %v8732_v5 = vld [vmem:[#allocation6 + $0x1604] ss:$8 sps:$4 sm:$0xff]  }
 0x300   :  { %6142 = vmatprep.subr.bf16.mxu1 %v8674_v6  ;;  %v8727_v6 = vld [vmem:[#allocation6 + $0x1710] ss:$8 sps:$4 sm:$0xff]  }
 0x301   :  { %6102 = vmatpush2.bf16.msra.mxu0 %v8669_v7  ;;  %v8730_v7 = vld [vmem:[#allocation6 + $0x1600] ss:$8 sps:$4 sm:$0xff]  }
 0x302   :  { %6103 = vmatprep.subr.bf16.mxu0 %v8677_v8  ;;  %v8738_v8 = vld [vmem:[#allocation6 + $0x16f4] ss:$8 sps:$4 sm:$0xff]  }
 0x303   :  { %6143 = vmatpush2.bf16.msra.mxu1 %v8672_v15  ;;  %v8733_v15 = vld [vmem:[#allocation6 + $0x1700] ss:$8 sps:$4 sm:$0xff]  }
 0x304   :  { %6144 = vmatprep.subr.bf16.mxu1 %v8680_v10  ;;  %v8736_v10 = vld [vmem:[#allocation6 + $0x16f0] ss:$8 sps:$4 sm:$0xff]  }
 0x305   :  { %6104 = vmatpush2.bf16.msra.mxu0 %v8675_v36  ;;  %v8744_v36 = vld [vmem:[#allocation6 + $0x16e4] ss:$8 sps:$4 sm:$0xff]  }
 0x306   :  { %6105 = vmatprep.subr.bf16.mxu0 %v8683_v11  ;;  %v8739_v11 = vld [vmem:[#allocation6 + $0x17f0] ss:$8 sps:$4 sm:$0xff]  }
 0x307   :  { %6145 = vmatpush2.bf16.msra.mxu1 %v8678_v12  ;;  %v8747_v12 = vld [vmem:[#allocation6 + $0x17e4] ss:$8 sps:$4 sm:$0xff]  }
 0x308   :  { %6146 = vmatprep.subr.bf16.mxu1 %v8686_v40  ;;  %v8742_v40 = vld [vmem:[#allocation6 + $0x16e0] ss:$8 sps:$4 sm:$0xff]  }
 0x309   :  { %6106 = vmatpush2.bf16.msra.mxu0 %v8681_v18  ;;  %v8750_v18 = vld [vmem:[#allocation6 + $0x16d4] ss:$8 sps:$4 sm:$0xff]  }
 0x30a   :  { %6157 = vmatprep.subr.bf16.mxu0 %v8689_v19  ;;  %v8753_v19 = vld [vmem:[#allocation6 + $0x17d4] ss:$8 sps:$4 sm:$0xff]  }
 0x30b   :  { %6147 = vmatpush2.bf16.msra.mxu1 %v8684_v24  ;;  %v8748_v24 = vld [vmem:[#allocation6 + $0x16d0] ss:$8 sps:$4 sm:$0xff]  }
 0x30c   :  { %v5863_v31 = vpop.f32.mrf.mxu0  ;;  %6108 = vmatmul.mubr.bf16.vlgmr.msra.gmra.mxu0 %v433_v25  ;;  %6198 = vmatprep.subr.bf16.mxu1 %v8693_v48  ;;  %v8751_v25 = vld [vmem:[#allocation6 + $0x17d0] ss:$8 sps:$4 sm:$0xff]   ;;  %v8759_v48 = vld [vmem:[#allocation6 + $0x17c4] ss:$8 sps:$4 sm:$0xff]  }
 0x30d   :  { %v5864_v33 = vadd.f32 %v5863_v31, %v9306_v9  ;;  %6158 = vmatpush1.bf16.msra.mxu0 %v8687_v26  ;;  %6189 = vmatprep.mubr.bf16.mxu0 %v438_v16  ;;  %v8754_v26 = vld [vmem:[#allocation6 + $0x16c0] ss:$8 sps:$4 sm:$0xff]   ;;  %v8762_v16 = vld [vmem:[#allocation6 + $0x16b4] ss:$8 sps:$4 sm:$0xff]   ;;  %v8763_v31 = vld [vmem:[#allocation6 + $0x17b0] ss:$8 sps:$4 sm:$0xff]  }
 0x30e   :  { %v5865_v35 = vpop.f32.mrf.mxu0  ;;  %v5904_v37 = vpop.f32.mrf.mxu1  ;;  %6149 = vmatmul.mubr.bf16.vlgmr.msra.gmra.mxu1 %v435_v27  ;;  %6159 = vmatprep.subr.bf16.mxu0 %v8696_v28  ;;  %v8757_v27 = vld [vmem:[#allocation6 + $0x17c0] ss:$8 sps:$4 sm:$0xff]   ;;  %v8765_v28 = vld [vmem:[#allocation6 + $0x17b4] ss:$8 sps:$4 sm:$0xff]  }
 0x30f   :  { %v5866_v56 = vadd.f32 %v5865_v35, %v9308_v54  ;;  %v9326_v50 = vadd.f32 %v5904_v37, %v5864_v33  ;;  %6199 = vmatpush1.bf16.msra.mxu1 %v8691_v29  ;;  %6230 = vmatprep.mubr.bf16.mxu1 %v440_v30  ;;  %v8711_v54 = vld [vmem:[#allocation6 + $0x1744] ss:$8 sps:$4 sm:$0xff]   ;;  %v8760_v29 = vld [vmem:[#allocation6 + $0x16b0] ss:$8 sps:$4 sm:$0xff]   ;;  %v8766_v33 = vld [vmem:[#allocation6 + $0x16a0] ss:$8 sps:$4 sm:$0xff]  }
 0x310   :  { %v5867_v42 = vpop.f32.mrf.mxu0  ;;  %v5906_v44 = vpop.f32.mrf.mxu1  ;;  %6200 = vmatprep.subr.bf16.mxu1 %v8699_v32  ;;  %v8768_v30 = vld [vmem:[#allocation6 + $0x16a4] ss:$8 sps:$4 sm:$0xff]   ;;  %v8769_v35 = vld [vmem:[#allocation6 + $0x17a0] ss:$8 sps:$4 sm:$0xff]   ;;  %v8777_v37 = vld [vmem:[#allocation6 + $0x1794] ss:$8 sps:$4 sm:$0xff]  }
 0x311   :  { %v9328_v9 = vadd.f32 %v5906_v44, %v5866_v56  ;;  %6160 = vmatpush1.bf16.msra.mxu0 %v8694_v53  ;;  %v8771_v32 = vld [vmem:[#allocation6 + $0x17a4] ss:$8 sps:$4 sm:$0xff]   ;;  %v8774_v53 = vld [vmem:[#allocation6 + $0x1694] ss:$8 sps:$4 sm:$0xff]   ;;  %v8775_v42 = vld [vmem:[#allocation6 + $0x1790] ss:$8 sps:$4 sm:$0xff]  }
 0x312   :  { %v5868_v46 = vpop.f32.mrf.mxu0  ;;  %6161 = vmatprep.subr.bf16.mxu0 %v8702_v38  ;;  %v5908_v49 = vpop.f32.mrf.mxu1  ;;  %v8772_v38 = vld [vmem:[#allocation6 + $0x1690] ss:$8 sps:$4 sm:$0xff]   ;;  %v8780_v56 = vld [vmem:[#allocation6 + $0x1684] ss:$8 sps:$4 sm:$0xff]  }
 0x313   :  { %6201 = vmatpush1.bf16.msra.mxu1 %v8697_v41  ;;  %v9330_v41 = vld.sshfl [vmem:[#allocation3 + $0x60] sm:$0x33 pattern:$0x76325410]  ;;  %v8783_v44 = vld [vmem:[#allocation6 + $0x1784] ss:$8 sps:$4 sm:$0xff]   ;;  %v437_v49 = vpack.c.bf16 %v9311_v20, %v9311_v20 }
 0x314   :  { %6202 = vmatprep.subr.bf16.mxu1 %v8705_v55  ;;  %v5909_v57 = vpop.f32.mrf.mxu1  ;;  %v8778_v55 = vld [vmem:[#allocation6 + $0x1680] ss:$8 sps:$4 sm:$0xff]   ;;  %v8786_v46 = vld [vmem:[#allocation6 + $0x1874] ss:$8 sps:$4 sm:$0xff]  }
 0x315   :  { %6162 = vmatpush1.bf16.msra.mxu0 %v8700_v45  ;;  %v342_v45 = vcombine.high %v9330_v41, %v9330_v41  ;;  %v439_v57 = vpack.c.bf16 %v9314_v23, %v9314_v23  ;;  %v8793_v20 = vld [vmem:[#allocation6 + $0x1854] ss:$8 sps:$4 sm:$0xff]  }
 0x316   :  { %6163 = vmatprep.subr.bf16.mxu0 %v8708_v58  ;;  %v8781_v58 = vld [vmem:[#allocation6 + $0x1780] ss:$8 sps:$4 sm:$0xff]  }
 0x317   :  { %6203 = vmatpush1.bf16.msra.mxu1 %v8703_v52  ;;  %v8784_v52 = vld [vmem:[#allocation6 + $0x1870] ss:$8 sps:$4 sm:$0xff]  }
 0x318   :  { %6204 = vmatprep.subr.bf16.mxu1 %v8711_v54  ;;  %v442_v54 = vpack.c.bf16 %v342_v45, %v342_v45 }
 0x319   :  { %6164 = vmatpush1.bf16.msra.mxu0 %v8706_v59  ;;  %v8790_v59 = vld [vmem:[#allocation6 + $0x1864] ss:$8 sps:$4 sm:$0xff]  }
 0x31a   :  { %6165 = vmatprep.subr.bf16.mxu0 %v8714_v47 }
 0x31b   :  { %6205 = vmatpush1.bf16.msra.mxu1 %v8709_v60 }
 0x31c   :  { %6206 = vmatprep.subr.bf16.mxu1 %v8717_v39  ;;  %v8788_v39 = vld [vmem:[#allocation6 + $0x1860] ss:$8 sps:$4 sm:$0xff]  }
 0x31d   :  { %6166 = vmatpush1.bf16.msra.mxu0 %v8712_v51 }
 0x31e   :  { %6167 = vmatprep.subr.bf16.mxu0 %v8720_v61 }
 0x31f   :  { %6207 = vmatpush1.bf16.msra.mxu1 %v8715_v21 }
 0x320   :  { %6208 = vmatprep.subr.bf16.mxu1 %v8723_v63 }
 0x321   :  { %6168 = vmatpush1.bf16.msra.mxu0 %v8718_v0 }
 0x322   :  { %6169 = vmatprep.subr.bf16.mxu0 %v8726_v1 }
 0x323   :  { %6209 = vmatpush1.bf16.msra.mxu1 %v8721_v2  ;;  %v8791_v2 = vld [vmem:[#allocation6 + $0x1850] ss:$8 sps:$4 sm:$0xff]  }
 0x324   :  { %6210 = vmatprep.subr.bf16.mxu1 %v8729_v3 }
 0x325   :  { %6170 = vmatpush1.bf16.msra.mxu0 %v8724_v4 }
 0x326   :  { %6171 = vmatprep.subr.bf16.mxu0 %v8732_v5 }
 0x327   :  { %6211 = vmatpush1.bf16.msra.mxu1 %v8727_v6  ;;  %v8794_v6 = vld [vmem:[#allocation6 + $0x1840] ss:$8 sps:$4 sm:$0xff]  }
 0x328   :  { %6212 = vmatprep.subr.bf16.mxu1 %v8735_v13  ;;  %v8799_v13 = vld [vmem:[#allocation6 + $0x1834] ss:$8 sps:$4 sm:$0xff]  }
 0x329   :  { %6172 = vmatpush1.bf16.msra.mxu0 %v8730_v7  ;;  %v8797_v7 = vld [vmem:[#allocation6 + $0x1830] ss:$8 sps:$4 sm:$0xff]  }
 0x32a   :  { %6173 = vmatprep.subr.bf16.mxu0 %v8738_v8  ;;  %v8800_v8 = vld [vmem:[#allocation6 + $0x1820] ss:$8 sps:$4 sm:$0xff]  }
 0x32b   :  { %6213 = vmatpush1.bf16.msra.mxu1 %v8733_v15  ;;  %v8805_v15 = vld [vmem:[#allocation6 + $0x1814] ss:$8 sps:$4 sm:$0xff]  }
 0x32c   :  { %6214 = vmatprep.subr.bf16.mxu1 %v8741_v17  ;;  %v8803_v17 = vld [vmem:[#allocation6 + $0x1810] ss:$8 sps:$4 sm:$0xff]  }
 0x32d   :  { %6174 = vmatpush2.bf16.msra.mxu0 %v8736_v10  ;;  %v8808_v10 = vld [vmem:[#allocation6 + $0x1804] ss:$8 sps:$4 sm:$0xff]  }
 0x32e   :  { %6175 = vmatprep.subr.bf16.mxu0 %v8744_v36  ;;  %v8806_v36 = vld [vmem:[#allocation6 + $0x1800] ss:$8 sps:$4 sm:$0xff]  }
 0x32f   :  { %6215 = vmatpush2.bf16.msra.mxu1 %v8739_v11  ;;  %v8811_v11 = vld [vmem:[#allocation6 + $0x18f4] ss:$8 sps:$4 sm:$0xff]  }
 0x330   :  { %6216 = vmatprep.subr.bf16.mxu1 %v8747_v12  ;;  %v8809_v12 = vld [vmem:[#allocation6 + $0x18f0] ss:$8 sps:$4 sm:$0xff]  }
 0x331   :  { %6176 = vmatpush2.bf16.msra.mxu0 %v8742_v40  ;;  %v8814_v40 = vld [vmem:[#allocation6 + $0x18e4] ss:$8 sps:$4 sm:$0xff]  }
 0x332   :  { %6177 = vmatprep.subr.bf16.mxu0 %v8750_v18  ;;  %v8812_v18 = vld [vmem:[#allocation6 + $0x18e0] ss:$8 sps:$4 sm:$0xff]  }
 0x333   :  { %6217 = vmatpush2.bf16.msra.mxu1 %v8745_v22  ;;  %v8817_v22 = vld [vmem:[#allocation6 + $0x18d4] ss:$8 sps:$4 sm:$0xff]  }
 0x334   :  { %6218 = vmatprep.subr.bf16.mxu1 %v8753_v19  ;;  %v8815_v19 = vld [vmem:[#allocation6 + $0x18d0] ss:$8 sps:$4 sm:$0xff]  }
 0x335   :  { %6178 = vmatpush2.bf16.msra.mxu0 %v8748_v24  ;;  %v8820_v24 = vld [vmem:[#allocation6 + $0x18c4] ss:$8 sps:$4 sm:$0xff]  }
 0x336   :  { %6179 = vmatprep.subr.bf16.mxu0 %v8756_v14  ;;  %v8818_v14 = vld [vmem:[#allocation6 + $0x18c0] ss:$8 sps:$4 sm:$0xff]  }
 0x337   :  { %6219 = vmatpush2.bf16.msra.mxu1 %v8751_v25  ;;  %v8823_v25 = vld [vmem:[#allocation6 + $0x18b4] ss:$8 sps:$4 sm:$0xff]  }
 0x338   :  { %6220 = vmatprep.subr.bf16.mxu1 %v8759_v48  ;;  %v8821_v48 = vld [vmem:[#allocation6 + $0x18b0] ss:$8 sps:$4 sm:$0xff]  }
 0x339   :  { %6180 = vmatpush2.bf16.msra.mxu0 %v8754_v26  ;;  %v8826_v26 = vld [vmem:[#allocation6 + $0x18a4] ss:$8 sps:$4 sm:$0xff]  }
 0x33a   :  { %6181 = vmatprep.subr.bf16.mxu0 %v8762_v16  ;;  %v8824_v16 = vld [vmem:[#allocation6 + $0x18a0] ss:$8 sps:$4 sm:$0xff]  }
 0x33b   :  { %6221 = vmatpush2.bf16.msra.mxu1 %v8757_v27  ;;  %v8829_v27 = vld [vmem:[#allocation6 + $0x1894] ss:$8 sps:$4 sm:$0xff]  }
 0x33c   :  { %6222 = vmatprep.subr.bf16.mxu1 %v8765_v28  ;;  %v8827_v28 = vld [vmem:[#allocation6 + $0x1890] ss:$8 sps:$4 sm:$0xff]  }
 0x33d   :  { %6182 = vmatpush2.bf16.msra.mxu0 %v8760_v29  ;;  %v8832_v29 = vld [vmem:[#allocation6 + $0x1884] ss:$8 sps:$4 sm:$0xff]  }
 0x33e   :  { %6183 = vmatprep.subr.bf16.mxu0 %v8768_v30  ;;  %v8830_v30 = vld [vmem:[#allocation6 + $0x1880] ss:$8 sps:$4 sm:$0xff]  }
 0x33f   :  { %6223 = vmatpush2.bf16.msra.mxu1 %v8763_v31  ;;  %v441_v31 = vpack.c.bf16 %v9330_v41, %v9330_v41  ;;  %v8838_v41 = vld [vmem:[#allocation9 + $0x64] ss:$8 sps:$4 sm:$0xff]  }
 0x340   :  { %6224 = vmatprep.subr.bf16.mxu1 %v8771_v32 }
 0x341   :  { %6184 = vmatpush2.bf16.msra.mxu0 %v8766_v33 }
 0x342   :  { %6185 = vmatprep.subr.bf16.mxu0 %v8774_v53 }
 0x343   :  { %6225 = vmatpush2.bf16.msra.mxu1 %v8769_v35 }
 0x344   :  { %6226 = vmatprep.subr.bf16.mxu1 %v8777_v37 }
 0x345   :  { %6186 = vmatpush2.bf16.msra.mxu0 %v8772_v38 }
 0x346   :  { %6187 = vmatprep.subr.bf16.mxu0 %v8780_v56 }
 0x347   :  { %6227 = vmatpush2.bf16.msra.mxu1 %v8775_v42 }
 0x348   :  { %6228 = vmatprep.subr.bf16.mxu1 %v8783_v44 }
 0x349   :  { %6188 = vmatpush2.bf16.msra.mxu0 %v8778_v55 }
 0x34a   :  { %6239 = vmatprep.subr.bf16.mxu0 %v8786_v46  ;;  %v8833_v46 = vld [vmem:[#allocation9 + $0x70] ss:$8 sps:$4 sm:$0xff]  }
 0x34b   :  { %6229 = vmatpush2.bf16.msra.mxu1 %v8781_v58  ;;  %v8835_v58 = vld [vmem:[#allocation9 + $0x74] ss:$8 sps:$4 sm:$0xff]  }
 0x34c   :  { %v5945_v47 = vpop.f32.mrf.mxu0  ;;  %6190 = vmatmul.mubr.bf16.vlgmr.msra.gmra.mxu0 %v437_v49  ;;  %6492 = vmatprep.subr.bf16.mxu1 %v8835_v58 }
 0x34d   :  { %v5946_v60 = vadd.f32 %v5945_v47, %v9326_v50  ;;  %6240 = vmatpush1.bf16.msra.mxu0 %v8784_v52  ;;  %6271 = vmatprep.mubr.bf16.mxu0 %v442_v54  ;;  %v8796_v50 = vld [vmem:[#allocation6 + $0x1844] ss:$8 sps:$4 sm:$0xff]   ;;  %v8841_v54 = vld [vmem:[#allocation9 + $0x54] ss:$8 sps:$4 sm:$0xff]  }
 0x34e   :  { %v5947_v51 = vpop.f32.mrf.mxu0  ;;  %v5986_v61 = vpop.f32.mrf.mxu1  ;;  %6231 = vmatmul.mubr.bf16.vlgmr.msra.gmra.mxu1 %v439_v57  ;;  %6241 = vmatprep.subr.bf16.mxu0 %v8790_v59  ;;  %v8836_v52 = vld [vmem:[#allocation9 + $0x60] ss:$8 sps:$4 sm:$0xff]   ;;  %v8839_v57 = vld [vmem:[#allocation9 + $0x50] ss:$8 sps:$4 sm:$0xff]   ;;  %v8844_v59 = vld [vmem:[#allocation9 + $0x44] ss:$8 sps:$4 sm:$0xff]  }
 0x34f   :  { %v5948_v21 = vadd.f32 %v5947_v51, %v9328_v9  ;;  %v9340_v63 = vadd.f32 %v5986_v61, %v5946_v60  ;;  %v8802_v9 = vld [vmem:[#allocation6 + $0x1824] ss:$8 sps:$4 sm:$0xff]   ;;  %6493 = vmatpush1.bf16.msra.mxu1 %v8833_v46  ;;  %v8847_v60 = vld [vmem:[#allocation9 + $0x34] ss:$8 sps:$4 sm:$0xff]  }
 0x350   :  { %v5949_v0 = vpop.f32.mrf.mxu0  ;;  %v5988_v23 = vpop.f32.mrf.mxu1  ;;  %6494 = vmatprep.subr.bf16.mxu1 %v8838_v41  ;;  %v8842_v47 = vld [vmem:[#allocation9 + $0x40] ss:$8 sps:$4 sm:$0xff]   ;;  %v8850_v51 = vld [vmem:[#allocation9 + $0x24] ss:$8 sps:$4 sm:$0xff]  }
 0x351   :  { %v9342_v1 = vadd.f32 %v5988_v23, %v5948_v21  ;;  %6242 = vmatpush1.bf16.msra.mxu0 %v8788_v39  ;;  %v8845_v39 = vld [vmem:[#allocation9 + $0x30] ss:$8 sps:$4 sm:$0xff]   ;;  %v8848_v61 = vld [vmem:[#allocation9 + $0x20] ss:$8 sps:$4 sm:$0xff]   ;;  %v8859_v23 = vld [vmem:[#allocation9 + $0xf4] ss:$8 sps:$4 sm:$0xff]  }
 0x352   :  { %v5950_v3 = vpop.f32.mrf.mxu0  ;;  %6243 = vmatprep.subr.bf16.mxu0 %v8793_v20  ;;  %v5990_v4 = vpop.f32.mrf.mxu1  ;;  %v8853_v20 = vld [vmem:[#allocation9 + $0x14] ss:$8 sps:$4 sm:$0xff]   ;;  %v8851_v21 = vld [vmem:[#allocation9 + $0x10] ss:$8 sps:$4 sm:$0xff]   ;;  %v8854_v0 = vld [vmem:[#allocation9] ss:$8 sps:$4 sm:$0xff]  }
 0x353   :  { %6495 = vmatpush1.bf16.msra.mxu1 %v8836_v52  ;;  %v8860_v3 = vld [vmem:[#allocation9 + $0xe0] ss:$8 sps:$4 sm:$0xff]   ;;  %v8863_v4 = vld [vmem:[#allocation9 + $0xd0] ss:$8 sps:$4 sm:$0xff]  }
 0x354   :  { %v5991_v5 = vpop.f32.mrf.mxu1  ;;  %6496 = vmatprep.subr.bf16.mxu1 %v8841_v54 }
 0x355   :  { %6244 = vmatpush1.bf16.msra.mxu0 %v8791_v2  ;;  %v8862_v2 = vld [vmem:[#allocation9 + $0xe4] ss:$8 sps:$4 sm:$0xff]  }
 0x356   :  { %6245 = vmatprep.subr.bf16.mxu0 %v8796_v50  ;;  %v8865_v50 = vld [vmem:[#allocation9 + $0xd4] ss:$8 sps:$4 sm:$0xff]   ;;  %v8868_v5 = vld [vmem:[#allocation9 + $0xc4] ss:$8 sps:$4 sm:$0xff]  }
 0x357   :  { %6497 = vmatpush1.bf16.msra.mxu1 %v8839_v57 }
 0x358   :  { %6498 = vmatprep.subr.bf16.mxu1 %v8844_v59 }
 0x359   :  { %6246 = vmatpush1.bf16.msra.mxu0 %v8794_v6  ;;  %v8866_v6 = vld [vmem:[#allocation9 + $0xc0] ss:$8 sps:$4 sm:$0xff]  }
 0x35a   :  { %6247 = vmatprep.subr.bf16.mxu0 %v8799_v13  ;;  %v8871_v13 = vld [vmem:[#allocation9 + $0xb4] ss:$8 sps:$4 sm:$0xff]  }
 0x35b   :  { %6499 = vmatpush1.bf16.msra.mxu1 %v8842_v47 }
 0x35c   :  { %6500 = vmatprep.subr.bf16.mxu1 %v8847_v60 }
 0x35d   :  { %6248 = vmatpush1.bf16.msra.mxu0 %v8797_v7  ;;  %v8869_v7 = vld [vmem:[#allocation9 + $0xb0] ss:$8 sps:$4 sm:$0xff]  }
 0x35e   :  { %6249 = vmatprep.subr.bf16.mxu0 %v8802_v9  ;;  %v8874_v9 = vld [vmem:[#allocation9 + $0xa4] ss:$8 sps:$4 sm:$0xff]  }
 0x35f   :  { %6501 = vmatpush1.bf16.msra.mxu1 %v8845_v39 }
 0x360   :  { %6502 = vmatprep.subr.bf16.mxu1 %v8850_v51 }
 0x361   :  { %6250 = vmatpush1.bf16.msra.mxu0 %v8800_v8  ;;  %v8872_v8 = vld [vmem:[#allocation9 + $0xa0] ss:$8 sps:$4 sm:$0xff]  }
 0x362   :  { %6251 = vmatprep.subr.bf16.mxu0 %v8805_v15 }
 0x363   :  { %6503 = vmatpush1.bf16.msra.mxu1 %v8848_v61 }
 0x364   :  { %6504 = vmatprep.subr.bf16.mxu1 %v8853_v20 }
 0x365   :  { %6252 = vmatpush1.bf16.msra.mxu0 %v8803_v17 }
 0x366   :  { %6253 = vmatprep.subr.bf16.mxu0 %v8808_v10  ;;  %v8877_v10 = vld [vmem:[#allocation9 + $0x94] ss:$8 sps:$4 sm:$0xff]  }
 0x367   :  { %6505 = vmatpush1.bf16.msra.mxu1 %v8851_v21 }
 0x369   :  { %6254 = vmatpush1.bf16.msra.mxu0 %v8806_v36 }
 0x36a   :  { %6255 = vmatprep.subr.bf16.mxu0 %v8811_v11 }
 0x36d   :  { %6256 = vmatpush2.bf16.msra.mxu0 %v8809_v12  ;;  %v8875_v12 = vld [vmem:[#allocation9 + $0x90] ss:$8 sps:$4 sm:$0xff]  }
 0x36e   :  { %6257 = vmatprep.subr.bf16.mxu0 %v8814_v40 }
 0x371   :  { %6258 = vmatpush2.bf16.msra.mxu0 %v8812_v18 }
 0x372   :  { %6259 = vmatprep.subr.bf16.mxu0 %v8817_v22 }
 0x375   :  { %6260 = vmatpush2.bf16.msra.mxu0 %v8815_v19 }
 0x376   :  { %6261 = vmatprep.subr.bf16.mxu0 %v8820_v24 }
 0x379   :  { %6262 = vmatpush2.bf16.msra.mxu0 %v8818_v14  ;;  %v8880_v14 = vld [vmem:[#allocation9 + $0x84] ss:$8 sps:$4 sm:$0xff]  }
 0x37a   :  { %6263 = vmatprep.subr.bf16.mxu0 %v8823_v25 }
 0x37d   :  { %6264 = vmatpush2.bf16.msra.mxu0 %v8821_v48 }
 0x37e   :  { %6265 = vmatprep.subr.bf16.mxu0 %v8826_v26  ;;  %v8878_v26 = vld [vmem:[#allocation9 + $0x80] ss:$8 sps:$4 sm:$0xff]  }
 0x381   :  { %6266 = vmatpush2.bf16.msra.mxu0 %v8824_v16 }
 0x382   :  { %6267 = vmatprep.subr.bf16.mxu0 %v8829_v27  ;;  %v8881_v27 = vld [vmem:[#allocation12 + $0x78] sm:$0xff]  }
 0x385   :  { %6268 = vmatpush2.bf16.msra.mxu0 %v8827_v28  ;;  %v8882_v28 = vld [vmem:[#allocation12 + $0x38] sm:$0xff]  }
 0x386   :  { %6269 = vmatprep.subr.bf16.mxu0 %v8832_v29  ;;  %v8883_v29 = vld [vmem:[#allocation12 + $0x70] sm:$0xff]  }
 0x389   :  { %6270 = vmatpush2.bf16.msra.mxu0 %v8830_v30  ;;  %v8884_v30 = vld [vmem:[#allocation12 + $0x30] sm:$0xff]  }
 0x38a   :  { %7587 = vmatprep.subr.bf16.mxu0 %v8881_v27 }
 0x38c   :  { %v6027_v32 = vpop.f32.mrf.mxu0  ;;  %6272 = vmatmul.mubr.bf16.vlgmr.msra.gmra.mxu0 %v441_v31  ;;  %v8885_v31 = vld [vmem:[#allocation12 + $0x68] sm:$0xff]  }
 0x38d   :  { %v6028_v33 = vadd.f32 %v6027_v32, %v9340_v63  ;;  %v8856_v63 = vld [vmem:[#allocation9 + $0x4] ss:$8 sps:$4 sm:$0xff]   ;;  %7588 = vmatpush3.bf16.msra.mxu0 %v8882_v28 }
 0x38e   :  { %v6029_v53 = vpop.f32.mrf.mxu0  ;;  %v6068_v35 = vpop.f32.mrf.mxu1  ;;  %6506 = vmatprep.subr.bf16.mxu1 %v8856_v63  ;;  %7589 = vmatprep.subr.bf16.mxu0 %v8883_v29  ;;  %v8886_v32 = vld [vmem:[#allocation12 + $0x28] sm:$0xff]  }
 0x38f   :  { %v6030_v37 = vadd.f32 %v6029_v53, %v9342_v1  ;;  %v9348_v38 = vadd.f32 %v6068_v35, %v6028_v33  ;;  %6507 = vmatpush1.bf16.msra.mxu1 %v8854_v0  ;;  %v8857_v1 = vld [vmem:[#allocation9 + $0xf0] ss:$8 sps:$4 sm:$0xff]   ;;  %v8887_v33 = vld [vmem:[#allocation12 + $0x60] sm:$0xff]  }
 0x390   :  { %v6031_v56 = vpop.f32.mrf.mxu0  ;;  %v6070_v42 = vpop.f32.mrf.mxu1  ;;  %6508 = vmatprep.subr.bf16.mxu1 %v8859_v23  ;;  %v8888_v53 = vld [vmem:[#allocation12 + $0x20] sm:$0xff]   ;;  %v8889_v35 = vld [vmem:[#allocation12 + $0x58] sm:$0xff]  }
 0x391   :  { %v9350_v44 = vadd.f32 %v6070_v42, %v6030_v37  ;;  %7590 = vmatpush3.bf16.msra.mxu0 %v8884_v30  ;;  %v8890_v37 = vld [vmem:[#allocation12 + $0x18] sm:$0xff]  }
 0x392   :  { %v6032_v55 = vpop.f32.mrf.mxu0  ;;  %v6072_v45 = vpop.f32.mrf.mxu1  ;;  %7591 = vmatprep.subr.bf16.mxu0 %v8885_v31 }
 0x393   :  { %6509 = vmatpush2.bf16.msra.mxu1 %v8857_v1 }
 0x394   :  { %v6073_v49 = vpop.f32.mrf.mxu1  ;;  %6510 = vmatprep.subr.bf16.mxu1 %v8862_v2  ;;  %v8892_v2 = vld [vmem:[#allocation12 + $0x10] sm:$0xff]  }
 0x395   :  { %7592 = vmatpush3.bf16.msra.mxu0 %v8886_v32 }
 0x396   :  { %7593 = vmatprep.subr.bf16.mxu0 %v8887_v33 }
 0x397   :  { %6511 = vmatpush2.bf16.msra.mxu1 %v8860_v3  ;;  %v8893_v3 = vld [vmem:[#allocation12 + $0x48] sm:$0xff]  }
 0x398   :  { %6512 = vmatprep.subr.bf16.mxu1 %v8865_v50  ;;  %v8894_v50 = vld [vmem:[#allocation12 + $0x8] sm:$0xff]  }
 0x399   :  { %7594 = vmatpush3.bf16.msra.mxu0 %v8888_v53 }
 0x39a   :  { %7595 = vmatprep.subr.bf16.mxu0 %v8889_v35 }
 0x39b   :  { %6513 = vmatpush2.bf16.msra.mxu1 %v8863_v4  ;;  %v8895_v4 = vld [vmem:[#allocation12 + $0x40] sm:$0xff]  }
 0x39c   :  { %6514 = vmatprep.subr.bf16.mxu1 %v8868_v5  ;;  %v8896_v5 = vld [vmem:[#allocation12] sm:$0xff]  }
 0x39d   :  { %7596 = vmatpush3.bf16.msra.mxu0 %v8890_v37 }
 0x39f   :  { %6515 = vmatpush2.bf16.msra.mxu1 %v8866_v6  ;;  %v6320_v6 = vld [vmem:[#allocation11] sm:$0x3] }
 0x3a0   :  { %6516 = vmatprep.subr.bf16.mxu1 %v8871_v13  ;;  %v6325_v13 = vrot.slane %v6320_v6, %v1247_v34 }
 0x3a3   :  { %6517 = vmatpush2.bf16.msra.mxu1 %v8869_v7  ;;  %v6329_v7 = vrot.slane %v6320_v6, %v1251_v62 }
 0x3a4   :  { %6518 = vmatprep.subr.bf16.mxu1 %v8874_v9 }
 0x3a7   :  { %6519 = vmatpush2.bf16.msra.mxu1 %v8872_v8 }
 0x3a8   :  { %6520 = vmatprep.subr.bf16.mxu1 %v8877_v10 }
 0x3ab   :  { %6521 = vmatpush2.bf16.msra.mxu1 %v8875_v12 }
 0x3ac   :  { %6522 = vmatprep.subr.bf16.mxu1 %v8880_v14 }
 0x3af   :  { %6523 = vmatpush2.bf16.msra.mxu1 %v8878_v26 }
 0x3cc   :  { %v6109_v15 = vpop.f32.mrf.mxu0 }
 0x3cd   :  { %v6110_v17 = vadd.f32 %v6109_v15, %v9348_v38  ;;  %v8891_v38 = vld [vmem:[#allocation12 + $0x50] sm:$0xff]  }
 0x3ce   :  { %v6111_v36 = vpop.f32.mrf.mxu0  ;;  %v6150_v11 = vpop.f32.mrf.mxu1  ;;  %7597 = vmatprep.subr.bf16.mxu0 %v8891_v38 }
 0x3cf   :  { %v6112_v40 = vadd.f32 %v6111_v36, %v9350_v44  ;;  %v6151_v18 = vadd.f32 %v6150_v11, %v6110_v17  ;;  %7598 = vmatpush3.bf16.msra.mxu0 %v8892_v2 }
 0x3d0   :  { %v6113_v22 = vpop.f32.mrf.mxu0  ;;  %v6152_v19 = vpop.f32.mrf.mxu1  ;;  %7599 = vmatprep.subr.bf16.mxu0 %v8893_v3 }
 0x3d1   :  { %v6153_v24 = vadd.f32 %v6152_v19, %v6112_v40 }
 0x3d2   :  { %v6114_v25 = vpop.f32.mrf.mxu0  ;;  %v6154_v48 = vpop.f32.mrf.mxu1 }
 0x3d3   :  { %7600 = vmatpush3.bf16.msra.mxu0 %v8894_v50 }
 0x3d4   :  { %v6155_v16 = vpop.f32.mrf.mxu1  ;;  %7601 = vmatprep.subr.bf16.mxu0 %v8895_v4 }
 0x3d7   :  { %7602 = vmatpush3.bf16.msra.mxu0 %v8896_v5 }
 0x40c   :  { %v6191_v56 = vpop.f32.mrf.mxu0 }
 0x40d   :  { %v6192_v49 = vadd.f32 %v6191_v56, %v6151_v18 }
 0x40e   :  { %v6193_v42 = vpop.f32.mrf.mxu0  ;;  %v6232_v44 = vpop.f32.mrf.mxu1 }
 0x40f   :  { %v6194_v52 = vadd.f32 %v6193_v42, %v6153_v24  ;;  %v6233_v54 = vadd.f32 %v6232_v44, %v6192_v49 }
 0x410   :  { %v6195_v55 = vpop.f32.mrf.mxu0  ;;  %v6234_v45 = vpop.f32.mrf.mxu1 }
 0x411   :  { %v6235_v59 = vadd.f32 %v6234_v45, %v6194_v52 }
 0x412   :  { %v6196_v46 = vpop.f32.mrf.mxu0  ;;  %v6236_v58 = vpop.f32.mrf.mxu1 }
 0x414   :  { %v6237_v41 = vpop.f32.mrf.mxu1 }
 0x44c   :  { %v6273_v57 = vpop.f32.mrf.mxu0 }
 0x44d   :  { %v6274_v47 = vadd.f32 %v6273_v57, %v6233_v54 }
 0x44e   :  { %v6275_v60 = vpop.f32.mrf.mxu0 }
 0x44f   :  { %vm6280_vm0 = vcmp.gt.f32.partialorder %v6274_v47, 0.0  ;;  %v6282_v39 = vmul.f32 0.2, %v6274_v47  ;;  %v6276_v51 = vadd.f32 %v6275_v60, %v6235_v59 }
 0x450   :  { %v6277_v61 = vpop.f32.mrf.mxu0 }
 0x451   :  { %vm6281_vm1 = vcmp.gt.f32.partialorder %v6276_v51, 0.0  ;;  %v6283_v20 = vmul.f32 0.2, %v6276_v51  ;;  %v6284_v21 = vsel %vm6280_vm0, %v6274_v47, %v6282_v39 }
 0x452   :  { %v6278_v63 = vpop.f32.mrf.mxu0  ;;  %v6286_v1 = vpack.c.bf16 %v6284_v21, %v6284_v21 }
 0x453   :  { %v6285_v0 = vsel %vm6281_vm1, %v6276_v51, %v6283_v20 }
 0x454   :  { %v6287_v23 = vpack.c.bf16 %v6285_v0, %v6285_v0 }
 0x456   :  { %6524 = vmatprep.mubr.bf16.mxu1 %v6287_v23 }
 0x457   :  { %6525 = vmatmul.mubr.bf16.vlgmr.msra.gmra.mxu1 %v6286_v1 }
 0x517   :  { %v6526_v9 = vpop.f32.mrf.mxu1 }
 0x518   :  { %v6527_v8 = vadd.f32 %v6526_v9, %v6325_v13 }
 0x519   :  { %v6528_v15 = vpop.f32.mrf.mxu1 }
 0x51a   :  { %vm6533_vm2 = vcmp.gt.f32.partialorder %v6527_v8, 0.0  ;;  %v6535_v17 = vmul.f32 0.2, %v6527_v8  ;;  %v6529_v10 = vadd.f32 %v6528_v15, %v6329_v7 }
 0x51b   :  { %v6530_v36 = vpop.f32.mrf.mxu1 }
 0x51c   :  { %vm6534_vm3 = vcmp.gt.f32.partialorder %v6529_v10, 0.0  ;;  %v6536_v11 = vmul.f32 0.2, %v6529_v10  ;;  %v6537_v12 = vsel %vm6533_vm2, %v6527_v8, %v6535_v17 }
 0x51d   :  { %v6531_v40 = vpop.f32.mrf.mxu1  ;;  %v6539_v19 = vpack.c.bf16 %v6537_v12, %v6537_v12 }
 0x51e   :  { %v6538_v18 = vsel %vm6534_vm3, %v6529_v10, %v6536_v11 }
 0x51f   :  { %v6540_v22 = vpack.c.bf16 %v6538_v18, %v6538_v18 }
 0x521   :  { %6703 = vmatprep.mubr.bf16.mxu0 %v6540_v22 }
 0x522   :  { %6704 = vmatmul.mubr.bf16.vlgmr.msra.gmra.mxu0 %v6539_v19 }
 0x5e2   :  { %v7603_v34 = vpop.f32.mrf.mxu0 }
 0x5e4   :  { %v7604_v62 = vpop.f32.mrf.mxu0 }
 0x5e5   :  { %v7605_v24 = vadd.f32 %v7604_v62, %v7603_v34 }
 0x5e6   :  { %v7606_v14 = vpop.f32.mrf.mxu0 }
 0x5e7   :  { %v6706_v25 = vadd.f32 %v7605_v24, %v6574_v43 }
 0x5e8   :  { %v7607_v48 = vpop.f32.mrf.mxu0 }
 0x5e9   :  { %v7586_v26 = vmul.f32 -1.442695, %v6706_v25 }
 0x5eb   :  { %8897 = vpow2.f32 %v7586_v26 }
 0x5f8   :  { %v8898_v16 = vpop.eup %8897 }
 0x5f9   :  { %v6714_v27 = vadd.f32 1.0, %v8898_v16 }
 0x5fb   :  { %8899 = vrcp.f32 %v6714_v27 }
 0x608   :  { %v8900_v28 = vpop.eup %8899 }
 0x609   :  { %v6717_v29 = vpack.c.bf16 %v8900_v28, %v8900_v28 }
 0x60b   :  { %6718 = vst [vmem:[#allocation14] sm:$0x1] %v6717_v29 }
 0x60c   :  { %9032 = shalt.err (!%p9029_p6)
}
 0x60d   :  { %6728 = dma.vmem_to_hbm [thread:$0]  %s6726_s9, 16, %s9371_s7, [#allocation5]  }
 0x60e   :  { %9049 = dma.done.wait [#allocation5], 16  }
 0x60f   :  { %9050 = vsyncadd [#allocation5], 4294967280 }
 0x610   :  { %6732 = vsyncpa [#allocation4], 1 }
 0x611   :  { %6733 = vsyncpa [#allocation7], 1 }
 0x612   :  { %6734 = vsyncpa [#allocation10], 1 }
 0x613   :  { %6735 = vsyncpa [#allocation13], 1 }
 0x614   :  { %6736 = vsyncpa [#allocation5], 1 }

</bundles_post_ra>
